<compile_context>
chip_gen: v7x
topology: tpu7x:2x2x1
jax: 0.10.0
libtpu: 0.0.40
codegen_flags: <defaults>
</compile_context>

<pallas_src>
import functools

import jax
import jax.numpy as jnp
from jax import lax
from jax.experimental import pallas as pl
from jax.experimental.pallas import tpu as pltpu


_SUBLANE_PACK = 16   # bf16 sublane packing: multiples of 16 rows -> free reshape views


def _round_up(x, m):
    return -(-x // m) * m


def _choose_tiling(N, H, target_m=256, prefer_grid=2):
    """Pick (TILE_N, grid, N_pad).

    TILE_N is a multiple of 16 (bf16 sublane tile) so in-kernel reshapes are
    free views; TILE_N*H targets >= 256 matmul rows (fills an MXU pass on
    v6e/v7x, and >= 128 for v5e); the batch grid keeps >= 2 steps when the
    batch allows so v7x megacore can shard the "parallel" axis.
    """
    n_al = _round_up(max(N, 1), _SUBLANE_PACK)
    tile_for_m = _round_up(_round_up(target_m, H) // H, _SUBLANE_PACK)
    tile = min(tile_for_m, n_al)
    grid = -(-n_al // tile)
    if grid < prefer_grid and n_al // _SUBLANE_PACK >= prefer_grid:
        # Trade some M for >=2 grid steps (v7x megacore; latency-bound sizes).
        tile = max(_SUBLANE_PACK, (n_al // prefer_grid) // _SUBLANE_PACK * _SUBLANE_PACK)
        grid = -(-n_al // tile)
    return tile, grid, grid * tile


def _residual_block_kernel(x_ref, t1_ref, s1_ref, b1_ref, t2_ref, s2_ref, b2_ref,
                           o_ref, mid_s, *, TILE_N, H, WC):
    """One batch tile per grid step, fused lane-dense (H+2, TILE_N, W*C) layout.

    x_ref : (H+2, TILE_N, WC) bf16  input, zero H-halo already padded in HBM
    t*_ref: (3, WC, WC)       bf16  banded block-Toeplitz conv weights (per kh)
    s*/b* : (1, WC)           f32   folded BN scale / bias, tiled along lanes
    o_ref : (H+2, TILE_N, WC) bf16  output (zero H-halo written by the kernel)
    mid_s : (H+2, TILE_N, WC) bf16  VMEM scratch: H-padded intermediate
    """
    M = H * TILE_N

    def conv3x3(src_ref, t_ref):
        # sum_kh (M, WC) @ (WC, WC) -- bf16 operands, f32 accumulation.
        # Each kh slice is H*TILE_N contiguous rows -> reshape is a free view.
        acc = None
        for kh in range(3):
            lhs = src_ref[kh:kh + H].reshape(M, WC)
            part = jnp.dot(lhs, t_ref[kh], preferred_element_type=jnp.float32)
            acc = part if acc is None else acc + part
        return acc                                       # (M, WC) f32

    # Re-zero the 2 H-halo rows of the scratch every step (scratch persists
    # across the "parallel" grid axis; do NOT guard this with program_id == 0).
    zrow = jnp.zeros((1, TILE_N, WC), mid_s.dtype)
    mid_s[0:1] = zrow
    mid_s[H + 1:H + 2] = zrow

    # conv1 -> folded BN1 -> ReLU (f32 elementwise), stored bf16 for conv2.
    y = jnp.maximum(conv3x3(x_ref, t1_ref) * s1_ref[...] + b1_ref[...], 0.0)
    mid_s[1:H + 1] = y.astype(mid_s.dtype).reshape(H, TILE_N, WC)

    # conv2 -> folded BN2 -> +residual -> ReLU (f32 elementwise).
    z = conv3x3(mid_s, t2_ref) * s2_ref[...] + b2_ref[...]
    res = x_ref[1:H + 1].reshape(M, WC).astype(jnp.float32)
    out = jnp.maximum(z + res, 0.0)

    # Output carries the zero H-halo so blocks chain in the fused layout.
    zrow_o = jnp.zeros((1, TILE_N, WC), o_ref.dtype)
    o_ref[0:1] = zrow_o
    o_ref[H + 1:H + 2] = zrow_o
    o_ref[1:H + 1] = out.astype(o_ref.dtype).reshape(H, TILE_N, WC)


def _toeplitz_weights(w_oihw, W, dtype=jnp.bfloat16):
    """(C_out, C_in, 3, 3) OIHW conv weight -> (3, W*C_in, W*C_out) banded mats.

    T_kh[wi*Cin + ci, w*Cout + co] = w[co, ci, kh, wi - w + 1] for 0 <= wi-w+1 < 3,
    so one conv row is  out_row(h) = sum_kh  x_row(h+kh-1) @ T_kh, with the
    W-direction zero padding absorbed by the clipped band.
    """
    C_out, C_in, _, _ = w_oihw.shape
    mats = []
    for kh in range(3):
        T = jnp.zeros((W * C_in, W * C_out), jnp.float32)
        for w in range(W):
            for kw in range(3):
                wi = w + kw - 1
                if 0 <= wi < W:
                    blk = jnp.transpose(w_oihw[:, :, kh, kw])      # (C_in, C_out)
                    T = T.at[wi * C_in:(wi + 1) * C_in,
                             w * C_out:(w + 1) * C_out].set(blk)
        mats.append(T)
    return jnp.stack(mats).astype(dtype)


def _fold_bn(conv_b, gamma, beta, mean, var, eps, W):
    """Fold conv bias + eval-mode BN into (scale, bias), tiled to W*C lanes."""
    scale = gamma / jnp.sqrt(var + eps)
    bias = beta + scale * (conv_b - mean)
    return (jnp.tile(scale, W).reshape(1, -1).astype(jnp.float32),
            jnp.tile(bias, W).reshape(1, -1).astype(jnp.float32))


def prepare_block_params(params, W, eps=1e-5):
    """Precompute Toeplitz weights + folded BN affine for one residual block."""
    s1, b1 = _fold_bn(params["b1"], params["g1"], params["beta1"],
                      params["m1"], params["v1"], eps, W)
    s2, b2 = _fold_bn(params["b2"], params["g2"], params["beta2"],
                      params["m2"], params["v2"], eps, W)
    return {"T1": _toeplitz_weights(params["w1"], W),
            "T2": _toeplitz_weights(params["w2"], W),
            "s1": s1, "b1": b1, "s2": s2, "b2": b2}


def _build_residual_call(H, n_pad, WC, TILE_N, act_dtype, single_buffer_consts):
    # Constant-index blocks (weights, scale/bias) never change across grid steps;
    # single-buffer them to avoid a useless second ~384 KiB Toeplitz copy.
    const_kw = {"pipeline_mode": pl.Buffered(1)} if single_buffer_consts else {}
    kernel = functools.partial(_residual_block_kernel, TILE_N=TILE_N, H=H, WC=WC)
    act_spec = pl.BlockSpec((H + 2, TILE_N, WC), lambda n: (0, n, 0))
    return pl.pallas_call(
        kernel,
        out_shape=jax.ShapeDtypeStruct((H + 2, n_pad, WC), act_dtype),
        grid_spec=pltpu.PrefetchScalarGridSpec(
            num_scalar_prefetch=0,
            grid=(n_pad // TILE_N,),
            in_specs=[
                act_spec,                                                  # x (fused, H-padded)
                pl.BlockSpec((3, WC, WC), lambda n: (0, 0, 0), **const_kw),  # T1
                pl.BlockSpec((1, WC), lambda n: (0, 0), **const_kw),         # scale1
                pl.BlockSpec((1, WC), lambda n: (0, 0), **const_kw),         # bias1
                pl.BlockSpec((3, WC, WC), lambda n: (0, 0, 0), **const_kw),  # T2
                pl.BlockSpec((1, WC), lambda n: (0, 0), **const_kw),         # scale2
                pl.BlockSpec((1, WC), lambda n: (0, 0), **const_kw),         # bias2
            ],
            out_specs=act_spec,
            scratch_shapes=[pltpu.VMEM((H + 2, TILE_N, WC), act_dtype)],
        ),
        compiler_params=pltpu.CompilerParams(dimension_semantics=("parallel",)),
    )


def residual_block_fused(x_pad_fused, prep):
    """One residual block on the fused layout.

    x_pad_fused: (H+2, N_pad, W*C) bf16, rows 0 / H+1 zero (H halo), N_pad a
    multiple of 16.  Returns the same shape/dtype (halo rows zero), so calls
    can be chained without any NCHW round-trip between blocks.
    """
    H2, n_pad, WC = x_pad_fused.shape
    H = H2 - 2
    TILE_N, _, n_pad2 = _choose_tiling(n_pad, H)
    if n_pad2 != n_pad:
        raise ValueError("fused batch dim must match _choose_tiling padding")
    args = (x_pad_fused, prep["T1"], prep["s1"], prep["b1"],
            prep["T2"], prep["s2"], prep["b2"])
    try:
        return _build_residual_call(H, n_pad, WC, TILE_N, x_pad_fused.dtype, True)(*args)
    except Exception:
        # Fallback if this jax build rejects pl.Buffered(1): default buffering.
        return _build_residual_call(H, n_pad, WC, TILE_N, x_pad_fused.dtype, False)(*args)


def residual_block_forward(x_nchw, params, eps=1e-5):
    """Pallas forward. x_nchw: (N, C, H, W) float32 -> (N, C, H, W) float32."""
    N, C, H, W = x_nchw.shape
    WC = W * C
    prep = prepare_block_params(params, W, eps)
    _, _, n_pad = _choose_tiling(N, H)

    # NCHW -> lane-dense fused (H, N, W*C) bf16, then HBM-side H-halo + batch pad.
    x_f = jnp.transpose(x_nchw, (2, 0, 3, 1)).reshape(H, N, WC).astype(jnp.bfloat16)
    x_f = jnp.pad(x_f, ((1, 1), (0, n_pad - N), (0, 0)))

    out_f = residual_block_fused(x_f, prep)

    out = out_f[1:H + 1, :N, :].reshape(H, N, W, C)
    return jnp.transpose(out, (1, 3, 0, 2)).astype(jnp.float32)


def residual_block_reference(x, params, eps=1e-5, conv_dtype=jnp.float32):
    """Pure-JAX NCHW reference mirroring the PyTorch module (BN in eval mode).

    conv_dtype=bfloat16 mirrors the kernel's bf16 MXU operands (f32 accumulation).
    """
    def conv(inp, w, b):
        y = lax.conv_general_dilated(
            inp.astype(conv_dtype), w.astype(conv_dtype),
            window_strides=(1, 1), padding=((1, 1), (1, 1)),
            dimension_numbers=("NCHW", "OIHW", "NCHW"),
            preferred_element_type=jnp.float32,
            precision=lax.Precision.HIGHEST)
        return y + b.reshape(1, -1, 1, 1)

    def bn(inp, g, beta, m, v):
        g, beta, m, v = (t.reshape(1, -1, 1, 1) for t in (g, beta, m, v))
        return (inp - m) / jnp.sqrt(v + eps) * g + beta

    y = conv(x, params["w1"], params["b1"])
    y = jnp.maximum(bn(y, params["g1"], params["beta1"], params["m1"], params["v1"]), 0.0)
    y = conv(y, params["w2"], params["b2"])
    y = bn(y, params["g2"], params["beta2"], params["m2"], params["v2"])
    return jnp.maximum(y + x, 0.0)


def init_params(key, C):
    ks = jax.random.split(key, 10)
    return {
        "w1": 0.1 * jax.random.normal(ks[0], (C, C, 3, 3), jnp.float32),   # OIHW
        "b1": 0.05 * jax.random.normal(ks[1], (C,), jnp.float32),
        "g1": 1.0 + 0.1 * jax.random.normal(ks[2], (C,), jnp.float32),
        "beta1": 0.1 * jax.random.normal(ks[3], (C,), jnp.float32),
        "m1": 0.1 * jax.random.normal(ks[4], (C,), jnp.float32),
        "v1": jax.random.uniform(ks[5], (C,), jnp.float32, 0.5, 1.5),
        "w2": 0.1 * jax.random.normal(ks[6], (C, C, 3, 3), jnp.float32),
        "b2": 0.05 * jax.random.normal(ks[7], (C,), jnp.float32),
        "g2": 1.0 + 0.1 * jax.random.normal(ks[8], (C,), jnp.float32),
        "beta2": 0.1 * jax.random.normal(ks[9], (C,), jnp.float32),
        "m2": 0.1 * jax.random.normal(ks[4] + 1, (C,), jnp.float32),
        "v2": jax.random.uniform(ks[5] + 1, (C,), jnp.float32, 0.5, 1.5),
    }


if __name__ == "__main__":
    # Module-consistent small shapes: batch=2, channels=32 (module default),
    # 8x8 board (checkers).
    N, C, H, W = 2, 32, 8, 8
    key = jax.random.PRNGKey(0)
    kx, kp = jax.random.split(key)
    x = jax.random.normal(kx, (N, C, H, W), jnp.float32)   # NCHW, like PyTorch
    params = init_params(kp, C)

    out = jax.block_until_ready(residual_block_forward(x, params))

    # Tight check vs. a reference that mirrors the kernel's bf16 operands and
    # bf16-quantized input/residual (f32 accumulation); loose check vs. the
    # pure-f32 PyTorch-equivalent math.
    x_q = x.astype(jnp.bfloat16).astype(jnp.float32)
    ref_bf16 = residual_block_reference(x_q, params, conv_dtype=jnp.bfloat16)
    ref_f32 = residual_block_reference(x, params, conv_dtype=jnp.float32)

    assert out.shape == (N, C, H, W) and out.dtype == jnp.float32
    assert jnp.allclose(out, ref_bf16, rtol=1e-2, atol=1e-2), \
        float(jnp.max(jnp.abs(out - ref_bf16)))
    assert jnp.allclose(out, ref_f32, rtol=6e-2, atol=6e-2), \
        float(jnp.max(jnp.abs(out - ref_f32)))
    print("KERNEL_OK")
</pallas_src>

<mosaic_0001>
module attributes {stable_mosaic.version = 11 : i64} {
  func.func @_residual_block_kernel(%arg0: i32, %arg1: memref<10x16x256xbf16, #tpu.memory_space<vmem>>, %arg2: memref<3x256x256xbf16, #tpu.memory_space<vmem>>, %arg3: memref<1x256xf32, #tpu.memory_space<vmem>>, %arg4: memref<1x256xf32, #tpu.memory_space<vmem>>, %arg5: memref<3x256x256xbf16, #tpu.memory_space<vmem>>, %arg6: memref<1x256xf32, #tpu.memory_space<vmem>>, %arg7: memref<1x256xf32, #tpu.memory_space<vmem>>, %arg8: memref<10x16x256xbf16, #tpu.memory_space<vmem>>, %arg9: memref<10x16x256xbf16, #tpu.memory_space<vmem>>) attributes {dimension_semantics = [#tpu.dimension_semantics<parallel>], iteration_bounds = array<i64: 1>, scalar_prefetch = 0 : i64, scratch_operands = 1 : i64, tpu.core_type = #tpu.core_type<tc>, window_params = [{transform_indices = @transform_0, window_bounds = array<i64: 10, 16, 256>}, {pipeline_mode = #tpu.pipeline_mode<synchronous>, transform_indices = @transform_1, window_bounds = array<i64: 3, 256, 256>}, {pipeline_mode = #tpu.pipeline_mode<synchronous>, transform_indices = @transform_2, window_bounds = array<i64: 1, 256>}, {pipeline_mode = #tpu.pipeline_mode<synchronous>, transform_indices = @transform_3, window_bounds = array<i64: 1, 256>}, {pipeline_mode = #tpu.pipeline_mode<synchronous>, transform_indices = @transform_4, window_bounds = array<i64: 3, 256, 256>}, {pipeline_mode = #tpu.pipeline_mode<synchronous>, transform_indices = @transform_5, window_bounds = array<i64: 1, 256>}, {pipeline_mode = #tpu.pipeline_mode<synchronous>, transform_indices = @transform_6, window_bounds = array<i64: 1, 256>}, {transform_indices = @transform_7, window_bounds = array<i64: 10, 16, 256>}]} {
    %cst = arith.constant 0.000000e+00 : bf16
    %0 = vector.broadcast %cst : bf16 to vector<1x16x256xbf16>
    %c0 = arith.constant 0 : index
    %c0_0 = arith.constant 0 : index
    %c0_1 = arith.constant 0 : index
    %1 = vector.load %arg9[%c0, %c0_0, %c0_1] : memref<10x16x256xbf16, #tpu.memory_space<vmem>>, vector<1x16x256xbf16>
    tpu.vector_store %arg9[%c0, %c0_0, %c0_1], %0 {strides = array<i32>} : memref<10x16x256xbf16, #tpu.memory_space<vmem>>, vector<1x16x256xbf16>,
    %c9 = arith.constant 9 : index
    %c0_2 = arith.constant 0 : index
    %c0_3 = arith.constant 0 : index
    %2 = vector.load %arg9[%c9, %c0_2, %c0_3] : memref<10x16x256xbf16, #tpu.memory_space<vmem>>, vector<1x16x256xbf16>
    tpu.vector_store %arg9[%c9, %c0_2, %c0_3], %0 {strides = array<i32>} : memref<10x16x256xbf16, #tpu.memory_space<vmem>>, vector<1x16x256xbf16>,
    %c0_4 = arith.constant 0 : index
    %c0_5 = arith.constant 0 : index
    %c0_6 = arith.constant 0 : index
    %3 = vector.load %arg1[%c0_4, %c0_5, %c0_6] : memref<10x16x256xbf16, #tpu.memory_space<vmem>>, vector<8x16x256xbf16>
    %4 = vector.shape_cast %3 : vector<8x16x256xbf16> to vector<128x256xbf16>
    %c0_7 = arith.constant 0 : index
    %c0_8 = arith.constant 0 : index
    %c0_9 = arith.constant 0 : index
    %5 = vector.load %arg2[%c0_7, %c0_8, %c0_9] : memref<3x256x256xbf16, #tpu.memory_space<vmem>>, vector<1x256x256xbf16>
    %6 = vector.shape_cast %5 : vector<1x256x256xbf16> to vector<256x256xbf16>
    %cst_10 = arith.constant dense<0.000000e+00> : vector<128x256xf32>
    %7 = tpu.matmul %4, %6, %cst_10 {dimension_numbers = #tpu.dot_dimension_numbers<[1], [0], [0], [1], [0, 0, 1, 1], [], []>} : vector<128x256xbf16>, vector<256x256xbf16>, vector<128x256xf32> -> vector<128x256xf32>
    %c1 = arith.constant 1 : index
    %c0_11 = arith.constant 0 : index
    %c0_12 = arith.constant 0 : index
    %8 = vector.load %arg1[%c1, %c0_11, %c0_12] : memref<10x16x256xbf16, #tpu.memory_space<vmem>>, vector<8x16x256xbf16>
    %9 = vector.shape_cast %8 : vector<8x16x256xbf16> to vector<128x256xbf16>
    %c1_13 = arith.constant 1 : index
    %c0_14 = arith.constant 0 : index
    %c0_15 = arith.constant 0 : index
    %10 = vector.load %arg2[%c1_13, %c0_14, %c0_15] : memref<3x256x256xbf16, #tpu.memory_space<vmem>>, vector<1x256x256xbf16>
    %11 = vector.shape_cast %10 : vector<1x256x256xbf16> to vector<256x256xbf16>
    %cst_16 = arith.constant dense<0.000000e+00> : vector<128x256xf32>
    %12 = tpu.matmul %9, %11, %cst_16 {dimension_numbers = #tpu.dot_dimension_numbers<[1], [0], [0], [1], [0, 0, 1, 1], [], []>} : vector<128x256xbf16>, vector<256x256xbf16>, vector<128x256xf32> -> vector<128x256xf32>
    %13 = arith.addf %7, %12 : vector<128x256xf32>
    %c2 = arith.constant 2 : index
    %c0_17 = arith.constant 0 : index
    %c0_18 = arith.constant 0 : index
    %14 = vector.load %arg1[%c2, %c0_17, %c0_18] : memref<10x16x256xbf16, #tpu.memory_space<vmem>>, vector<8x16x256xbf16>
    %15 = vector.shape_cast %14 : vector<8x16x256xbf16> to vector<128x256xbf16>
    %c2_19 = arith.constant 2 : index
    %c0_20 = arith.constant 0 : index
    %c0_21 = arith.constant 0 : index
    %16 = vector.load %arg2[%c2_19, %c0_20, %c0_21] : memref<3x256x256xbf16, #tpu.memory_space<vmem>>, vector<1x256x256xbf16>
    %17 = vector.shape_cast %16 : vector<1x256x256xbf16> to vector<256x256xbf16>
    %cst_22 = arith.constant dense<0.000000e+00> : vector<128x256xf32>
    %18 = tpu.matmul %15, %17, %cst_22 {dimension_numbers = #tpu.dot_dimension_numbers<[1], [0], [0], [1], [0, 0, 1, 1], [], []>} : vector<128x256xbf16>, vector<256x256xbf16>, vector<128x256xf32> -> vector<128x256xf32>
    %19 = arith.addf %13, %18 : vector<128x256xf32>
    %c0_23 = arith.constant 0 : index
    %c0_24 = arith.constant 0 : index
    %20 = vector.load %arg3[%c0_23, %c0_24] : memref<1x256xf32, #tpu.memory_space<vmem>>, vector<1x256xf32>
    %21 = vector.broadcast %20 : vector<1x256xf32> to vector<128x256xf32>
    %22 = arith.mulf %19, %21 : vector<128x256xf32>
    %c0_25 = arith.constant 0 : index
    %c0_26 = arith.constant 0 : index
    %23 = vector.load %arg4[%c0_25, %c0_26] : memref<1x256xf32, #tpu.memory_space<vmem>>, vector<1x256xf32>
    %24 = vector.broadcast %23 : vector<1x256xf32> to vector<128x256xf32>
    %25 = arith.addf %22, %24 : vector<128x256xf32>
    %cst_27 = arith.constant 0.000000e+00 : f32
    %26 = vector.broadcast %cst_27 : f32 to vector<128x256xf32>
    %27 = arith.maximumf %25, %26 : vector<128x256xf32>
    %28 = arith.truncf %27 : vector<128x256xf32> to vector<128x256xbf16>
    %29 = vector.shape_cast %28 : vector<128x256xbf16> to vector<8x16x256xbf16>
    %c1_28 = arith.constant 1 : index
    %c0_29 = arith.constant 0 : index
    %c0_30 = arith.constant 0 : index
    %30 = vector.load %arg9[%c1_28, %c0_29, %c0_30] : memref<10x16x256xbf16, #tpu.memory_space<vmem>>, vector<8x16x256xbf16>
    tpu.vector_store %arg9[%c1_28, %c0_29, %c0_30], %29 {strides = array<i32>} : memref<10x16x256xbf16, #tpu.memory_space<vmem>>, vector<8x16x256xbf16>,
    %c0_31 = arith.constant 0 : index
    %c0_32 = arith.constant 0 : index
    %c0_33 = arith.constant 0 : index
    %31 = vector.load %arg9[%c0_31, %c0_32, %c0_33] : memref<10x16x256xbf16, #tpu.memory_space<vmem>>, vector<8x16x256xbf16>
    %32 = vector.shape_cast %31 : vector<8x16x256xbf16> to vector<128x256xbf16>
    %c0_34 = arith.constant 0 : index
    %c0_35 = arith.constant 0 : index
    %c0_36 = arith.constant 0 : index
    %33 = vector.load %arg5[%c0_34, %c0_35, %c0_36] : memref<3x256x256xbf16, #tpu.memory_space<vmem>>, vector<1x256x256xbf16>
    %34 = vector.shape_cast %33 : vector<1x256x256xbf16> to vector<256x256xbf16>
    %cst_37 = arith.constant dense<0.000000e+00> : vector<128x256xf32>
    %35 = tpu.matmul %32, %34, %cst_37 {dimension_numbers = #tpu.dot_dimension_numbers<[1], [0], [0], [1], [0, 0, 1, 1], [], []>} : vector<128x256xbf16>, vector<256x256xbf16>, vector<128x256xf32> -> vector<128x256xf32>
    %c1_38 = arith.constant 1 : index
    %c0_39 = arith.constant 0 : index
    %c0_40 = arith.constant 0 : index
    %36 = vector.load %arg9[%c1_38, %c0_39, %c0_40] : memref<10x16x256xbf16, #tpu.memory_space<vmem>>, vector<8x16x256xbf16>
    %37 = vector.shape_cast %36 : vector<8x16x256xbf16> to vector<128x256xbf16>
    %c1_41 = arith.constant 1 : index
    %c0_42 = arith.constant 0 : index
    %c0_43 = arith.constant 0 : index
    %38 = vector.load %arg5[%c1_41, %c0_42, %c0_43] : memref<3x256x256xbf16, #tpu.memory_space<vmem>>, vector<1x256x256xbf16>
    %39 = vector.shape_cast %38 : vector<1x256x256xbf16> to vector<256x256xbf16>
    %cst_44 = arith.constant dense<0.000000e+00> : vector<128x256xf32>
    %40 = tpu.matmul %37, %39, %cst_44 {dimension_numbers = #tpu.dot_dimension_numbers<[1], [0], [0], [1], [0, 0, 1, 1], [], []>} : vector<128x256xbf16>, vector<256x256xbf16>, vector<128x256xf32> -> vector<128x256xf32>
    %41 = arith.addf %35, %40 : vector<128x256xf32>
    %c2_45 = arith.constant 2 : index
    %c0_46 = arith.constant 0 : index
    %c0_47 = arith.constant 0 : index
    %42 = vector.load %arg9[%c2_45, %c0_46, %c0_47] : memref<10x16x256xbf16, #tpu.memory_space<vmem>>, vector<8x16x256xbf16>
    %43 = vector.shape_cast %42 : vector<8x16x256xbf16> to vector<128x256xbf16>
    %c2_48 = arith.constant 2 : index
    %c0_49 = arith.constant 0 : index
    %c0_50 = arith.constant 0 : index
    %44 = vector.load %arg5[%c2_48, %c0_49, %c0_50] : memref<3x256x256xbf16, #tpu.memory_space<vmem>>, vector<1x256x256xbf16>
    %45 = vector.shape_cast %44 : vector<1x256x256xbf16> to vector<256x256xbf16>
    %cst_51 = arith.constant dense<0.000000e+00> : vector<128x256xf32>
    %46 = tpu.matmul %43, %45, %cst_51 {dimension_numbers = #tpu.dot_dimension_numbers<[1], [0], [0], [1], [0, 0, 1, 1], [], []>} : vector<128x256xbf16>, vector<256x256xbf16>, vector<128x256xf32> -> vector<128x256xf32>
    %47 = arith.addf %41, %46 : vector<128x256xf32>
    %c0_52 = arith.constant 0 : index
    %c0_53 = arith.constant 0 : index
    %48 = vector.load %arg6[%c0_52, %c0_53] : memref<1x256xf32, #tpu.memory_space<vmem>>, vector<1x256xf32>
    %49 = vector.broadcast %48 : vector<1x256xf32> to vector<128x256xf32>
    %50 = arith.mulf %47, %49 : vector<128x256xf32>
    %c0_54 = arith.constant 0 : index
    %c0_55 = arith.constant 0 : index
    %51 = vector.load %arg7[%c0_54, %c0_55] : memref<1x256xf32, #tpu.memory_space<vmem>>, vector<1x256xf32>
    %52 = vector.broadcast %51 : vector<1x256xf32> to vector<128x256xf32>
    %53 = arith.addf %50, %52 : vector<128x256xf32>
    %c1_56 = arith.constant 1 : index
    %c0_57 = arith.constant 0 : index
    %c0_58 = arith.constant 0 : index
    %54 = vector.load %arg1[%c1_56, %c0_57, %c0_58] : memref<10x16x256xbf16, #tpu.memory_space<vmem>>, vector<8x16x256xbf16>
    %55 = vector.shape_cast %54 : vector<8x16x256xbf16> to vector<128x256xbf16>
    %56 = arith.extf %55 : vector<128x256xbf16> to vector<128x256xf32>
    %57 = arith.addf %53, %56 : vector<128x256xf32>
    %cst_59 = arith.constant 0.000000e+00 : f32
    %58 = vector.broadcast %cst_59 : f32 to vector<128x256xf32>
    %59 = arith.maximumf %57, %58 : vector<128x256xf32>
    %cst_60 = arith.constant 0.000000e+00 : bf16
    %60 = vector.broadcast %cst_60 : bf16 to vector<1x16x256xbf16>
    %c0_61 = arith.constant 0 : index
    %c0_62 = arith.constant 0 : index
    %c0_63 = arith.constant 0 : index
    %61 = vector.load %arg8[%c0_61, %c0_62, %c0_63] : memref<10x16x256xbf16, #tpu.memory_space<vmem>>, vector<1x16x256xbf16>
    tpu.vector_store %arg8[%c0_61, %c0_62, %c0_63], %60 {strides = array<i32>} : memref<10x16x256xbf16, #tpu.memory_space<vmem>>, vector<1x16x256xbf16>,
    %c9_64 = arith.constant 9 : index
    %c0_65 = arith.constant 0 : index
    %c0_66 = arith.constant 0 : index
    %62 = vector.load %arg8[%c9_64, %c0_65, %c0_66] : memref<10x16x256xbf16, #tpu.memory_space<vmem>>, vector<1x16x256xbf16>
    tpu.vector_store %arg8[%c9_64, %c0_65, %c0_66], %60 {strides = array<i32>} : memref<10x16x256xbf16, #tpu.memory_space<vmem>>, vector<1x16x256xbf16>,
    %63 = arith.truncf %59 : vector<128x256xf32> to vector<128x256xbf16>
    %64 = vector.shape_cast %63 : vector<128x256xbf16> to vector<8x16x256xbf16>
    %c1_67 = arith.constant 1 : index
    %c0_68 = arith.constant 0 : index
    %c0_69 = arith.constant 0 : index
    %65 = vector.load %arg8[%c1_67, %c0_68, %c0_69] : memref<10x16x256xbf16, #tpu.memory_space<vmem>>, vector<8x16x256xbf16>
    tpu.vector_store %arg8[%c1_67, %c0_68, %c0_69], %64 {strides = array<i32>} : memref<10x16x256xbf16, #tpu.memory_space<vmem>>, vector<8x16x256xbf16>,
    return
  }
  func.func @transform_0(%arg0: i32) -> (i32, i32, i32) {
    %c0_i32 = arith.constant 0 : i32
    %c0_i32_0 = arith.constant 0 : i32
    %c0_i32_1 = arith.constant 0 : i32
    return %c0_i32, %arg0, %c0_i32_0 : i32, i32, i32
  }
  func.func @transform_1(%arg0: i32) -> (i32, i32, i32) {
    %c0_i32 = arith.constant 0 : i32
    %c0_i32_0 = arith.constant 0 : i32
    %c0_i32_1 = arith.constant 0 : i32
    %c0_i32_2 = arith.constant 0 : i32
    return %c0_i32, %c0_i32_0, %c0_i32_1 : i32, i32, i32
  }
  func.func @transform_2(%arg0: i32) -> (i32, i32) {
    %c0_i32 = arith.constant 0 : i32
    %c0_i32_0 = arith.constant 0 : i32
    %c0_i32_1 = arith.constant 0 : i32
    return %c0_i32, %c0_i32_0 : i32, i32
  }
  func.func @transform_3(%arg0: i32) -> (i32, i32) {
    %c0_i32 = arith.constant 0 : i32
    %c0_i32_0 = arith.constant 0 : i32
    %c0_i32_1 = arith.constant 0 : i32
    return %c0_i32, %c0_i32_0 : i32, i32
  }
  func.func @transform_4(%arg0: i32) -> (i32, i32, i32) {
    %c0_i32 = arith.constant 0 : i32
    %c0_i32_0 = arith.constant 0 : i32
    %c0_i32_1 = arith.constant 0 : i32
    %c0_i32_2 = arith.constant 0 : i32
    return %c0_i32, %c0_i32_0, %c0_i32_1 : i32, i32, i32
  }
  func.func @transform_5(%arg0: i32) -> (i32, i32) {
    %c0_i32 = arith.constant 0 : i32
    %c0_i32_0 = arith.constant 0 : i32
    %c0_i32_1 = arith.constant 0 : i32
    return %c0_i32, %c0_i32_0 : i32, i32
  }
  func.func @transform_6(%arg0: i32) -> (i32, i32) {
    %c0_i32 = arith.constant 0 : i32
    %c0_i32_0 = arith.constant 0 : i32
    %c0_i32_1 = arith.constant 0 : i32
    return %c0_i32, %c0_i32_0 : i32, i32
  }
  func.func @transform_7(%arg0: i32) -> (i32, i32, i32) {
    %c0_i32 = arith.constant 0 : i32
    %c0_i32_0 = arith.constant 0 : i32
    %c0_i32_1 = arith.constant 0 : i32
    return %c0_i32, %arg0, %c0_i32_0 : i32, i32, i32
  }
}

module attributes {stable_mosaic.version = 11 : i64} {
  func.func @_residual_block_kernel(%arg0: i32, %arg1: memref<10x16x256xbf16, #tpu.memory_space<vmem>>, %arg2: memref<3x256x256xbf16, #tpu.memory_space<vmem>>, %arg3: memref<1x256xf32, #tpu.memory_space<vmem>>, %arg4: memref<1x256xf32, #tpu.memory_space<vmem>>, %arg5: memref<3x256x256xbf16, #tpu.memory_space<vmem>>, %arg6: memref<1x256xf32, #tpu.memory_space<vmem>>, %arg7: memref<1x256xf32, #tpu.memory_space<vmem>>, %arg8: memref<10x16x256xbf16, #tpu.memory_space<vmem>>, %arg9: memref<10x16x256xbf16, #tpu.memory_space<vmem>>) attributes {dimension_semantics = [#tpu.dimension_semantics<parallel>], iteration_bounds = array<i64: 1>, scalar_prefetch = 0 : i64, scratch_operands = 1 : i64, tpu.core_type = #tpu.core_type<tc>, window_params = [{transform_indices = @transform_0, window_bounds = array<i64: 10, 16, 256>}, {pipeline_mode = #tpu.pipeline_mode<synchronous>, transform_indices = @transform_1, window_bounds = array<i64: 3, 256, 256>}, {pipeline_mode = #tpu.pipeline_mode<synchronous>, transform_indices = @transform_2, window_bounds = array<i64: 1, 256>}, {pipeline_mode = #tpu.pipeline_mode<synchronous>, transform_indices = @transform_3, window_bounds = array<i64: 1, 256>}, {pipeline_mode = #tpu.pipeline_mode<synchronous>, transform_indices = @transform_4, window_bounds = array<i64: 3, 256, 256>}, {pipeline_mode = #tpu.pipeline_mode<synchronous>, transform_indices = @transform_5, window_bounds = array<i64: 1, 256>}, {pipeline_mode = #tpu.pipeline_mode<synchronous>, transform_indices = @transform_6, window_bounds = array<i64: 1, 256>}, {transform_indices = @transform_7, window_bounds = array<i64: 10, 16, 256>}]} {
    %cst = arith.constant 0.000000e+00 : bf16
    %0 = vector.broadcast %cst : bf16 to vector<1x16x256xbf16>
    %c0 = arith.constant 0 : index
    %c0_0 = arith.constant 0 : index
    %c0_1 = arith.constant 0 : index
    %1 = vector.load %arg9[%c0, %c0_0, %c0_1] : memref<10x16x256xbf16, #tpu.memory_space<vmem>>, vector<1x16x256xbf16>
    tpu.vector_store %arg9[%c0, %c0_0, %c0_1], %0 {strides = array<i32>} : memref<10x16x256xbf16, #tpu.memory_space<vmem>>, vector<1x16x256xbf16>,
    %c9 = arith.constant 9 : index
    %c0_2 = arith.constant 0 : index
    %c0_3 = arith.constant 0 : index
    %2 = vector.load %arg9[%c9, %c0_2, %c0_3] : memref<10x16x256xbf16, #tpu.memory_space<vmem>>, vector<1x16x256xbf16>
    tpu.vector_store %arg9[%c9, %c0_2, %c0_3], %0 {strides = array<i32>} : memref<10x16x256xbf16, #tpu.memory_space<vmem>>, vector<1x16x256xbf16>,
    %c0_4 = arith.constant 0 : index
    %c0_5 = arith.constant 0 : index
    %c0_6 = arith.constant 0 : index
    %3 = vector.load %arg1[%c0_4, %c0_5, %c0_6] : memref<10x16x256xbf16, #tpu.memory_space<vmem>>, vector<8x16x256xbf16>
    %4 = vector.shape_cast %3 : vector<8x16x256xbf16> to vector<128x256xbf16>
    %c0_7 = arith.constant 0 : index
    %c0_8 = arith.constant 0 : index
    %c0_9 = arith.constant 0 : index
    %5 = vector.load %arg2[%c0_7, %c0_8, %c0_9] : memref<3x256x256xbf16, #tpu.memory_space<vmem>>, vector<1x256x256xbf16>
    %6 = vector.shape_cast %5 : vector<1x256x256xbf16> to vector<256x256xbf16>
    %cst_10 = arith.constant dense<0.000000e+00> : vector<128x256xf32>
    %7 = tpu.matmul %4, %6, %cst_10 {dimension_numbers = #tpu.dot_dimension_numbers<[1], [0], [0], [1], [0, 0, 1, 1], [], []>} : vector<128x256xbf16>, vector<256x256xbf16>, vector<128x256xf32> -> vector<128x256xf32>
    %c1 = arith.constant 1 : index
    %c0_11 = arith.constant 0 : index
    %c0_12 = arith.constant 0 : index
    %8 = vector.load %arg1[%c1, %c0_11, %c0_12] : memref<10x16x256xbf16, #tpu.memory_space<vmem>>, vector<8x16x256xbf16>
    %9 = vector.shape_cast %8 : vector<8x16x256xbf16> to vector<128x256xbf16>
    %c1_13 = arith.constant 1 : index
    %c0_14 = arith.constant 0 : index
    %c0_15 = arith.constant 0 : index
    %10 = vector.load %arg2[%c1_13, %c0_14, %c0_15] : memref<3x256x256xbf16, #tpu.memory_space<vmem>>, vector<1x256x256xbf16>
    %11 = vector.shape_cast %10 : vector<1x256x256xbf16> to vector<256x256xbf16>
    %cst_16 = arith.constant dense<0.000000e+00> : vector<128x256xf32>
    %12 = tpu.matmul %9, %11, %cst_16 {dimension_numbers = #tpu.dot_dimension_numbers<[1], [0], [0], [1], [0, 0, 1, 1], [], []>} : vector<128x256xbf16>, vector<256x256xbf16>, vector<128x256xf32> -> vector<128x256xf32>
    %13 = arith.addf %7, %12 : vector<128x256xf32>
    %c2 = arith.constant 2 : index
    %c0_17 = arith.constant 0 : index
    %c0_18 = arith.constant 0 : index
    %14 = vector.load %arg1[%c2, %c0_17, %c0_18] : memref<10x16x256xbf16, #tpu.memory_space<vmem>>, vector<8x16x256xbf16>
    %15 = vector.shape_cast %14 : vector<8x16x256xbf16> to vector<128x256xbf16>
    %c2_19 = arith.constant 2 : index
    %c0_20 = arith.constant 0 : index
    %c0_21 = arith.constant 0 : index
    %16 = vector.load %arg2[%c2_19, %c0_20, %c0_21] : memref<3x256x256xbf16, #tpu.memory_space<vmem>>, vector<1x256x256xbf16>
    %17 = vector.shape_cast %16 : vector<1x256x256xbf16> to vector<256x256xbf16>
    %cst_22 = arith.constant dense<0.000000e+00> : vector<128x256xf32>
    %18 = tpu.matmul %15, %17, %cst_22 {dimension_numbers = #tpu.dot_dimension_numbers<[1], [0], [0], [1], [0, 0, 1, 1], [], []>} : vector<128x256xbf16>, vector<256x256xbf16>, vector<128x256xf32> -> vector<128x256xf32>
    %19 = arith.addf %13, %18 : vector<128x256xf32>
    %c0_23 = arith.constant 0 : index
    %c0_24 = arith.constant 0 : index
    %20 = vector.load %arg3[%c0_23, %c0_24] : memref<1x256xf32, #tpu.memory_space<vmem>>, vector<1x256xf32>
    %21 = vector.broadcast %20 : vector<1x256xf32> to vector<128x256xf32>
    %22 = arith.mulf %19, %21 : vector<128x256xf32>
    %c0_25 = arith.constant 0 : index
    %c0_26 = arith.constant 0 : index
    %23 = vector.load %arg4[%c0_25, %c0_26] : memref<1x256xf32, #tpu.memory_space<vmem>>, vector<1x256xf32>
    %24 = vector.broadcast %23 : vector<1x256xf32> to vector<128x256xf32>
    %25 = arith.addf %22, %24 : vector<128x256xf32>
    %cst_27 = arith.constant 0.000000e+00 : f32
    %26 = vector.broadcast %cst_27 : f32 to vector<128x256xf32>
    %27 = arith.maximumf %25, %26 : vector<128x256xf32>
    %28 = arith.truncf %27 : vector<128x256xf32> to vector<128x256xbf16>
    %29 = vector.shape_cast %28 : vector<128x256xbf16> to vector<8x16x256xbf16>
    %c1_28 = arith.constant 1 : index
    %c0_29 = arith.constant 0 : index
    %c0_30 = arith.constant 0 : index
    %30 = vector.load %arg9[%c1_28, %c0_29, %c0_30] : memref<10x16x256xbf16, #tpu.memory_space<vmem>>, vector<8x16x256xbf16>
    tpu.vector_store %arg9[%c1_28, %c0_29, %c0_30], %29 {strides = array<i32>} : memref<10x16x256xbf16, #tpu.memory_space<vmem>>, vector<8x16x256xbf16>,
    %c0_31 = arith.constant 0 : index
    %c0_32 = arith.constant 0 : index
    %c0_33 = arith.constant 0 : index
    %31 = vector.load %arg9[%c0_31, %c0_32, %c0_33] : memref<10x16x256xbf16, #tpu.memory_space<vmem>>, vector<8x16x256xbf16>
    %32 = vector.shape_cast %31 : vector<8x16x256xbf16> to vector<128x256xbf16>
    %c0_34 = arith.constant 0 : index
    %c0_35 = arith.constant 0 : index
    %c0_36 = arith.constant 0 : index
    %33 = vector.load %arg5[%c0_34, %c0_35, %c0_36] : memref<3x256x256xbf16, #tpu.memory_space<vmem>>, vector<1x256x256xbf16>
    %34 = vector.shape_cast %33 : vector<1x256x256xbf16> to vector<256x256xbf16>
    %cst_37 = arith.constant dense<0.000000e+00> : vector<128x256xf32>
    %35 = tpu.matmul %32, %34, %cst_37 {dimension_numbers = #tpu.dot_dimension_numbers<[1], [0], [0], [1], [0, 0, 1, 1], [], []>} : vector<128x256xbf16>, vector<256x256xbf16>, vector<128x256xf32> -> vector<128x256xf32>
    %c1_38 = arith.constant 1 : index
    %c0_39 = arith.constant 0 : index
    %c0_40 = arith.constant 0 : index
    %36 = vector.load %arg9[%c1_38, %c0_39, %c0_40] : memref<10x16x256xbf16, #tpu.memory_space<vmem>>, vector<8x16x256xbf16>
    %37 = vector.shape_cast %36 : vector<8x16x256xbf16> to vector<128x256xbf16>
    %c1_41 = arith.constant 1 : index
    %c0_42 = arith.constant 0 : index
    %c0_43 = arith.constant 0 : index
    %38 = vector.load %arg5[%c1_41, %c0_42, %c0_43] : memref<3x256x256xbf16, #tpu.memory_space<vmem>>, vector<1x256x256xbf16>
    %39 = vector.shape_cast %38 : vector<1x256x256xbf16> to vector<256x256xbf16>
    %cst_44 = arith.constant dense<0.000000e+00> : vector<128x256xf32>
    %40 = tpu.matmul %37, %39, %cst_44 {dimension_numbers = #tpu.dot_dimension_numbers<[1], [0], [0], [1], [0, 0, 1, 1], [], []>} : vector<128x256xbf16>, vector<256x256xbf16>, vector<128x256xf32> -> vector<128x256xf32>
    %41 = arith.addf %35, %40 : vector<128x256xf32>
    %c2_45 = arith.constant 2 : index
    %c0_46 = arith.constant 0 : index
    %c0_47 = arith.constant 0 : index
    %42 = vector.load %arg9[%c2_45, %c0_46, %c0_47] : memref<10x16x256xbf16, #tpu.memory_space<vmem>>, vector<8x16x256xbf16>
    %43 = vector.shape_cast %42 : vector<8x16x256xbf16> to vector<128x256xbf16>
    %c2_48 = arith.constant 2 : index
    %c0_49 = arith.constant 0 : index
    %c0_50 = arith.constant 0 : index
    %44 = vector.load %arg5[%c2_48, %c0_49, %c0_50] : memref<3x256x256xbf16, #tpu.memory_space<vmem>>, vector<1x256x256xbf16>
    %45 = vector.shape_cast %44 : vector<1x256x256xbf16> to vector<256x256xbf16>
    %cst_51 = arith.constant dense<0.000000e+00> : vector<128x256xf32>
    %46 = tpu.matmul %43, %45, %cst_51 {dimension_numbers = #tpu.dot_dimension_numbers<[1], [0], [0], [1], [0, 0, 1, 1], [], []>} : vector<128x256xbf16>, vector<256x256xbf16>, vector<128x256xf32> -> vector<128x256xf32>
    %47 = arith.addf %41, %46 : vector<128x256xf32>
    %c0_52 = arith.constant 0 : index
    %c0_53 = arith.constant 0 : index
    %48 = vector.load %arg6[%c0_52, %c0_53] : memref<1x256xf32, #tpu.memory_space<vmem>>, vector<1x256xf32>
    %49 = vector.broadcast %48 : vector<1x256xf32> to vector<128x256xf32>
    %50 = arith.mulf %47, %49 : vector<128x256xf32>
    %c0_54 = arith.constant 0 : index
    %c0_55 = arith.constant 0 : index
    %51 = vector.load %arg7[%c0_54, %c0_55] : memref<1x256xf32, #tpu.memory_space<vmem>>, vector<1x256xf32>
    %52 = vector.broadcast %51 : vector<1x256xf32> to vector<128x256xf32>
    %53 = arith.addf %50, %52 : vector<128x256xf32>
    %c1_56 = arith.constant 1 : index
    %c0_57 = arith.constant 0 : index
    %c0_58 = arith.constant 0 : index
    %54 = vector.load %arg1[%c1_56, %c0_57, %c0_58] : memref<10x16x256xbf16, #tpu.memory_space<vmem>>, vector<8x16x256xbf16>
    %55 = vector.shape_cast %54 : vector<8x16x256xbf16> to vector<128x256xbf16>
    %56 = arith.extf %55 : vector<128x256xbf16> to vector<128x256xf32>
    %57 = arith.addf %53, %56 : vector<128x256xf32>
    %cst_59 = arith.constant 0.000000e+00 : f32
    %58 = vector.broadcast %cst_59 : f32 to vector<128x256xf32>
    %59 = arith.maximumf %57, %58 : vector<128x256xf32>
    %cst_60 = arith.constant 0.000000e+00 : bf16
    %60 = vector.broadcast %cst_60 : bf16 to vector<1x16x256xbf16>
    %c0_61 = arith.constant 0 : index
    %c0_62 = arith.constant 0 : index
    %c0_63 = arith.constant 0 : index
    %61 = vector.load %arg8[%c0_61, %c0_62, %c0_63] : memref<10x16x256xbf16, #tpu.memory_space<vmem>>, vector<1x16x256xbf16>
    tpu.vector_store %arg8[%c0_61, %c0_62, %c0_63], %60 {strides = array<i32>} : memref<10x16x256xbf16, #tpu.memory_space<vmem>>, vector<1x16x256xbf16>,
    %c9_64 = arith.constant 9 : index
    %c0_65 = arith.constant 0 : index
    %c0_66 = arith.constant 0 : index
    %62 = vector.load %arg8[%c9_64, %c0_65, %c0_66] : memref<10x16x256xbf16, #tpu.memory_space<vmem>>, vector<1x16x256xbf16>
    tpu.vector_store %arg8[%c9_64, %c0_65, %c0_66], %60 {strides = array<i32>} : memref<10x16x256xbf16, #tpu.memory_space<vmem>>, vector<1x16x256xbf16>,
    %63 = arith.truncf %59 : vector<128x256xf32> to vector<128x256xbf16>
    %64 = vector.shape_cast %63 : vector<128x256xbf16> to vector<8x16x256xbf16>
    %c1_67 = arith.constant 1 : index
    %c0_68 = arith.constant 0 : index
    %c0_69 = arith.constant 0 : index
    %65 = vector.load %arg8[%c1_67, %c0_68, %c0_69] : memref<10x16x256xbf16, #tpu.memory_space<vmem>>, vector<8x16x256xbf16>
    tpu.vector_store %arg8[%c1_67, %c0_68, %c0_69], %64 {strides = array<i32>} : memref<10x16x256xbf16, #tpu.memory_space<vmem>>, vector<8x16x256xbf16>,
    return
  }
  func.func @transform_0(%arg0: i32) -> (i32, i32, i32) {
    %c0_i32 = arith.constant 0 : i32
    %c0_i32_0 = arith.constant 0 : i32
    %c0_i32_1 = arith.constant 0 : i32
    return %c0_i32, %arg0, %c0_i32_0 : i32, i32, i32
  }
  func.func @transform_1(%arg0: i32) -> (i32, i32, i32) {
    %c0_i32 = arith.constant 0 : i32
    %c0_i32_0 = arith.constant 0 : i32
    %c0_i32_1 = arith.constant 0 : i32
    %c0_i32_2 = arith.constant 0 : i32
    return %c0_i32, %c0_i32_0, %c0_i32_1 : i32, i32, i32
  }
  func.func @transform_2(%arg0: i32) -> (i32, i32) {
    %c0_i32 = arith.constant 0 : i32
    %c0_i32_0 = arith.constant 0 : i32
    %c0_i32_1 = arith.constant 0 : i32
    return %c0_i32, %c0_i32_0 : i32, i32
  }
  func.func @transform_3(%arg0: i32) -> (i32, i32) {
    %c0_i32 = arith.constant 0 : i32
    %c0_i32_0 = arith.constant 0 : i32
    %c0_i32_1 = arith.constant 0 : i32
    return %c0_i32, %c0_i32_0 : i32, i32
  }
  func.func @transform_4(%arg0: i32) -> (i32, i32, i32) {
    %c0_i32 = arith.constant 0 : i32
    %c0_i32_0 = arith.constant 0 : i32
    %c0_i32_1 = arith.constant 0 : i32
    %c0_i32_2 = arith.constant 0 : i32
    return %c0_i32, %c0_i32_0, %c0_i32_1 : i32, i32, i32
  }
  func.func @transform_5(%arg0: i32) -> (i32, i32) {
    %c0_i32 = arith.constant 0 : i32
    %c0_i32_0 = arith.constant 0 : i32
    %c0_i32_1 = arith.constant 0 : i32
    return %c0_i32, %c0_i32_0 : i32, i32
  }
  func.func @transform_6(%arg0: i32) -> (i32, i32) {
    %c0_i32 = arith.constant 0 : i32
    %c0_i32_0 = arith.constant 0 : i32
    %c0_i32_1 = arith.constant 0 : i32
    return %c0_i32, %c0_i32_0 : i32, i32
  }
  func.func @transform_7(%arg0: i32) -> (i32, i32, i32) {
    %c0_i32 = arith.constant 0 : i32
    %c0_i32_0 = arith.constant 0 : i32
    %c0_i32_1 = arith.constant 0 : i32
    return %c0_i32, %arg0, %c0_i32_0 : i32, i32, i32
  }
}

</mosaic_0001>

<bundles_post_ra>
// kernel: tpu_custom_call.1
= control target key start
LH: loop header
LB: loop body
LE: loop exit
PB: predicated region body
PF: predicated region fallthrough
CT: control target
= control target key end

     0   :  { %12 = vsyncpa [#allocation4], 0  ;;  %s4061_s0 = inlined_call_operand.hbm [shape: bf16[10,16,256], index: 0, kind: input, shape index: {}]   ;;  %s4062_s1 = inlined_call_operand.hbm [shape: bf16[3,256,256], index: 1, kind: input, shape index: {}]   ;;  %s4063_s2 = inlined_call_operand.vmem [shape: f32[1,256], index: 2, kind: input, shape index: {}]   ;;  %s4064_s3 = inlined_call_operand.vmem [shape: f32[1,256], index: 3, kind: input, shape index: {}]   ;;  %s4065_s4 = inlined_call_operand.hbm [shape: bf16[3,256,256], index: 4, kind: input, shape index: {}]   ;;  %s4066_s5 = inlined_call_operand.vmem [shape: f32[1,256], index: 5, kind: input, shape index: {}]   ;;  %s4067_s6 = inlined_call_operand.vmem [shape: f32[1,256], index: 6, kind: input, shape index: {}]   ;;  %s4068_s7 = inlined_call_operand.hbm [shape: bf16[10,16,256], index: 7, kind: output, shape index: {}]  }
   0x1   :  { %13 = vsyncpa [#allocation7], 0 }
   0x2   :  { %14 = vsyncpa [#allocation5], 0  ;;  %s3619_s24 = smov [#allocation6]   ;;  %s3620_s26 = smov [#allocation3]  }
   0x3   :  { %s32_s25 = sshll.u32 %s3619_s24, 4  ;;  %s20_s27 = sshll.u32 %s3620_s26, 4  ;;  %s33_s25 = int_to_ptr.vmem [resolvable:$true] %s32_s25  ;;  %s3666_s27 = int_to_ptr.vmem [resolvable:$true] %s20_s27 }
   0x4   :  { %s3525_s30 = scalar_lea.hbm %s4062_s1, 12288 }
   0x5   :  { %p3526_p0 = scmp.ne.s32.totalorder %s4062_s1, %s3525_s30  ;;  %p3529_p1 = scmp.lt.u32.totalorder %s3525_s30, %s4062_s1 }
   0x7   :  { %p3531_p2 = pnand %p3529_p1, %p3526_p0 }
   0x9   :  { %3534 = shalt.err (!%p3531_p2)
}
   0xa   :  { %s3535_s12 = scalar_lea.vmem %s33_s25, 12288  ;;  %p3540_p4 = scmp.lt.s32.totalorder %s33_s25, %s33_s25 }
   0xb   :  { %p3536_p3 = scmp.ne.s32.totalorder %s33_s25, %s3535_s12  ;;  %p3541_p5 = scmp.lt.s32.totalorder %s3535_s12, %s3535_s12 }
   0xd   :  { %p3542_p6 = por %p3541_p5, %p3540_p4 }
   0xf   :  { %p3543_p7 = pnand %p3542_p6, %p3536_p3 }
  0x11   :  { %3546 = shalt.err (!%p3543_p7)
}
  0x12   :  { %s3621_s13 = smov 128   ;;  %s3622_s14 = smov 8  }
  0x13   :  { %38 = dma.hbm_to_vmem [thread:$0]  %s4062_s1, 12288, %s33_s25, [#allocation7], %s3621_s13, %s3621_s13, %s3622_s14  }
  0x14   :  { %s3547_s19 = scalar_lea.hbm %s4061_s0, 2560 }
  0x15   :  { %p3548_p8 = scmp.ne.s32.totalorder %s4061_s0, %s3547_s19  ;;  %p3551_p9 = scmp.lt.u32.totalorder %s3547_s19, %s4061_s0 }
  0x17   :  { %p3553_p10 = pnand %p3551_p9, %p3548_p8 }
  0x19   :  { %3556 = shalt.err (!%p3553_p10)
}
  0x1a   :  { %s3557_s24 = scalar_lea.vmem %s3666_s27, 2560  ;;  %p3562_p12 = scmp.lt.s32.totalorder %s3666_s27, %s3666_s27 }
  0x1b   :  { %p3558_p11 = scmp.ne.s32.totalorder %s3666_s27, %s3557_s24  ;;  %p3563_p13 = scmp.lt.s32.totalorder %s3557_s24, %s3557_s24 }
  0x1d   :  { %p3564_p0 = por %p3563_p13, %p3562_p12 }
  0x1f   :  { %p3565_p1 = pnand %p3564_p0, %p3558_p11 }
  0x21   :  { %3568 = shalt.err (!%p3565_p1)
}
  0x22   :  { %26 = dma.hbm_to_vmem [thread:$0]  %s4061_s0, 2560, %s3666_s27, [#allocation4], %s3621_s13, %s3621_s13, %s3622_s14  }
  0x23   :  { %s3623_s26 = smov [#allocation8]   ;;  %s3569_s8 = scalar_lea.hbm %s4065_s4, 12288 }
  0x24   :  { %s48_s28 = sshll.u32 %s3623_s26, 4  ;;  %p3570_p2 = scmp.ne.s32.totalorder %s4065_s4, %s3569_s8  ;;  %s49_s28 = int_to_ptr.vmem [resolvable:$true] %s48_s28 }
  0x25   :  { %p3573_p3 = scmp.lt.u32.totalorder %s3569_s8, %s4065_s4 }
  0x27   :  { %p3575_p4 = pnand %p3573_p3, %p3570_p2 }
  0x29   :  { %3578 = shalt.err (!%p3575_p4)
}
  0x2a   :  { %s3579_s15 = scalar_lea.vmem %s49_s28, 12288  ;;  %p3584_p6 = scmp.lt.s32.totalorder %s49_s28, %s49_s28 }
  0x2b   :  { %p3580_p5 = scmp.ne.s32.totalorder %s49_s28, %s3579_s15  ;;  %p3585_p7 = scmp.lt.s32.totalorder %s3579_s15, %s3579_s15 }
  0x2d   :  { %p3586_p8 = por %p3585_p7, %p3584_p6 }
  0x2f   :  { %p3587_p9 = pnand %p3586_p8, %p3580_p5 }
  0x31   :  { %3590 = shalt.err (!%p3587_p9)
}
  0x32   :  { %54 = dma.hbm_to_vmem [thread:$0]  %s4065_s4, 12288, %s49_s28, [#allocation7], %s3621_s13, %s3621_s13, %s3622_s14  }
  0x33   :  { %3613 = dma.done.wait [#allocation4], 2560  }
  0x34   :  { %3614 = vsyncadd [#allocation4], 4294964736 }
  0x35   :  { %3615 = dma.done.wait [#allocation7], 24576  }
  0x36   :  { %3616 = vsyncadd [#allocation7], 4294942720  ;;  %v3207_v0 = vld [vmem:[#allocation6 + $0x104] ss:$8 sps:$4 sm:$0xff]   ;;  %v3209_v1 = vld [vmem:[#allocation6 + $0x100] ss:$8 sps:$4 sm:$0xff]  }
  0x37   :  { %412 = vmatprep.subr.bf16.mxu0 %v3207_v0  ;;  %v3210_v2 = vld [vmem:[#allocation6 + $0x114] ss:$8 sps:$4 sm:$0xff]   ;;  %v3212_v3 = vld [vmem:[#allocation6 + $0x110] ss:$8 sps:$4 sm:$0xff]   ;;  %v3213_v4 = vld [vmem:[#allocation6 + $0x124] ss:$8 sps:$4 sm:$0xff]  }
  0x38   :  { %413 = vmatpush1.bf16.msra.mxu0 %v3209_v1  ;;  %v3215_v5 = vld [vmem:[#allocation6 + $0x120] ss:$8 sps:$4 sm:$0xff]   ;;  %v3216_v6 = vld [vmem:[#allocation6 + $0x134] ss:$8 sps:$4 sm:$0xff]   ;;  %v3218_v7 = vld [vmem:[#allocation6 + $0x130] ss:$8 sps:$4 sm:$0xff]  }
  0x39   :  { %414 = vmatprep.subr.bf16.mxu0 %v3210_v2  ;;  %v3219_v8 = vld [vmem:[#allocation6 + $0x144] ss:$8 sps:$4 sm:$0xff]   ;;  %v3221_v9 = vld [vmem:[#allocation6 + $0x140] ss:$8 sps:$4 sm:$0xff]   ;;  %v3222_v10 = vld [vmem:[#allocation6 + $0x154] ss:$8 sps:$4 sm:$0xff]  }
  0x3a   :  { %v3224_v11 = vld [vmem:[#allocation6 + $0x150] ss:$8 sps:$4 sm:$0xff]   ;;  %v3225_v12 = vld [vmem:[#allocation6 + $0x164] ss:$8 sps:$4 sm:$0xff]   ;;  %v3718_v13 = vld [vmem:[#allocation3 + $0x14] ss:$8 sps:$4 sm:$0xff]  }
  0x3b   :  { %v3227_v14 = vld [vmem:[#allocation6 + $0x160] ss:$8 sps:$4 sm:$0xff]   ;;  %v3228_v15 = vld [vmem:[#allocation6 + $0x174] ss:$8 sps:$4 sm:$0xff]   ;;  %444 = vmatprep.mubr.bf16.mxu0 %v3718_v13  ;;  %v3230_v16 = vld [vmem:[#allocation6 + $0x170] ss:$8 sps:$4 sm:$0xff]  }
  0x3c   :  { %415 = vmatpush1.bf16.msra.mxu0 %v3212_v3  ;;  %v3231_v17 = vld [vmem:[#allocation6 + $0x184] ss:$8 sps:$4 sm:$0xff]   ;;  %v3233_v18 = vld [vmem:[#allocation6 + $0x180] ss:$8 sps:$4 sm:$0xff]   ;;  %v3234_v19 = vld [vmem:[#allocation6 + $0x194] ss:$8 sps:$4 sm:$0xff]  }
  0x3d   :  { %416 = vmatprep.subr.bf16.mxu0 %v3213_v4  ;;  %v3236_v20 = vld [vmem:[#allocation6 + $0x190] ss:$8 sps:$4 sm:$0xff]   ;;  %v3237_v21 = vld [vmem:[#allocation6 + $0x1a4] ss:$8 sps:$4 sm:$0xff]   ;;  %v3239_v22 = vld [vmem:[#allocation6 + $0x1a0] ss:$8 sps:$4 sm:$0xff]  }
  0x3e   :  { %v3240_v23 = vld [vmem:[#allocation6 + $0x1b4] ss:$8 sps:$4 sm:$0xff]   ;;  %v3242_v24 = vld [vmem:[#allocation6 + $0x1b0] ss:$8 sps:$4 sm:$0xff]   ;;  %v3243_v25 = vld [vmem:[#allocation6 + $0x1c4] ss:$8 sps:$4 sm:$0xff]  }
  0x3f   :  { %v3245_v26 = vld [vmem:[#allocation6 + $0x1c0] ss:$8 sps:$4 sm:$0xff]   ;;  %v3246_v27 = vld [vmem:[#allocation6 + $0x1d4] ss:$8 sps:$4 sm:$0xff]   ;;  %v3248_v28 = vld [vmem:[#allocation6 + $0x1d0] ss:$8 sps:$4 sm:$0xff]  }
  0x40   :  { %417 = vmatpush1.bf16.msra.mxu0 %v3215_v5  ;;  %v3249_v29 = vld [vmem:[#allocation6 + $0x1e4] ss:$8 sps:$4 sm:$0xff]   ;;  %v3251_v30 = vld [vmem:[#allocation6 + $0x1e0] ss:$8 sps:$4 sm:$0xff]   ;;  %v3252_v31 = vld [vmem:[#allocation6 + $0x1f4] ss:$8 sps:$4 sm:$0xff]  }
  0x41   :  { %418 = vmatprep.subr.bf16.mxu0 %v3216_v6  ;;  %v3254_v32 = vld [vmem:[#allocation6 + $0x1f0] ss:$8 sps:$4 sm:$0xff]   ;;  %v3260_v33 = vld [vmem:[#allocation6 + $0x4] ss:$8 sps:$4 sm:$0xff]   ;;  %v3258_v35 = vld [vmem:[#allocation6] ss:$8 sps:$4 sm:$0xff]  }
  0x42   :  { %v3721_v34 = vld [vmem:[#allocation3 + $0x10] ss:$8 sps:$4 sm:$0xff]   ;;  %v3723_v36 = vld [vmem:[#allocation3 + $0x24] ss:$8 sps:$4 sm:$0xff]   ;;  %v3263_v37 = vld [vmem:[#allocation6 + $0x14] ss:$8 sps:$4 sm:$0xff]  }
  0x43   :  { %v3261_v38 = vld [vmem:[#allocation6 + $0x10] ss:$8 sps:$4 sm:$0xff]   ;;  %v3269_v39 = vld [vmem:[#allocation6 + $0x24] ss:$8 sps:$4 sm:$0xff]   ;;  %v3727_v40 = vld [vmem:[#allocation3 + $0x20] ss:$8 sps:$4 sm:$0xff]  }
  0x44   :  { %419 = vmatpush1.bf16.msra.mxu0 %v3218_v7  ;;  %v3267_v41 = vld [vmem:[#allocation6 + $0x20] ss:$8 sps:$4 sm:$0xff]   ;;  %v3729_v42 = vld [vmem:[#allocation3 + $0x34] ss:$8 sps:$4 sm:$0xff]   ;;  %v3270_v44 = vld [vmem:[#allocation6 + $0x30] ss:$8 sps:$4 sm:$0xff]  }
  0x45   :  { %420 = vmatprep.subr.bf16.mxu0 %v3219_v8  ;;  %v3272_v43 = vld [vmem:[#allocation6 + $0x34] ss:$8 sps:$4 sm:$0xff]   ;;  %v3278_v45 = vld [vmem:[#allocation6 + $0x44] ss:$8 sps:$4 sm:$0xff]   ;;  %v3733_v46 = vld [vmem:[#allocation3 + $0x30] ss:$8 sps:$4 sm:$0xff]  }
  0x46   :  { %v3276_v47 = vld [vmem:[#allocation6 + $0x40] ss:$8 sps:$4 sm:$0xff]   ;;  %v3735_v48 = vld [vmem:[#allocation3 + $0x44] ss:$8 sps:$4 sm:$0xff]   ;;  %v3281_v49 = vld [vmem:[#allocation6 + $0x54] ss:$8 sps:$4 sm:$0xff]  }
  0x47   :  { %v3279_v50 = vld [vmem:[#allocation6 + $0x50] ss:$8 sps:$4 sm:$0xff]   ;;  %v3287_v51 = vld [vmem:[#allocation6 + $0x64] ss:$8 sps:$4 sm:$0xff]   ;;  %v3739_v52 = vld [vmem:[#allocation3 + $0x40] ss:$8 sps:$4 sm:$0xff]  }
  0x48   :  { %421 = vmatpush1.bf16.msra.mxu0 %v3221_v9  ;;  %v3285_v53 = vld [vmem:[#allocation6 + $0x60] ss:$8 sps:$4 sm:$0xff]   ;;  %v3741_v54 = vld [vmem:[#allocation3 + $0x54] ss:$8 sps:$4 sm:$0xff]   ;;  %v3288_v56 = vld [vmem:[#allocation6 + $0x70] ss:$8 sps:$4 sm:$0xff]  }
  0x49   :  { %422 = vmatprep.subr.bf16.mxu0 %v3222_v10  ;;  %v3290_v55 = vld [vmem:[#allocation6 + $0x74] ss:$8 sps:$4 sm:$0xff]   ;;  %v3296_v57 = vld [vmem:[#allocation6 + $0x84] ss:$8 sps:$4 sm:$0xff]   ;;  %v3745_v58 = vld [vmem:[#allocation3 + $0x50] ss:$8 sps:$4 sm:$0xff]  }
  0x4a   :  { %v3294_v59 = vld [vmem:[#allocation6 + $0x80] ss:$8 sps:$4 sm:$0xff]   ;;  %v3747_v60 = vld [vmem:[#allocation3 + $0x64] ss:$8 sps:$4 sm:$0xff]   ;;  %v3299_v61 = vld [vmem:[#allocation6 + $0x94] ss:$8 sps:$4 sm:$0xff]  }
  0x4b   :  { %v3297_v62 = vld [vmem:[#allocation6 + $0x90] ss:$8 sps:$4 sm:$0xff]   ;;  %v3305_v63 = vld [vmem:[#allocation6 + $0xa4] ss:$8 sps:$4 sm:$0xff]   ;;  %v3751_v0 = vld [vmem:[#allocation3 + $0x60] ss:$8 sps:$4 sm:$0xff]  }
  0x4c   :  { %423 = vmatpush1.bf16.msra.mxu0 %v3224_v11  ;;  %v3303_v1 = vld [vmem:[#allocation6 + $0xa0] ss:$8 sps:$4 sm:$0xff]   ;;  %v3753_v2 = vld [vmem:[#allocation3 + $0x74] ss:$8 sps:$4 sm:$0xff]   ;;  %v3306_v4 = vld [vmem:[#allocation6 + $0xb0] ss:$8 sps:$4 sm:$0xff]  }
  0x4d   :  { %424 = vmatprep.subr.bf16.mxu0 %v3225_v12  ;;  %v3308_v3 = vld [vmem:[#allocation6 + $0xb4] ss:$8 sps:$4 sm:$0xff]   ;;  %v3314_v5 = vld [vmem:[#allocation6 + $0xc4] ss:$8 sps:$4 sm:$0xff]   ;;  %v3757_v6 = vld [vmem:[#allocation3 + $0x70] ss:$8 sps:$4 sm:$0xff]  }
  0x4e   :  { %v3312_v7 = vld [vmem:[#allocation6 + $0xc0] ss:$8 sps:$4 sm:$0xff]   ;;  %v3759_v8 = vld [vmem:[#allocation3 + $0x84] ss:$8 sps:$4 sm:$0xff]   ;;  %v3317_v9 = vld [vmem:[#allocation6 + $0xd4] ss:$8 sps:$4 sm:$0xff]  }
  0x4f   :  { %v3315_v10 = vld [vmem:[#allocation6 + $0xd0] ss:$8 sps:$4 sm:$0xff]   ;;  %v3323_v11 = vld [vmem:[#allocation6 + $0xe4] ss:$8 sps:$4 sm:$0xff]   ;;  %v3763_v12 = vld [vmem:[#allocation3 + $0x80] ss:$8 sps:$4 sm:$0xff]  }
  0x50   :  { %425 = vmatpush1.bf16.msra.mxu0 %v3227_v14  ;;  %v3321_v14 = vld [vmem:[#allocation6 + $0xe0] ss:$8 sps:$4 sm:$0xff]  }
  0x51   :  { %426 = vmatprep.subr.bf16.mxu0 %v3228_v15  ;;  %v3329_v15 = vld [vmem:[#allocation3 + $0x4] ss:$8 sps:$4 sm:$0xff]  }
  0x54   :  { %427 = vmatpush1.bf16.msra.mxu0 %v3230_v16  ;;  %v3326_v16 = vld [vmem:[#allocation6 + $0xf4] ss:$8 sps:$4 sm:$0xff]  }
  0x55   :  { %428 = vmatprep.subr.bf16.mxu0 %v3231_v17  ;;  %v3381_v17 = vld [vmem:[#allocation8 + $0x104] ss:$8 sps:$4 sm:$0xff]  }
  0x56   :  { %1723 = vmatprep.subr.bf16.mxu1 %v3381_v17  ;;  %v3419_v17 = vld [vmem:[#allocation8 + $0x1c0] ss:$8 sps:$4 sm:$0xff]  }
  0x58   :  { %429 = vmatpush1.bf16.msra.mxu0 %v3233_v18  ;;  %v3383_v18 = vld [vmem:[#allocation8 + $0x100] ss:$8 sps:$4 sm:$0xff]  }
  0x59   :  { %430 = vmatprep.subr.bf16.mxu0 %v3234_v19  ;;  %v3384_v19 = vld [vmem:[#allocation8 + $0x114] ss:$8 sps:$4 sm:$0xff]   ;;  %1724 = vmatpush1.bf16.msra.mxu1 %v3383_v18  ;;  %v3363_v18 = vld [vmem:[#allocation6 + $0x2b0] ss:$8 sps:$4 sm:$0xff]  }
  0x5a   :  { %1725 = vmatprep.subr.bf16.mxu1 %v3384_v19  ;;  %v3368_v19 = vld [vmem:[#allocation6 + $0x2c4] ss:$8 sps:$4 sm:$0xff]  }
  0x5c   :  { %431 = vmatpush1.bf16.msra.mxu0 %v3236_v20  ;;  %v3324_v20 = vld [vmem:[#allocation6 + $0xf0] ss:$8 sps:$4 sm:$0xff]  }
  0x5d   :  { %432 = vmatprep.subr.bf16.mxu0 %v3237_v21  ;;  %v3332_v21 = vld [vmem:[#allocation6 + $0x204] ss:$8 sps:$4 sm:$0xff]  }
  0x60   :  { %433 = vmatpush1.bf16.msra.mxu0 %v3239_v22  ;;  %v3386_v22 = vld [vmem:[#allocation8 + $0x110] ss:$8 sps:$4 sm:$0xff]  }
  0x61   :  { %434 = vmatprep.subr.bf16.mxu0 %v3240_v23  ;;  %v3327_v23 = vld [vmem:[#allocation3] ss:$8 sps:$4 sm:$0xff]   ;;  %1726 = vmatpush1.bf16.msra.mxu1 %v3386_v22  ;;  %v3369_v22 = vld [vmem:[#allocation6 + $0x2d0] ss:$8 sps:$4 sm:$0xff]  }
  0x64   :  { %435 = vmatpush1.bf16.msra.mxu0 %v3242_v24  ;;  %v3387_v24 = vld [vmem:[#allocation8 + $0x124] ss:$8 sps:$4 sm:$0xff]  }
  0x65   :  { %436 = vmatprep.subr.bf16.mxu0 %v3243_v25  ;;  %v3330_v25 = vld [vmem:[#allocation6 + $0x200] ss:$8 sps:$4 sm:$0xff]   ;;  %1727 = vmatprep.subr.bf16.mxu1 %v3387_v24 }
  0x66   :  { %v3372_v24 = vld [vmem:[#allocation6 + $0x2e0] ss:$8 sps:$4 sm:$0xff]  }
  0x68   :  { %437 = vmatpush1.bf16.msra.mxu0 %v3245_v26  ;;  %v3335_v26 = vld [vmem:[#allocation6 + $0x214] ss:$8 sps:$4 sm:$0xff]  }
  0x69   :  { %438 = vmatprep.subr.bf16.mxu0 %v3246_v27  ;;  %v3389_v27 = vld [vmem:[#allocation8 + $0x120] ss:$8 sps:$4 sm:$0xff]  }
  0x6a   :  { %1728 = vmatpush1.bf16.msra.mxu1 %v3389_v27 }
  0x6c   :  { %439 = vmatpush1.bf16.msra.mxu0 %v3248_v28  ;;  %v3390_v28 = vld [vmem:[#allocation8 + $0x134] ss:$8 sps:$4 sm:$0xff]  }
  0x6d   :  { %440 = vmatprep.subr.bf16.mxu0 %v3249_v29  ;;  %v3333_v29 = vld [vmem:[#allocation6 + $0x210] ss:$8 sps:$4 sm:$0xff]   ;;  %1729 = vmatprep.subr.bf16.mxu1 %v3390_v28  ;;  %v1357_v28 = vld [vmem:[%s4064_s3] sm:$0x3] }
  0x70   :  { %441 = vmatpush1.bf16.msra.mxu0 %v3251_v30  ;;  %v3338_v30 = vld [vmem:[#allocation6 + $0x224] ss:$8 sps:$4 sm:$0xff]  }
  0x71   :  { %442 = vmatprep.subr.bf16.mxu0 %v3252_v31  ;;  %v3392_v31 = vld [vmem:[#allocation8 + $0x130] ss:$8 sps:$4 sm:$0xff]  }
  0x72   :  { %1730 = vmatpush1.bf16.msra.mxu1 %v3392_v31 }
  0x74   :  { %443 = vmatpush1.bf16.msra.mxu0 %v3254_v32  ;;  %v3393_v32 = vld [vmem:[#allocation8 + $0x144] ss:$8 sps:$4 sm:$0xff]  }
  0x75   :  { %765 = vmatprep.subr.bf16.mxu0 %v3260_v33  ;;  %v3336_v33 = vld [vmem:[#allocation6 + $0x220] ss:$8 sps:$4 sm:$0xff]   ;;  %1731 = vmatprep.subr.bf16.mxu1 %v3393_v32 }
  0x77   :  { %445 = vmatmul.mubr.bf16.vlgmr.msra.gmra.mrb[0].mxu0 %v3721_v34 }
  0x78   :  { %766 = vmatpush1.bf16.msra.mxu0 %v3258_v35  ;;  %454 = vmatprep.mubr.bf16.mxu0 %v3723_v36  ;;  %v3341_v35 = vld [vmem:[#allocation6 + $0x234] ss:$8 sps:$4 sm:$0xff]  }
  0x79   :  { %767 = vmatprep.subr.bf16.mxu0 %v3263_v37  ;;  %v3395_v37 = vld [vmem:[#allocation8 + $0x140] ss:$8 sps:$4 sm:$0xff]  }
  0x7a   :  { %1732 = vmatpush1.bf16.msra.mxu1 %v3395_v37 }
  0x7c   :  { %768 = vmatpush1.bf16.msra.mxu0 %v3261_v38  ;;  %v3396_v38 = vld [vmem:[#allocation8 + $0x154] ss:$8 sps:$4 sm:$0xff]  }
  0x7d   :  { %769 = vmatprep.subr.bf16.mxu0 %v3269_v39  ;;  %v3339_v39 = vld [vmem:[#allocation6 + $0x230] ss:$8 sps:$4 sm:$0xff]   ;;  %1733 = vmatprep.subr.bf16.mxu1 %v3396_v38 }
  0x7f   :  { %455 = vmatmul.mubr.bf16.gmra.mrb[4].mxu0 %v3727_v40 }
  0x80   :  { %770 = vmatpush1.bf16.msra.mxu0 %v3267_v41  ;;  %464 = vmatprep.mubr.bf16.mxu0 %v3729_v42  ;;  %v3398_v41 = vld [vmem:[#allocation8 + $0x150] ss:$8 sps:$4 sm:$0xff]  }
  0x81   :  { %771 = vmatprep.subr.bf16.mxu0 %v3272_v43  ;;  %v3399_v43 = vld [vmem:[#allocation8 + $0x164] ss:$8 sps:$4 sm:$0xff]   ;;  %1734 = vmatpush1.bf16.msra.mxu1 %v3398_v41 }
  0x82   :  { %1735 = vmatprep.subr.bf16.mxu1 %v3399_v43 }
  0x84   :  { %772 = vmatpush1.bf16.msra.mxu0 %v3270_v44  ;;  %v3342_v44 = vld [vmem:[#allocation6 + $0x240] ss:$8 sps:$4 sm:$0xff]  }
  0x85   :  { %773 = vmatprep.subr.bf16.mxu0 %v3278_v45  ;;  %v3347_v45 = vld [vmem:[#allocation6 + $0x254] ss:$8 sps:$4 sm:$0xff]  }
  0x87   :  { %465 = vmatmul.mubr.bf16.gmra.mrb[8].mxu0 %v3733_v46 }
  0x88   :  { %774 = vmatpush1.bf16.msra.mxu0 %v3276_v47  ;;  %474 = vmatprep.mubr.bf16.mxu0 %v3735_v48  ;;  %v3401_v47 = vld [vmem:[#allocation8 + $0x160] ss:$8 sps:$4 sm:$0xff]  }
  0x89   :  { %775 = vmatprep.subr.bf16.mxu0 %v3281_v49  ;;  %v3345_v49 = vld [vmem:[#allocation6 + $0x250] ss:$8 sps:$4 sm:$0xff]   ;;  %1736 = vmatpush1.bf16.msra.mxu1 %v3401_v47 }
  0x8c   :  { %776 = vmatpush1.bf16.msra.mxu0 %v3279_v50  ;;  %v3350_v50 = vld [vmem:[#allocation6 + $0x264] ss:$8 sps:$4 sm:$0xff]  }
  0x8d   :  { %777 = vmatprep.subr.bf16.mxu0 %v3287_v51  ;;  %v3404_v51 = vld [vmem:[#allocation8 + $0x170] ss:$8 sps:$4 sm:$0xff]  }
  0x8f   :  { %475 = vmatmul.mubr.bf16.gmra.mrb[12].mxu0 %v3739_v52 }
  0x90   :  { %778 = vmatpush1.bf16.msra.mxu0 %v3285_v53  ;;  %484 = vmatprep.mubr.bf16.mxu0 %v3741_v54  ;;  %v3405_v53 = vld [vmem:[#allocation8 + $0x184] ss:$8 sps:$4 sm:$0xff]  }
  0x91   :  { %779 = vmatprep.subr.bf16.mxu0 %v3290_v55  ;;  %v3348_v55 = vld [vmem:[#allocation6 + $0x260] ss:$8 sps:$4 sm:$0xff]  }
  0x94   :  { %780 = vmatpush1.bf16.msra.mxu0 %v3288_v56  ;;  %v3353_v56 = vld [vmem:[#allocation6 + $0x274] ss:$8 sps:$4 sm:$0xff]  }
  0x95   :  { %781 = vmatprep.subr.bf16.mxu0 %v3296_v57  ;;  %v3407_v57 = vld [vmem:[#allocation8 + $0x180] ss:$8 sps:$4 sm:$0xff]  }
  0x97   :  { %485 = vmatmul.mubr.bf16.gmra.mrb[16].mxu0 %v3745_v58 }
  0x98   :  { %782 = vmatpush1.bf16.msra.mxu0 %v3294_v59  ;;  %494 = vmatprep.mubr.bf16.mxu0 %v3747_v60  ;;  %v3408_v59 = vld [vmem:[#allocation8 + $0x194] ss:$8 sps:$4 sm:$0xff]  }
  0x99   :  { %783 = vmatprep.subr.bf16.mxu0 %v3299_v61  ;;  %v3351_v61 = vld [vmem:[#allocation6 + $0x270] ss:$8 sps:$4 sm:$0xff]  }
  0x9c   :  { %784 = vmatpush1.bf16.msra.mxu0 %v3297_v62  ;;  %v3356_v62 = vld [vmem:[#allocation6 + $0x284] ss:$8 sps:$4 sm:$0xff]  }
  0x9d   :  { %785 = vmatprep.subr.bf16.mxu0 %v3305_v63  ;;  %v3410_v63 = vld [vmem:[#allocation8 + $0x190] ss:$8 sps:$4 sm:$0xff]  }
  0x9f   :  { %495 = vmatmul.mubr.bf16.gmra.mrb[20].mxu0 %v3751_v0 }
  0xa0   :  { %786 = vmatpush1.bf16.msra.mxu0 %v3303_v1  ;;  %504 = vmatprep.mubr.bf16.mxu0 %v3753_v2  ;;  %v3411_v1 = vld [vmem:[#allocation8 + $0x1a4] ss:$8 sps:$4 sm:$0xff]  }
  0xa1   :  { %787 = vmatprep.subr.bf16.mxu0 %v3308_v3  ;;  %v3354_v3 = vld [vmem:[#allocation6 + $0x280] ss:$8 sps:$4 sm:$0xff]  }
  0xa4   :  { %788 = vmatpush1.bf16.msra.mxu0 %v3306_v4  ;;  %v3359_v4 = vld [vmem:[#allocation6 + $0x294] ss:$8 sps:$4 sm:$0xff]  }
  0xa5   :  { %789 = vmatprep.subr.bf16.mxu0 %v3314_v5  ;;  %v3413_v5 = vld [vmem:[#allocation8 + $0x1a0] ss:$8 sps:$4 sm:$0xff]  }
  0xa7   :  { %505 = vmatmul.mubr.bf16.gmra.mrb[24].mxu0 %v3757_v6 }
  0xa8   :  { %790 = vmatpush1.bf16.msra.mxu0 %v3312_v7  ;;  %514 = vmatprep.mubr.bf16.mxu0 %v3759_v8  ;;  %v3414_v7 = vld [vmem:[#allocation8 + $0x1b4] ss:$8 sps:$4 sm:$0xff]  }
  0xa9   :  { %791 = vmatprep.subr.bf16.mxu0 %v3317_v9  ;;  %v3357_v9 = vld [vmem:[#allocation6 + $0x290] ss:$8 sps:$4 sm:$0xff]  }
  0xac   :  { %792 = vmatpush1.bf16.msra.mxu0 %v3315_v10  ;;  %v3362_v10 = vld [vmem:[#allocation6 + $0x2a4] ss:$8 sps:$4 sm:$0xff]  }
  0xad   :  { %793 = vmatprep.subr.bf16.mxu0 %v3323_v11  ;;  %v3416_v11 = vld [vmem:[#allocation8 + $0x1b0] ss:$8 sps:$4 sm:$0xff]  }
  0xaf   :  { %515 = vmatmul.mubr.bf16.gmra.mrb[28].mxu0 %v3763_v12 }
  0xb0   :  { %794 = vmatpush1.bf16.msra.mxu0 %v3321_v14  ;;  %797 = vmatprep.mubr.bf16.mxu0 %v3329_v15  ;;  %v3417_v14 = vld [vmem:[#allocation8 + $0x1c4] ss:$8 sps:$4 sm:$0xff]   ;;  %v3360_v15 = vld [vmem:[#allocation6 + $0x2a0] ss:$8 sps:$4 sm:$0xff]  }
  0xb1   :  { %795 = vmatprep.subr.bf16.mxu0 %v3326_v16  ;;  %v3365_v16 = vld [vmem:[#allocation6 + $0x2b4] ss:$8 sps:$4 sm:$0xff]  }
  0xb4   :  { %796 = vmatpush1.bf16.msra.mxu0 %v3324_v20  ;;  %v3366_v20 = vld [vmem:[#allocation6 + $0x2c0] ss:$8 sps:$4 sm:$0xff]  }
  0xb5   :  { %1168 = vmatprep.subr.bf16.mxu0 %v3332_v21  ;;  %v3371_v21 = vld [vmem:[#allocation6 + $0x2d4] ss:$8 sps:$4 sm:$0xff]  }
  0xb7   :  { %798 = vmatmul.mubr.bf16.vlgmr.msra.gmra.mrb[0].mxu0 %v3327_v23  ;;  %v3374_v23 = vld [vmem:[#allocation6 + $0x2e4] ss:$8 sps:$4 sm:$0xff]  }
  0xb8   :  { %1169 = vmatpush1.bf16.msra.mxu0 %v3330_v25  ;;  %807 = vmatprep.mubr.bf16.mxu0 %v3718_v13  ;;  %v3344_v13 = vld [vmem:[#allocation6 + $0x244] ss:$8 sps:$4 sm:$0xff]   ;;  %v3377_v25 = vld [vmem:[#allocation6 + $0x2f4] ss:$8 sps:$4 sm:$0xff]  }
  0xb9   :  { %1170 = vmatprep.subr.bf16.mxu0 %v3335_v26  ;;  %v3375_v26 = vld [vmem:[#allocation6 + $0x2f0] ss:$8 sps:$4 sm:$0xff]  }
  0xbc   :  { %1171 = vmatpush1.bf16.msra.mxu0 %v3333_v29 }
  0xbd   :  { %1172 = vmatprep.subr.bf16.mxu0 %v3338_v30 }
  0xbf   :  { %808 = vmatmul.mubr.bf16.gmra.mrb[4].mxu0 %v3721_v34  ;;  %v3402_v34 = vld [vmem:[#allocation8 + $0x174] ss:$8 sps:$4 sm:$0xff]  }
  0xc0   :  { %1173 = vmatpush1.bf16.msra.mxu0 %v3336_v33  ;;  %817 = vmatprep.mubr.bf16.mxu0 %v3723_v36 }
  0xc1   :  { %1174 = vmatprep.subr.bf16.mxu0 %v3341_v35  ;;  %1737 = vmatprep.subr.bf16.mxu1 %v3402_v34 }
  0xc2   :  { %1738 = vmatpush1.bf16.msra.mxu1 %v3404_v51 }
  0xc3   :  { %1739 = vmatprep.subr.bf16.mxu1 %v3405_v53 }
  0xc4   :  { %1175 = vmatpush1.bf16.msra.mxu0 %v3339_v39 }
  0xc5   :  { %1176 = vmatprep.subr.bf16.mxu0 %v3344_v13 }
  0xc6   :  { %1740 = vmatpush1.bf16.msra.mxu1 %v3407_v57 }
  0xc7   :  { %818 = vmatmul.mubr.bf16.gmra.mrb[8].mxu0 %v3727_v40  ;;  %1741 = vmatprep.subr.bf16.mxu1 %v3408_v59 }
  0xc8   :  { %1177 = vmatpush1.bf16.msra.mxu0 %v3342_v44  ;;  %827 = vmatprep.mubr.bf16.mxu0 %v3729_v42 }
  0xc9   :  { %1178 = vmatprep.subr.bf16.mxu0 %v3347_v45 }
  0xca   :  { %1742 = vmatpush1.bf16.msra.mxu1 %v3410_v63 }
  0xcb   :  { %1743 = vmatprep.subr.bf16.mxu1 %v3411_v1  ;;  %v3429_v1 = vld [vmem:[#allocation8] ss:$8 sps:$4 sm:$0xff]  }
  0xcc   :  { %1179 = vmatpush1.bf16.msra.mxu0 %v3345_v49 }
  0xcd   :  { %1180 = vmatprep.subr.bf16.mxu0 %v3350_v50 }
  0xce   :  { %1744 = vmatpush1.bf16.msra.mxu1 %v3413_v5 }
  0xcf   :  { %828 = vmatmul.mubr.bf16.gmra.mrb[12].mxu0 %v3733_v46  ;;  %1745 = vmatprep.subr.bf16.mxu1 %v3414_v7  ;;  %v3434_v7 = vld [vmem:[#allocation8 + $0x14] ss:$8 sps:$4 sm:$0xff]  }
  0xd0   :  { %1181 = vmatpush1.bf16.msra.mxu0 %v3348_v55  ;;  %837 = vmatprep.mubr.bf16.mxu0 %v3735_v48 }
  0xd1   :  { %1182 = vmatprep.subr.bf16.mxu0 %v3353_v56 }
  0xd2   :  { %1746 = vmatpush1.bf16.msra.mxu1 %v3416_v11 }
  0xd3   :  { %1747 = vmatprep.subr.bf16.mxu1 %v3417_v14 }
  0xd4   :  { %1183 = vmatpush1.bf16.msra.mxu0 %v3351_v61 }
  0xd5   :  { %1184 = vmatprep.subr.bf16.mxu0 %v3356_v62 }
  0xd6   :  { %1748 = vmatpush1.bf16.msra.mxu1 %v3419_v17 }
  0xd7   :  { %838 = vmatmul.mubr.bf16.gmra.mrb[16].mxu0 %v3739_v52 }
  0xd8   :  { %1185 = vmatpush1.bf16.msra.mxu0 %v3354_v3  ;;  %847 = vmatprep.mubr.bf16.mxu0 %v3741_v54 }
  0xd9   :  { %1186 = vmatprep.subr.bf16.mxu0 %v3359_v4 }
  0xdc   :  { %1187 = vmatpush1.bf16.msra.mxu0 %v3357_v9 }
  0xdd   :  { %1188 = vmatprep.subr.bf16.mxu0 %v3362_v10 }
  0xdf   :  { %848 = vmatmul.mubr.bf16.gmra.mrb[20].mxu0 %v3745_v58 }
  0xe0   :  { %1189 = vmatpush1.bf16.msra.mxu0 %v3360_v15  ;;  %857 = vmatprep.mubr.bf16.mxu0 %v3747_v60  ;;  %v3432_v15 = vld [vmem:[#allocation8 + $0x10] ss:$8 sps:$4 sm:$0xff]  }
  0xe1   :  { %1190 = vmatprep.subr.bf16.mxu0 %v3365_v16 }
  0xe4   :  { %1191 = vmatpush1.bf16.msra.mxu0 %v3363_v18  ;;  %v3437_v18 = vld [vmem:[#allocation8 + $0x24] ss:$8 sps:$4 sm:$0xff]  }
  0xe5   :  { %1192 = vmatprep.subr.bf16.mxu0 %v3368_v19 }
  0xe7   :  { %858 = vmatmul.mubr.bf16.gmra.mrb[24].mxu0 %v3751_v0 }
  0xe8   :  { %1193 = vmatpush1.bf16.msra.mxu0 %v3366_v20  ;;  %867 = vmatprep.mubr.bf16.mxu0 %v3753_v2 }
  0xe9   :  { %1194 = vmatprep.subr.bf16.mxu0 %v3371_v21 }
  0xec   :  { %1195 = vmatpush1.bf16.msra.mxu0 %v3369_v22 }
  0xed   :  { %1196 = vmatprep.subr.bf16.mxu0 %v3374_v23 }
  0xef   :  { %868 = vmatmul.mubr.bf16.gmra.mrb[28].mxu0 %v3757_v6 }
  0xf0   :  { %1197 = vmatpush1.bf16.msra.mxu0 %v3372_v24  ;;  %1200 = vmatprep.mubr.bf16.mxu0 %v3723_v36  ;;  %v3378_v36 = vld [vmem:[#allocation3 + $0x94] ss:$8 sps:$4 sm:$0xff]  }
  0xf1   :  { %1198 = vmatprep.subr.bf16.mxu0 %v3377_v25 }
  0xf4   :  { %1199 = vmatpush1.bf16.msra.mxu0 %v3375_v26 }
  0xf7   :  { %1201 = vmatmul.mubr.bf16.vlgmr.msra.gmra.mrb[0].mxu0 %v3727_v40  ;;  %v3380_v40 = vld [vmem:[#allocation3 + $0x90] ss:$8 sps:$4 sm:$0xff]  }
  0xf8   :  { %1210 = vmatprep.mubr.bf16.mxu0 %v3729_v42  ;;  %v3420_v42 = vld [vmem:[#allocation8 + $0x1d4] ss:$8 sps:$4 sm:$0xff]  }
  0xf9   :  { %1749 = vmatprep.subr.bf16.mxu1 %v3420_v42 }
  0xff   :  { %1211 = vmatmul.mubr.bf16.gmra.mrb[4].mxu0 %v3733_v46  ;;  %v3422_v46 = vld [vmem:[#allocation8 + $0x1d0] ss:$8 sps:$4 sm:$0xff]  }
 0x100   :  { %1220 = vmatprep.mubr.bf16.mxu0 %v3735_v48  ;;  %1750 = vmatpush1.bf16.msra.mxu1 %v3422_v46  ;;  %v3423_v48 = vld [vmem:[#allocation8 + $0x1e4] ss:$8 sps:$4 sm:$0xff]  }
 0x101   :  { %1751 = vmatprep.subr.bf16.mxu1 %v3423_v48 }
 0x107   :  { %1221 = vmatmul.mubr.bf16.gmra.mrb[8].mxu0 %v3739_v52  ;;  %v3425_v52 = vld [vmem:[#allocation8 + $0x1e0] ss:$8 sps:$4 sm:$0xff]  }
 0x108   :  { %1230 = vmatprep.mubr.bf16.mxu0 %v3741_v54  ;;  %1752 = vmatpush1.bf16.msra.mxu1 %v3425_v52  ;;  %v3426_v54 = vld [vmem:[#allocation8 + $0x1f4] ss:$8 sps:$4 sm:$0xff]  }
 0x109   :  { %1753 = vmatprep.subr.bf16.mxu1 %v3426_v54  ;;  %v3440_v52 = vld [vmem:[#allocation8 + $0x34] ss:$8 sps:$4 sm:$0xff]  }
 0x10f   :  { %1231 = vmatmul.mubr.bf16.gmra.mrb[12].mxu0 %v3745_v58  ;;  %v3428_v58 = vld [vmem:[#allocation8 + $0x1f0] ss:$8 sps:$4 sm:$0xff]  }
 0x110   :  { %1240 = vmatprep.mubr.bf16.mxu0 %v3747_v60  ;;  %1754 = vmatpush1.bf16.msra.mxu1 %v3428_v58  ;;  %v3431_v60 = vld [vmem:[#allocation8 + $0x4] ss:$8 sps:$4 sm:$0xff]  }
 0x111   :  { %1996 = vmatprep.subr.bf16.mxu1 %v3431_v60 }
 0x117   :  { %1241 = vmatmul.mubr.bf16.gmra.mrb[16].mxu0 %v3751_v0  ;;  %v3624_v0 = vmov 0  }
 0x118   :  { %1250 = vmatprep.mubr.bf16.mxu0 %v3753_v2  ;;  %2664 = vst [vmem:[#allocation9] sm:$0xff] %v3624_v0  ;;  %2665 = vst [vmem:[#allocation9 + $0x8] sm:$0xff] %v3624_v0  ;;  %v1315_v2 = vlaneseq }
 0x119   :  { %2667 = vst [vmem:[#allocation9 + $0x90] sm:$0xff] %v3624_v0  ;;  %2668 = vst [vmem:[#allocation9 + $0x98] sm:$0xff] %v3624_v0 }
 0x11f   :  { %1251 = vmatmul.mubr.bf16.gmra.mrb[20].mxu0 %v3757_v6  ;;  %v1316_v6 = vshrl.u32 %v1315_v2, 7 }
 0x120   :  { %1260 = vmatprep.mubr.bf16.mxu0 %v3759_v8 }
 0x121   :  { %v3798_v8 = vsub.s32 0, %v1316_v6  ;;  %v3803_v27 = vsub.s32 1, %v1316_v6  ;;  %v3438_v6 = vld [vmem:[#allocation8 + $0x30] ss:$8 sps:$4 sm:$0xff]  }
 0x123   :  { %v3815_v31 = vrot.slane %v1357_v28, %v3798_v8  ;;  %v3818_v33 = vrot.slane %v1357_v28, %v3803_v27 }
 0x127   :  { %1261 = vmatmul.mubr.bf16.gmra.mrb[24].mxu0 %v3763_v12  ;;  %v1313_v12 = vld [vmem:[%s4063_s2] sm:$0x3] }
 0x128   :  { %1270 = vmatprep.mubr.bf16.mxu0 %v3378_v36  ;;  %v3809_v29 = vrot.slane %v1313_v12, %v3798_v8  ;;  %v3812_v30 = vrot.slane %v1313_v12, %v3803_v27 }
 0x12f   :  { %1271 = vmatmul.mubr.bf16.gmra.mrb[28].mxu0 %v3380_v40  ;;  %v3435_v40 = vld [vmem:[#allocation8 + $0x20] ss:$8 sps:$4 sm:$0xff]  }
 0x1ca   :  { %v1202_v32 = vpop.f32.mrb[0].mxu0 }
 0x1cb   :  { %v1325_v35 = vmul.f32 %v3809_v29, %v1202_v32  ;;  %v1204_v37 = vpop.f32.mrb[1].mxu0  ;;  %v3443_v32 = vld [vmem:[#allocation8 + $0x44] ss:$8 sps:$4 sm:$0xff]  }
 0x1cc   :  { %v1326_v38 = vmul.f32 %v3812_v30, %v1204_v37  ;;  %v1206_v39 = vpop.f32.mrb[2].mxu0 }
 0x1cd   :  { %v1369_v13 = vadd.f32 %v3815_v31, %v1325_v35  ;;  %v1327_v41 = vmul.f32 %v3809_v29, %v1206_v39  ;;  %v1208_v43 = vpop.f32.mrb[3].mxu0 }
 0x1ce   :  { %v1370_v44 = vadd.f32 %v3818_v33, %v1326_v38  ;;  %v1328_v45 = vmul.f32 %v3812_v30, %v1208_v43 }
 0x1cf   :  { %v1371_v47 = vadd.f32 %v3815_v31, %v1327_v41  ;;  %v1401_v49 = vmax.f32 %v1369_v13, 0.0 }
 0x1d0   :  { %v1372_v34 = vadd.f32 %v3818_v33, %v1328_v45  ;;  %v1402_v51 = vmax.f32 %v1370_v44, 0.0 }
 0x1d1   :  { %v1403_v50 = vmax.f32 %v1371_v47, 0.0  ;;  %v3441_v47 = vld [vmem:[#allocation8 + $0x40] ss:$8 sps:$4 sm:$0xff]  }
 0x1d2   :  { %v1404_v53 = vmax.f32 %v1372_v34, 0.0  ;;  %v1212_v55 = vpop.f32.mrb[4].mxu0 }
 0x1d3   :  { %v1329_v56 = vmul.f32 %v3809_v29, %v1212_v55  ;;  %v1214_v57 = vpop.f32.mrb[5].mxu0  ;;  %v3829_v59 = vpack.c.bf16 %v1403_v50, %v1401_v49 }
 0x1d4   :  { %v1330_v61 = vmul.f32 %v3812_v30, %v1214_v57  ;;  %v1216_v62 = vpop.f32.mrb[6].mxu0  ;;  %v3832_v63 = vpack.c.bf16 %v1404_v53, %v1402_v51  ;;  %v3446_v51 = vld [vmem:[#allocation8 + $0x54] ss:$8 sps:$4 sm:$0xff]  }
 0x1d5   :  { %v1373_v3 = vadd.f32 %v3815_v31, %v1329_v56  ;;  %v1331_v4 = vmul.f32 %v3809_v29, %v1216_v62  ;;  %v1218_v5 = vpop.f32.mrb[7].mxu0 }
 0x1d6   :  { %v1374_v9 = vadd.f32 %v3818_v33, %v1330_v61  ;;  %v1332_v10 = vmul.f32 %v3812_v30, %v1218_v5  ;;  %1755 = vmatprep.mubr.bf16.mxu1 %v3832_v63  ;;  %v3444_v61 = vld [vmem:[#allocation8 + $0x50] ss:$8 sps:$4 sm:$0xff]  }
 0x1d7   :  { %v1375_v11 = vadd.f32 %v3815_v31, %v1331_v4  ;;  %1756 = vmatmul.mubr.bf16.vlgmr.msra.gmra.mrb[0].mxu1 %v3829_v59  ;;  %v1405_v16 = vmax.f32 %v1373_v3, 0.0  ;;  %v3449_v3 = vld [vmem:[#allocation8 + $0x64] ss:$8 sps:$4 sm:$0xff]  }
 0x1d8   :  { %v1376_v14 = vadd.f32 %v3818_v33, %v1332_v10  ;;  %1997 = vmatpush1.bf16.msra.mxu1 %v3429_v1  ;;  %v1406_v19 = vmax.f32 %v1374_v9, 0.0 }
 0x1d9   :  { %v1407_v17 = vmax.f32 %v1375_v11, 0.0  ;;  %1998 = vmatprep.subr.bf16.mxu1 %v3434_v7 }
 0x1da   :  { %v1408_v20 = vmax.f32 %v1376_v14, 0.0  ;;  %v1222_v21 = vpop.f32.mrb[8].mxu0 }
 0x1db   :  { %v1333_v22 = vmul.f32 %v3809_v29, %v1222_v21  ;;  %v1224_v23 = vpop.f32.mrb[9].mxu0  ;;  %v3843_v24 = vpack.c.bf16 %v1407_v17, %v1405_v16  ;;  %v3447_v17 = vld [vmem:[#allocation8 + $0x60] ss:$8 sps:$4 sm:$0xff]   ;;  %v3452_v21 = vld [vmem:[#allocation8 + $0x74] ss:$8 sps:$4 sm:$0xff]  }
 0x1dc   :  { %v1334_v25 = vmul.f32 %v3812_v30, %v1224_v23  ;;  %v1226_v26 = vpop.f32.mrb[10].mxu0  ;;  %1999 = vmatpush1.bf16.msra.mxu1 %v3432_v15  ;;  %v3846_v36 = vpack.c.bf16 %v1408_v20, %v1406_v19 }
 0x1dd   :  { %v1377_v42 = vadd.f32 %v3815_v31, %v1333_v22  ;;  %v1335_v46 = vmul.f32 %v3809_v29, %v1226_v26  ;;  %v1228_v48 = vpop.f32.mrb[11].mxu0  ;;  %2000 = vmatprep.subr.bf16.mxu1 %v3437_v18 }
 0x1de   :  { %v1378_v54 = vadd.f32 %v3818_v33, %v1334_v25  ;;  %v1336_v58 = vmul.f32 %v3812_v30, %v1228_v48  ;;  %1765 = vmatprep.mubr.bf16.mxu1 %v3846_v36  ;;  %v3455_v48 = vld [vmem:[#allocation8 + $0x84] ss:$8 sps:$4 sm:$0xff]  }
 0x1df   :  { %v1379_v60 = vadd.f32 %v3815_v31, %v1335_v46  ;;  %1766 = vmatmul.mubr.bf16.gmra.mrb[4].mxu1 %v3843_v24  ;;  %v1409_v12 = vmax.f32 %v1377_v42, 0.0 }
 0x1e0   :  { %v1380_v2 = vadd.f32 %v3818_v33, %v1336_v58  ;;  %2001 = vmatpush1.bf16.msra.mxu1 %v3435_v40  ;;  %v1410_v35 = vmax.f32 %v1378_v54, 0.0  ;;  %v3450_v40 = vld [vmem:[#allocation8 + $0x70] ss:$8 sps:$4 sm:$0xff]  }
 0x1e1   :  { %v1411_v28 = vmax.f32 %v1379_v60, 0.0  ;;  %2002 = vmatprep.subr.bf16.mxu1 %v3440_v52 }
 0x1e2   :  { %v1412_v37 = vmax.f32 %v1380_v2, 0.0  ;;  %v1232_v38 = vpop.f32.mrb[12].mxu0 }
 0x1e3   :  { %v1337_v39 = vmul.f32 %v3809_v29, %v1232_v38  ;;  %v1234_v13 = vpop.f32.mrb[13].mxu0  ;;  %v3857_v41 = vpack.c.bf16 %v1411_v28, %v1409_v12 }
 0x1e4   :  { %v1338_v43 = vmul.f32 %v3812_v30, %v1234_v13  ;;  %v1236_v44 = vpop.f32.mrb[14].mxu0  ;;  %2003 = vmatpush1.bf16.msra.mxu1 %v3438_v6  ;;  %v3860_v45 = vpack.c.bf16 %v1412_v37, %v1410_v35  ;;  %v3453_v35 = vld [vmem:[#allocation8 + $0x80] ss:$8 sps:$4 sm:$0xff]   ;;  %v3458_v13 = vld [vmem:[#allocation8 + $0x94] ss:$8 sps:$4 sm:$0xff]  }
 0x1e5   :  { %v1381_v34 = vadd.f32 %v3815_v31, %v1337_v39  ;;  %v1339_v49 = vmul.f32 %v3809_v29, %v1236_v44  ;;  %v1238_v50 = vpop.f32.mrb[15].mxu0  ;;  %2004 = vmatprep.subr.bf16.mxu1 %v3443_v32 }
 0x1e6   :  { %v1382_v53 = vadd.f32 %v3818_v33, %v1338_v43  ;;  %v1340_v55 = vmul.f32 %v3812_v30, %v1238_v50  ;;  %1775 = vmatprep.mubr.bf16.mxu1 %v3860_v45 }
 0x1e7   :  { %v1383_v56 = vadd.f32 %v3815_v31, %v1339_v49  ;;  %1776 = vmatmul.mubr.bf16.gmra.mrb[8].mxu1 %v3857_v41  ;;  %v1413_v62 = vmax.f32 %v1381_v34, 0.0  ;;  %v3456_v49 = vld [vmem:[#allocation8 + $0x90] ss:$8 sps:$4 sm:$0xff]  }
 0x1e8   :  { %v1384_v57 = vadd.f32 %v3818_v33, %v1340_v55  ;;  %2005 = vmatpush1.bf16.msra.mxu1 %v3441_v47  ;;  %v1414_v4 = vmax.f32 %v1382_v53, 0.0  ;;  %v3461_v53 = vld [vmem:[#allocation8 + $0xa4] ss:$8 sps:$4 sm:$0xff]  }
 0x1e9   :  { %v1415_v1 = vmax.f32 %v1383_v56, 0.0  ;;  %2006 = vmatprep.subr.bf16.mxu1 %v3446_v51 }
 0x1ea   :  { %v1416_v5 = vmax.f32 %v1384_v57, 0.0  ;;  %v1242_v7 = vpop.f32.mrb[16].mxu0 }
 0x1eb   :  { %v1341_v9 = vmul.f32 %v3809_v29, %v1242_v7  ;;  %v1244_v10 = vpop.f32.mrb[17].mxu0  ;;  %v3871_v11 = vpack.c.bf16 %v1415_v1, %v1413_v62  ;;  %v3459_v7 = vld [vmem:[#allocation8 + $0xa0] ss:$8 sps:$4 sm:$0xff]  }
 0x1ec   :  { %v1342_v14 = vmul.f32 %v3812_v30, %v1244_v10  ;;  %v1246_v15 = vpop.f32.mrb[18].mxu0  ;;  %2007 = vmatpush1.bf16.msra.mxu1 %v3444_v61  ;;  %v3874_v16 = vpack.c.bf16 %v1416_v5, %v1414_v4 }
 0x1ed   :  { %v1385_v18 = vadd.f32 %v3815_v31, %v1341_v9  ;;  %v1343_v19 = vmul.f32 %v3809_v29, %v1246_v15  ;;  %v1248_v20 = vpop.f32.mrb[19].mxu0  ;;  %2008 = vmatprep.subr.bf16.mxu1 %v3449_v3  ;;  %v3464_v15 = vld [vmem:[#allocation8 + $0xb4] ss:$8 sps:$4 sm:$0xff]  }
 0x1ee   :  { %v1386_v22 = vadd.f32 %v3818_v33, %v1342_v14  ;;  %v1344_v23 = vmul.f32 %v3812_v30, %v1248_v20  ;;  %1785 = vmatprep.mubr.bf16.mxu1 %v3874_v16 }
 0x1ef   :  { %v1387_v25 = vadd.f32 %v3815_v31, %v1343_v19  ;;  %1786 = vmatmul.mubr.bf16.gmra.mrb[12].mxu1 %v3871_v11  ;;  %v1417_v42 = vmax.f32 %v1385_v18, 0.0 }
 0x1f0   :  { %v1388_v26 = vadd.f32 %v3818_v33, %v1344_v23  ;;  %2009 = vmatpush1.bf16.msra.mxu1 %v3447_v17  ;;  %v1418_v52 = vmax.f32 %v1386_v22, 0.0 }
 0x1f1   :  { %v1419_v46 = vmax.f32 %v1387_v25, 0.0  ;;  %2010 = vmatprep.subr.bf16.mxu1 %v3452_v21  ;;  %v3462_v21 = vld [vmem:[#allocation8 + $0xb0] ss:$8 sps:$4 sm:$0xff]   ;;  %v3467_v25 = vld [vmem:[#allocation8 + $0xc4] ss:$8 sps:$4 sm:$0xff]  }
 0x1f2   :  { %v1420_v54 = vmax.f32 %v1388_v26, 0.0  ;;  %v1252_v58 = vpop.f32.mrb[20].mxu0 }
 0x1f3   :  { %v1345_v60 = vmul.f32 %v3809_v29, %v1252_v58  ;;  %v1254_v2 = vpop.f32.mrb[21].mxu0  ;;  %v3885_v6 = vpack.c.bf16 %v1419_v46, %v1417_v42 }
 0x1f4   :  { %v1346_v12 = vmul.f32 %v3812_v30, %v1254_v2  ;;  %v1256_v28 = vpop.f32.mrb[22].mxu0  ;;  %2011 = vmatpush1.bf16.msra.mxu1 %v3450_v40  ;;  %v3888_v32 = vpack.c.bf16 %v1420_v54, %v1418_v52  ;;  %v3465_v2 = vld [vmem:[#allocation8 + $0xc0] ss:$8 sps:$4 sm:$0xff]  }
 0x1f5   :  { %v1389_v37 = vadd.f32 %v3815_v31, %v1345_v60  ;;  %v1347_v38 = vmul.f32 %v3809_v29, %v1256_v28  ;;  %v1258_v39 = vpop.f32.mrb[23].mxu0  ;;  %2012 = vmatprep.subr.bf16.mxu1 %v3455_v48 }
 0x1f6   :  { %v1390_v43 = vadd.f32 %v3818_v33, %v1346_v12  ;;  %v1348_v44 = vmul.f32 %v3812_v30, %v1258_v39  ;;  %1795 = vmatprep.mubr.bf16.mxu1 %v3888_v32 }
 0x1f7   :  { %v1391_v47 = vadd.f32 %v3815_v31, %v1347_v38  ;;  %1796 = vmatmul.mubr.bf16.gmra.mrb[16].mxu1 %v3885_v6  ;;  %v1421_v50 = vmax.f32 %v1389_v37, 0.0  ;;  %v3470_v37 = vld [vmem:[#allocation8 + $0xd4] ss:$8 sps:$4 sm:$0xff]  }
 0x1f8   :  { %v1392_v34 = vadd.f32 %v3818_v33, %v1348_v44  ;;  %2013 = vmatpush1.bf16.msra.mxu1 %v3453_v35  ;;  %v1422_v55 = vmax.f32 %v1390_v43, 0.0  ;;  %v3468_v44 = vld [vmem:[#allocation8 + $0xd0] ss:$8 sps:$4 sm:$0xff]  }
 0x1f9   :  { %v1423_v51 = vmax.f32 %v1391_v47, 0.0  ;;  %2014 = vmatprep.subr.bf16.mxu1 %v3458_v13 }
 0x1fa   :  { %v1424_v56 = vmax.f32 %v1392_v34, 0.0  ;;  %v1262_v57 = vpop.f32.mrb[24].mxu0 }
 0x1fb   :  { %v1349_v61 = vmul.f32 %v3809_v29, %v1262_v57  ;;  %v1264_v62 = vpop.f32.mrb[25].mxu0  ;;  %v3899_v1 = vpack.c.bf16 %v1423_v51, %v1421_v50  ;;  %v3482_v57 = vld [vmem:[#allocation8 + $0x214] ss:$8 sps:$4 sm:$0xff]  }
 0x1fc   :  { %v1350_v3 = vmul.f32 %v3812_v30, %v1264_v62  ;;  %v1266_v4 = vpop.f32.mrb[26].mxu0  ;;  %2015 = vmatpush1.bf16.msra.mxu1 %v3456_v49  ;;  %v3902_v5 = vpack.c.bf16 %v1424_v56, %v1422_v55  ;;  %v3479_v55 = vld [vmem:[#allocation8 + $0x204] ss:$8 sps:$4 sm:$0xff]   ;;  %v3477_v56 = vld [vmem:[#allocation8 + $0x200] ss:$8 sps:$4 sm:$0xff]  }
 0x1fd   :  { %v1393_v9 = vadd.f32 %v3815_v31, %v1349_v61  ;;  %v1351_v10 = vmul.f32 %v3809_v29, %v1266_v4  ;;  %v1268_v14 = vpop.f32.mrb[27].mxu0  ;;  %2016 = vmatprep.subr.bf16.mxu1 %v3461_v53  ;;  %v3471_v53 = vld [vmem:[#allocation8 + $0xe0] ss:$8 sps:$4 sm:$0xff]   ;;  %v3480_v61 = vld [vmem:[#allocation8 + $0x210] ss:$8 sps:$4 sm:$0xff]  }
 0x1fe   :  { %v1394_v17 = vadd.f32 %v3818_v33, %v1350_v3  ;;  %v1352_v18 = vmul.f32 %v3812_v30, %v1268_v14  ;;  %1805 = vmatprep.mubr.bf16.mxu1 %v3902_v5  ;;  %v3485_v62 = vld [vmem:[#allocation8 + $0x224] ss:$8 sps:$4 sm:$0xff]   ;;  %v3483_v3 = vld [vmem:[#allocation8 + $0x220] ss:$8 sps:$4 sm:$0xff]   ;;  %v3488_v4 = vld [vmem:[#allocation8 + $0x234] ss:$8 sps:$4 sm:$0xff]  }
 0x1ff   :  { %v1395_v19 = vadd.f32 %v3815_v31, %v1351_v10  ;;  %1806 = vmatmul.mubr.bf16.gmra.mrb[20].mxu1 %v3899_v1  ;;  %v1425_v22 = vmax.f32 %v1393_v9, 0.0  ;;  %v3491_v9 = vld [vmem:[#allocation8 + $0x244] ss:$8 sps:$4 sm:$0xff]   ;;  %v3489_v10 = vld [vmem:[#allocation8 + $0x240] ss:$8 sps:$4 sm:$0xff]  }
 0x200   :  { %v1396_v20 = vadd.f32 %v3818_v33, %v1352_v18  ;;  %2017 = vmatpush1.bf16.msra.mxu1 %v3459_v7  ;;  %v1426_v26 = vmax.f32 %v1394_v17, 0.0  ;;  %v3486_v7 = vld [vmem:[#allocation8 + $0x230] ss:$8 sps:$4 sm:$0xff]   ;;  %v3500_v17 = vld [vmem:[#allocation8 + $0x274] ss:$8 sps:$4 sm:$0xff]  }
 0x201   :  { %v1427_v23 = vmax.f32 %v1395_v19, 0.0  ;;  %2018 = vmatprep.subr.bf16.mxu1 %v3464_v15  ;;  %v3492_v14 = vld [vmem:[#allocation8 + $0x250] ss:$8 sps:$4 sm:$0xff]   ;;  %v3497_v15 = vld [vmem:[#allocation8 + $0x264] ss:$8 sps:$4 sm:$0xff]  }
 0x202   :  { %v1428_v40 = vmax.f32 %v1396_v20, 0.0  ;;  %v1272_v42 = vpop.f32.mrb[28].mxu0  ;;  %v3498_v18 = vld [vmem:[#allocation8 + $0x270] ss:$8 sps:$4 sm:$0xff]   ;;  %v3503_v19 = vld [vmem:[#allocation8 + $0x284] ss:$8 sps:$4 sm:$0xff]  }
 0x203   :  { %v1353_v46 = vmul.f32 %v3809_v29, %v1272_v42  ;;  %v1274_v48 = vpop.f32.mrb[29].mxu0  ;;  %v3913_v52 = vpack.c.bf16 %v1427_v23, %v1425_v22  ;;  %v3501_v20 = vld [vmem:[#allocation8 + $0x280] ss:$8 sps:$4 sm:$0xff]   ;;  %v3504_v22 = vld [vmem:[#allocation8 + $0x290] ss:$8 sps:$4 sm:$0xff]  }
 0x204   :  { %v1354_v54 = vmul.f32 %v3812_v30, %v1274_v48  ;;  %v1276_v58 = vpop.f32.mrb[30].mxu0  ;;  %2019 = vmatpush1.bf16.msra.mxu1 %v3462_v21  ;;  %v3916_v60 = vpack.c.bf16 %v1428_v40, %v1426_v26  ;;  %v3506_v21 = vld [vmem:[#allocation8 + $0x294] ss:$8 sps:$4 sm:$0xff]   ;;  %v3509_v23 = vld [vmem:[#allocation8 + $0x2a4] ss:$8 sps:$4 sm:$0xff]  }
 0x205   :  { %v1397_v12 = vadd.f32 %v3815_v31, %v1353_v46  ;;  %v1355_v28 = vmul.f32 %v3809_v29, %v1276_v58  ;;  %v1278_v35 = vpop.f32.mrb[31].mxu0  ;;  %2020 = vmatprep.subr.bf16.mxu1 %v3467_v25  ;;  %v3473_v29 = vld [vmem:[#allocation8 + $0xe4] ss:$8 sps:$4 sm:$0xff]   ;;  %v3507_v25 = vld [vmem:[#allocation8 + $0x2a0] ss:$8 sps:$4 sm:$0xff]  }
 0x206   :  { %v1398_v38 = vadd.f32 %v3818_v33, %v1354_v54  ;;  %v1356_v39 = vmul.f32 %v3812_v30, %v1278_v35  ;;  %1815 = vmatprep.mubr.bf16.mxu1 %v3916_v60  ;;  %v3512_v26 = vld [vmem:[#allocation8 + $0x2b4] ss:$8 sps:$4 sm:$0xff]   ;;  %v3510_v40 = vld [vmem:[#allocation8 + $0x2b0] ss:$8 sps:$4 sm:$0xff]   ;;  %v3515_v42 = vld [vmem:[#allocation8 + $0x2c4] ss:$8 sps:$4 sm:$0xff]  }
 0x207   :  { %v1399_v13 = vadd.f32 %v3815_v31, %v1355_v28  ;;  %1816 = vmatmul.mubr.bf16.gmra.mrb[24].mxu1 %v3913_v52  ;;  %v1429_v47 = vmax.f32 %v1397_v12, 0.0  ;;  %v3476_v31 = vld [vmem:[#allocation8 + $0xf4] ss:$8 sps:$4 sm:$0xff]   ;;  %v3513_v46 = vld [vmem:[#allocation8 + $0x2c0] ss:$8 sps:$4 sm:$0xff]  }
 0x208   :  { %v1400_v43 = vadd.f32 %v3818_v33, %v1356_v39  ;;  %2021 = vmatpush1.bf16.msra.mxu1 %v3465_v2  ;;  %v1430_v49 = vmax.f32 %v1398_v38, 0.0  ;;  %v3474_v33 = vld [vmem:[#allocation8 + $0xf0] ss:$8 sps:$4 sm:$0xff]   ;;  %v3518_v48 = vld [vmem:[#allocation8 + $0x2d4] ss:$8 sps:$4 sm:$0xff]  }
 0x209   :  { %v1431_v34 = vmax.f32 %v1399_v13, 0.0  ;;  %2022 = vmatprep.subr.bf16.mxu1 %v3470_v37  ;;  %v3516_v54 = vld [vmem:[#allocation8 + $0x2d0] ss:$8 sps:$4 sm:$0xff]   ;;  %v3521_v58 = vld [vmem:[#allocation8 + $0x2e4] ss:$8 sps:$4 sm:$0xff]  }
 0x20a   :  { %v1432_v50 = vmax.f32 %v1400_v43, 0.0  ;;  %v3519_v2 = vld [vmem:[#allocation8 + $0x2e0] ss:$8 sps:$4 sm:$0xff]   ;;  %v3524_v12 = vld [vmem:[#allocation8 + $0x2f4] ss:$8 sps:$4 sm:$0xff]  }
 0x20b   :  { %v3926_v51 = vpack.c.bf16 %v1431_v34, %v1429_v47  ;;  %v3522_v28 = vld [vmem:[#allocation8 + $0x2f0] ss:$8 sps:$4 sm:$0xff]  }
 0x20c   :  { %2023 = vmatpush1.bf16.msra.mxu1 %v3468_v44  ;;  %v3928_v30 = vpack.c.bf16 %v1432_v50, %v1430_v49  ;;  %v2554_v50 = vld [vmem:[#allocation3 + $0x20] sm:$0xff] }
 0x20d   :  { %2024 = vmatprep.subr.bf16.mxu1 %v3473_v29 }
 0x20e   :  { %1825 = vmatprep.mubr.bf16.mxu1 %v3928_v30 }
 0x20f   :  { %1826 = vmatmul.mubr.bf16.gmra.mrb[28].mxu1 %v3926_v51 }
 0x210   :  { %2025 = vmatpush1.bf16.msra.mxu1 %v3471_v53  ;;  %2028 = vmatprep.mubr.bf16.mxu1 %v3624_v0 }
 0x211   :  { %2026 = vmatprep.subr.bf16.mxu1 %v3476_v31 }
 0x214   :  { %2027 = vmatpush1.bf16.msra.mxu1 %v3474_v33 }
 0x215   :  { %2319 = vmatprep.subr.bf16.mxu1 %v3479_v55  ;;  %v2555_v55 = vld [vmem:[#allocation3 + $0x28] sm:$0xff] }
 0x217   :  { %2029 = vmatmul.mubr.bf16.vlgmr.msra.gmra.mrb[0].mxu1 %v3624_v0 }
 0x218   :  { %2038 = vmatprep.mubr.bf16.mxu1 %v3832_v63  ;;  %2320 = vmatpush1.bf16.msra.mxu1 %v3477_v56  ;;  %v3494_v63 = vld [vmem:[#allocation8 + $0x254] ss:$8 sps:$4 sm:$0xff]  }
 0x219   :  { %2321 = vmatprep.subr.bf16.mxu1 %v3482_v57 }
 0x21c   :  { %2322 = vmatpush1.bf16.msra.mxu1 %v3480_v61  ;;  %v2572_v61 = vunpack.c.l.bf16 %v2554_v50 }
 0x21d   :  { %2323 = vmatprep.subr.bf16.mxu1 %v3485_v62 }
 0x21f   :  { %2039 = vmatmul.mubr.bf16.gmra.mrb[4].mxu1 %v3829_v59  ;;  %v3495_v59 = vld [vmem:[#allocation8 + $0x260] ss:$8 sps:$4 sm:$0xff]  }
 0x220   :  { %2048 = vmatprep.mubr.bf16.mxu1 %v3846_v36  ;;  %2324 = vmatpush1.bf16.msra.mxu1 %v3483_v3 }
 0x221   :  { %2325 = vmatprep.subr.bf16.mxu1 %v3488_v4 }
 0x224   :  { %2326 = vmatpush1.bf16.msra.mxu1 %v3486_v7 }
 0x225   :  { %2327 = vmatprep.subr.bf16.mxu1 %v3491_v9  ;;  %v2573_v9 = vunpack.c.h.bf16 %v2554_v50 }
 0x227   :  { %2049 = vmatmul.mubr.bf16.gmra.mrb[8].mxu1 %v3843_v24 }
 0x228   :  { %2058 = vmatprep.mubr.bf16.mxu1 %v3860_v45  ;;  %2328 = vmatpush1.bf16.msra.mxu1 %v3489_v10 }
 0x229   :  { %2329 = vmatprep.subr.bf16.mxu1 %v3494_v63 }
 0x22c   :  { %2330 = vmatpush1.bf16.msra.mxu1 %v3492_v14 }
 0x22d   :  { %2331 = vmatprep.subr.bf16.mxu1 %v3497_v15  ;;  %v2574_v15 = vunpack.c.l.bf16 %v2555_v55 }
 0x22f   :  { %2059 = vmatmul.mubr.bf16.gmra.mrb[12].mxu1 %v3857_v41 }
 0x230   :  { %2068 = vmatprep.mubr.bf16.mxu1 %v3874_v16  ;;  %2332 = vmatpush1.bf16.msra.mxu1 %v3495_v59 }
 0x231   :  { %2333 = vmatprep.subr.bf16.mxu1 %v3500_v17 }
 0x234   :  { %2334 = vmatpush1.bf16.msra.mxu1 %v3498_v18 }
 0x235   :  { %2335 = vmatprep.subr.bf16.mxu1 %v3503_v19 }
 0x237   :  { %2069 = vmatmul.mubr.bf16.gmra.mrb[16].mxu1 %v3871_v11 }
 0x238   :  { %2078 = vmatprep.mubr.bf16.mxu1 %v3888_v32  ;;  %2336 = vmatpush1.bf16.msra.mxu1 %v3501_v20  ;;  %v2575_v20 = vunpack.c.h.bf16 %v2555_v55 }
 0x239   :  { %2337 = vmatprep.subr.bf16.mxu1 %v3506_v21 }
 0x23c   :  { %2338 = vmatpush1.bf16.msra.mxu1 %v3504_v22 }
 0x23d   :  { %2339 = vmatprep.subr.bf16.mxu1 %v3509_v23 }
 0x23f   :  { %2079 = vmatmul.mubr.bf16.gmra.mrb[20].mxu1 %v3885_v6 }
 0x240   :  { %2088 = vmatprep.mubr.bf16.mxu1 %v3902_v5  ;;  %2340 = vmatpush1.bf16.msra.mxu1 %v3507_v25 }
 0x241   :  { %2341 = vmatprep.subr.bf16.mxu1 %v3512_v26  ;;  %v2556_v26 = vld [vmem:[#allocation3 + $0x30] sm:$0xff] }
 0x244   :  { %2342 = vmatpush1.bf16.msra.mxu1 %v3510_v40 }
 0x245   :  { %2343 = vmatprep.subr.bf16.mxu1 %v3515_v42 }
 0x247   :  { %2089 = vmatmul.mubr.bf16.gmra.mrb[24].mxu1 %v3899_v1 }
 0x248   :  { %2098 = vmatprep.mubr.bf16.mxu1 %v3916_v60  ;;  %2344 = vmatpush1.bf16.msra.mxu1 %v3513_v46 }
 0x249   :  { %2345 = vmatprep.subr.bf16.mxu1 %v3518_v48 }
 0x24c   :  { %2346 = vmatpush1.bf16.msra.mxu1 %v3516_v54 }
 0x24d   :  { %2347 = vmatprep.subr.bf16.mxu1 %v3521_v58  ;;  %v2557_v58 = vld [vmem:[#allocation3 + $0x38] sm:$0xff] }
 0x24f   :  { %2099 = vmatmul.mubr.bf16.gmra.mrb[28].mxu1 %v3913_v52 }
 0x250   :  { %2348 = vmatpush1.bf16.msra.mxu1 %v3519_v2  ;;  %2351 = vmatprep.mubr.bf16.mxu1 %v3846_v36  ;;  %v2508_v36 = vld [vmem:[%s4067_s6] sm:$0x3] }
 0x251   :  { %2349 = vmatprep.subr.bf16.mxu1 %v3524_v12 }
 0x254   :  { %2350 = vmatpush1.bf16.msra.mxu1 %v3522_v28  ;;  %v2576_v28 = vunpack.c.l.bf16 %v2556_v26 }
 0x257   :  { %2352 = vmatmul.mubr.bf16.vlgmr.msra.gmra.mrb[0].mxu1 %v3843_v24  ;;  %v2464_v24 = vld [vmem:[%s4066_s5] sm:$0x3]  ;;  %s3625_s5 = smov [#allocation9]  }
 0x258   :  { %2361 = vmatprep.mubr.bf16.mxu1 %v3860_v45  ;;  %v2552_v45 = vld [vmem:[#allocation3 + $0x10] sm:$0xff]  ;;  %s2787_s6 = sshll.u32 %s3625_s5, 4  ;;  %s2788_s6 = int_to_ptr.vmem [resolvable:$true] %s2787_s6 }
 0x259   :  { %v2569_v35 = vunpack.c.h.bf16 %v2552_v45  ;;  %s3591_s21 = scalar_lea.vmem %s2788_s6, 2560  ;;  %p3596_p11 = scmp.lt.s32.totalorder %s2788_s6, %s2788_s6 }
 0x25a   :  { %p3592_p10 = scmp.ne.s32.totalorder %s2788_s6, %s3591_s21  ;;  %p3597_p12 = scmp.lt.s32.totalorder %s3591_s21, %s3591_s21 }
 0x25c   :  { %p3598_p13 = por %p3597_p12, %p3596_p11 }
 0x25e   :  { %p3599_p0 = pnand %p3598_p13, %p3592_p10 }
 0x25f   :  { %2362 = vmatmul.mubr.bf16.gmra.mrb[4].mxu1 %v3857_v41  ;;  %v3971_v41 = vrot.slane %v2464_v24, %v3798_v8 }
 0x260   :  { %2371 = vmatprep.mubr.bf16.mxu1 %v3874_v16  ;;  %v3977_v16 = vrot.slane %v2508_v36, %v3798_v8 }
 0x267   :  { %2372 = vmatmul.mubr.bf16.gmra.mrb[8].mxu1 %v3871_v11  ;;  %v3974_v11 = vrot.slane %v2464_v24, %v3803_v27 }
 0x268   :  { %2381 = vmatprep.mubr.bf16.mxu1 %v3888_v32  ;;  %v2553_v32 = vld [vmem:[#allocation3 + $0x18] sm:$0xff] }
 0x269   :  { %v2570_v13 = vunpack.c.l.bf16 %v2553_v32  ;;  %v2571_v44 = vunpack.c.h.bf16 %v2553_v32  ;;  %v2577_v32 = vunpack.c.h.bf16 %v2556_v26 }
 0x26f   :  { %2382 = vmatmul.mubr.bf16.gmra.mrb[12].mxu1 %v3885_v6 }
 0x270   :  { %2391 = vmatprep.mubr.bf16.mxu1 %v3902_v5  ;;  %v2568_v5 = vunpack.c.l.bf16 %v2552_v45 }
 0x277   :  { %2392 = vmatmul.mubr.bf16.gmra.mrb[16].mxu1 %v3899_v1 }
 0x278   :  { %2401 = vmatprep.mubr.bf16.mxu1 %v3916_v60 }
 0x27f   :  { %2402 = vmatmul.mubr.bf16.gmra.mrb[20].mxu1 %v3913_v52 }
 0x280   :  { %2411 = vmatprep.mubr.bf16.mxu1 %v3928_v30 }
 0x287   :  { %2412 = vmatmul.mubr.bf16.gmra.mrb[24].mxu1 %v3926_v51 }
 0x288   :  { %2421 = vmatprep.mubr.bf16.mxu1 %v3624_v0 }
 0x28f   :  { %2422 = vmatmul.mubr.bf16.gmra.mrb[28].mxu1 %v3624_v0  ;;  %v3980_v0 = vrot.slane %v2508_v36, %v3803_v27 }
 0x32a   :  { %v2353_v6 = vpop.f32.mrb[0].mxu1 }
 0x32b   :  { %v2476_v1 = vmul.f32 %v3971_v41, %v2353_v6  ;;  %v2355_v52 = vpop.f32.mrb[1].mxu1 }
 0x32c   :  { %v2477_v60 = vmul.f32 %v3974_v11, %v2355_v52  ;;  %v2357_v37 = vpop.f32.mrb[2].mxu1 }
 0x32d   :  { %v2520_v38 = vadd.f32 %v3977_v16, %v2476_v1  ;;  %v2478_v39 = vmul.f32 %v3971_v41, %v2357_v37  ;;  %v2359_v8 = vpop.f32.mrb[3].mxu1 }
 0x32e   :  { %v2521_v43 = vadd.f32 %v3980_v0, %v2477_v60  ;;  %v2479_v27 = vmul.f32 %v3974_v11, %v2359_v8  ;;  %v2578_v60 = vunpack.c.l.bf16 %v2557_v58 }
 0x32f   :  { %v2600_v47 = vadd.f32 %v2568_v5, %v2520_v38  ;;  %v2522_v34 = vadd.f32 %v3977_v16, %v2478_v39 }
 0x330   :  { %v2601_v29 = vadd.f32 %v2569_v35, %v2521_v43  ;;  %v2523_v49 = vadd.f32 %v3980_v0, %v2479_v27 }
 0x331   :  { %v2632_v51 = vmax.f32 %v2600_v47, 0.0  ;;  %v2602_v30 = vadd.f32 %v2570_v13, %v2522_v34  ;;  %v2579_v13 = vunpack.c.h.bf16 %v2557_v58  ;;  %v2558_v47 = vld [vmem:[#allocation3 + $0x40] sm:$0xff] }
 0x332   :  { %v2633_v53 = vmax.f32 %v2601_v29, 0.0  ;;  %v2603_v31 = vadd.f32 %v2571_v44, %v2523_v49  ;;  %v2363_v33 = vpop.f32.mrb[4].mxu1 }
 0x333   :  { %v2634_v56 = vmax.f32 %v2602_v30, 0.0  ;;  %v2480_v57 = vmul.f32 %v3971_v41, %v2363_v33  ;;  %v2365_v62 = vpop.f32.mrb[5].mxu1  ;;  %v2559_v30 = vld [vmem:[#allocation3 + $0x48] sm:$0xff]  ;;  %v2580_v33 = vunpack.c.l.bf16 %v2558_v47 }
 0x334   :  { %v3056_v3 = vpack.c.bf16 %v2633_v53, %v2632_v51  ;;  %v2635_v4 = vmax.f32 %v2603_v31, 0.0  ;;  %v2481_v7 = vmul.f32 %v3974_v11, %v2365_v62  ;;  %v2367_v10 = vpop.f32.mrb[6].mxu1  ;;  %v2581_v62 = vunpack.c.h.bf16 %v2558_v47 }
 0x335   :  { %v2524_v63 = vadd.f32 %v3977_v16, %v2480_v57  ;;  %v2482_v14 = vmul.f32 %v3971_v41, %v2367_v10  ;;  %v2369_v59 = vpop.f32.mrb[7].mxu1 }
 0x336   :  { %2766 = vst [vmem:[#allocation9 + $0x10] sm:$0xff] %v3056_v3  ;;  %v3057_v17 = vpack.c.bf16 %v2635_v4, %v2634_v56  ;;  %v2525_v18 = vadd.f32 %v3980_v0, %v2481_v7  ;;  %v2483_v19 = vmul.f32 %v3974_v11, %v2369_v59  ;;  %v2583_v59 = vunpack.c.h.bf16 %v2559_v30 }
 0x337   :  { %v2604_v21 = vadd.f32 %v2572_v61, %v2524_v63  ;;  %v2526_v22 = vadd.f32 %v3977_v16, %v2482_v14 }
 0x338   :  { %2767 = vst [vmem:[#allocation9 + $0x18] sm:$0xff] %v3057_v17  ;;  %v2605_v23 = vadd.f32 %v2573_v9, %v2525_v18  ;;  %v2527_v25 = vadd.f32 %v3980_v0, %v2483_v19  ;;  %v2582_v9 = vunpack.c.l.bf16 %v2559_v30 }
 0x339   :  { %v2636_v40 = vmax.f32 %v2604_v21, 0.0  ;;  %v2606_v42 = vadd.f32 %v2574_v15, %v2526_v22  ;;  %v2560_v21 = vld [vmem:[#allocation3 + $0x50] sm:$0xff] }
 0x33a   :  { %v2637_v46 = vmax.f32 %v2605_v23, 0.0  ;;  %v2607_v48 = vadd.f32 %v2575_v20, %v2527_v25  ;;  %v2373_v54 = vpop.f32.mrb[8].mxu1 }
 0x33b   :  { %v2638_v2 = vmax.f32 %v2606_v42, 0.0  ;;  %v2484_v12 = vmul.f32 %v3971_v41, %v2373_v54  ;;  %v2375_v24 = vpop.f32.mrb[9].mxu1  ;;  %v2561_v42 = vld [vmem:[#allocation3 + $0x58] sm:$0xff]  ;;  %v2584_v54 = vunpack.c.l.bf16 %v2560_v21 }
 0x33c   :  { %v3058_v36 = vpack.c.bf16 %v2637_v46, %v2636_v40  ;;  %v2639_v45 = vmax.f32 %v2607_v48, 0.0  ;;  %v2485_v6 = vmul.f32 %v3974_v11, %v2375_v24  ;;  %v2377_v1 = vpop.f32.mrb[10].mxu1  ;;  %v2585_v24 = vunpack.c.h.bf16 %v2560_v21 }
 0x33d   :  { %v2528_v5 = vadd.f32 %v3977_v16, %v2484_v12  ;;  %v2486_v52 = vmul.f32 %v3971_v41, %v2377_v1  ;;  %v2379_v35 = vpop.f32.mrb[11].mxu1 }
 0x33e   :  { %2768 = vst [vmem:[#allocation9 + $0x20] sm:$0xff] %v3058_v36  ;;  %v3059_v37 = vpack.c.bf16 %v2639_v45, %v2638_v2  ;;  %v2529_v38 = vadd.f32 %v3980_v0, %v2485_v6  ;;  %v2487_v39 = vmul.f32 %v3974_v11, %v2379_v35  ;;  %v2587_v35 = vunpack.c.h.bf16 %v2561_v42 }
 0x33f   :  { %v2608_v8 = vadd.f32 %v2576_v28, %v2528_v5  ;;  %v2530_v43 = vadd.f32 %v3977_v16, %v2486_v52 }
 0x340   :  { %2769 = vst [vmem:[#allocation9 + $0x28] sm:$0xff] %v3059_v37  ;;  %v2609_v27 = vadd.f32 %v2577_v32, %v2529_v38  ;;  %v2531_v44 = vadd.f32 %v3980_v0, %v2487_v39  ;;  %v2586_v32 = vunpack.c.l.bf16 %v2561_v42 }
 0x341   :  { %v2640_v34 = vmax.f32 %v2608_v8, 0.0  ;;  %v2610_v29 = vadd.f32 %v2578_v60, %v2530_v43  ;;  %v2562_v8 = vld [vmem:[#allocation3 + $0x60] sm:$0xff] }
 0x342   :  { %v2641_v49 = vmax.f32 %v2609_v27, 0.0  ;;  %v2611_v50 = vadd.f32 %v2579_v13, %v2531_v44  ;;  %v2383_v51 = vpop.f32.mrb[12].mxu1 }
 0x343   :  { %v2642_v53 = vmax.f32 %v2610_v29, 0.0  ;;  %v2488_v31 = vmul.f32 %v3971_v41, %v2383_v51  ;;  %v2385_v55 = vpop.f32.mrb[13].mxu1  ;;  %v2563_v29 = vld [vmem:[#allocation3 + $0x68] sm:$0xff]  ;;  %v2588_v51 = vunpack.c.l.bf16 %v2562_v8 }
 0x344   :  { %v3060_v56 = vpack.c.bf16 %v2641_v49, %v2640_v34  ;;  %v2643_v57 = vmax.f32 %v2611_v50, 0.0  ;;  %v2489_v61 = vmul.f32 %v3974_v11, %v2385_v55  ;;  %v2387_v3 = vpop.f32.mrb[14].mxu1  ;;  %v2589_v55 = vunpack.c.h.bf16 %v2562_v8 }
 0x345   :  { %v2532_v4 = vadd.f32 %v3977_v16, %v2488_v31  ;;  %v2490_v7 = vmul.f32 %v3971_v41, %v2387_v3  ;;  %v2389_v10 = vpop.f32.mrb[15].mxu1 }
 0x346   :  { %2770 = vst [vmem:[#allocation9 + $0x30] sm:$0xff] %v3060_v56  ;;  %v3061_v63 = vpack.c.bf16 %v2643_v57, %v2642_v53  ;;  %v2533_v14 = vadd.f32 %v3980_v0, %v2489_v61  ;;  %v2491_v15 = vmul.f32 %v3974_v11, %v2389_v10  ;;  %v2591_v10 = vunpack.c.h.bf16 %v2563_v29 }
 0x347   :  { %v2612_v17 = vadd.f32 %v2580_v33, %v2532_v4  ;;  %v2534_v18 = vadd.f32 %v3977_v16, %v2490_v7 }
 0x348   :  { %2771 = vst [vmem:[#allocation9 + $0x38] sm:$0xff] %v3061_v63  ;;  %v2613_v19 = vadd.f32 %v2581_v62, %v2533_v14  ;;  %v2535_v20 = vadd.f32 %v3980_v0, %v2491_v15  ;;  %v2590_v62 = vunpack.c.l.bf16 %v2563_v29 }
 0x349   :  { %v2644_v22 = vmax.f32 %v2612_v17, 0.0  ;;  %v2614_v23 = vadd.f32 %v2582_v9, %v2534_v18  ;;  %v2564_v17 = vld [vmem:[#allocation3 + $0x70] sm:$0xff] }
 0x34a   :  { %v2645_v25 = vmax.f32 %v2613_v19, 0.0  ;;  %v2615_v26 = vadd.f32 %v2583_v59, %v2535_v20  ;;  %v2393_v40 = vpop.f32.mrb[16].mxu1 }
 0x34b   :  { %v2646_v46 = vmax.f32 %v2614_v23, 0.0  ;;  %v2492_v48 = vmul.f32 %v3971_v41, %v2393_v40  ;;  %v2395_v58 = vpop.f32.mrb[17].mxu1  ;;  %v2565_v23 = vld [vmem:[#allocation3 + $0x78] sm:$0xff]  ;;  %v2592_v40 = vunpack.c.l.bf16 %v2564_v17 }
 0x34c   :  { %v3062_v2 = vpack.c.bf16 %v2645_v25, %v2644_v22  ;;  %v2647_v12 = vmax.f32 %v2615_v26, 0.0  ;;  %v2493_v28 = vmul.f32 %v3974_v11, %v2395_v58  ;;  %v2397_v36 = vpop.f32.mrb[18].mxu1  ;;  %v2593_v58 = vunpack.c.h.bf16 %v2564_v17 }
 0x34d   :  { %v2536_v45 = vadd.f32 %v3977_v16, %v2492_v48  ;;  %v2494_v6 = vmul.f32 %v3971_v41, %v2397_v36  ;;  %v2399_v1 = vpop.f32.mrb[19].mxu1 }
 0x34e   :  { %2772 = vst [vmem:[#allocation9 + $0x40] sm:$0xff] %v3062_v2  ;;  %v3063_v5 = vpack.c.bf16 %v2647_v12, %v2646_v46  ;;  %v2537_v52 = vadd.f32 %v3980_v0, %v2493_v28  ;;  %v2495_v60 = vmul.f32 %v3974_v11, %v2399_v1  ;;  %v2595_v1 = vunpack.c.h.bf16 %v2565_v23 }
 0x34f   :  { %v2616_v37 = vadd.f32 %v2584_v54, %v2536_v45  ;;  %v2538_v38 = vadd.f32 %v3977_v16, %v2494_v6 }
 0x350   :  { %2773 = vst [vmem:[#allocation9 + $0x48] sm:$0xff] %v3063_v5  ;;  %v2617_v39 = vadd.f32 %v2585_v24, %v2537_v52  ;;  %v2539_v13 = vadd.f32 %v3980_v0, %v2495_v60  ;;  %v2594_v24 = vunpack.c.l.bf16 %v2565_v23 }
 0x351   :  { %v2648_v43 = vmax.f32 %v2616_v37, 0.0  ;;  %v2618_v27 = vadd.f32 %v2586_v32, %v2538_v38  ;;  %v2566_v37 = vld [vmem:[#allocation3 + $0x80] sm:$0xff] }
 0x352   :  { %v2649_v44 = vmax.f32 %v2617_v39, 0.0  ;;  %v2619_v47 = vadd.f32 %v2587_v35, %v2539_v13  ;;  %v2403_v34 = vpop.f32.mrb[20].mxu1 }
 0x353   :  { %v2650_v49 = vmax.f32 %v2618_v27, 0.0  ;;  %v2496_v50 = vmul.f32 %v3971_v41, %v2403_v34  ;;  %v2405_v30 = vpop.f32.mrb[21].mxu1  ;;  %v2567_v27 = vld [vmem:[#allocation3 + $0x88] sm:$0xff]  ;;  %v2596_v34 = vunpack.c.l.bf16 %v2566_v37 }
 0x354   :  { %v3064_v53 = vpack.c.bf16 %v2649_v44, %v2648_v43  ;;  %v2651_v31 = vmax.f32 %v2619_v47, 0.0  ;;  %v2497_v33 = vmul.f32 %v3974_v11, %v2405_v30  ;;  %v2407_v56 = vpop.f32.mrb[22].mxu1  ;;  %v2597_v30 = vunpack.c.h.bf16 %v2566_v37 }
 0x355   :  { %v2540_v57 = vadd.f32 %v3977_v16, %v2496_v50  ;;  %v2498_v61 = vmul.f32 %v3971_v41, %v2407_v56  ;;  %v2409_v3 = vpop.f32.mrb[23].mxu1 }
 0x356   :  { %2774 = vst [vmem:[#allocation9 + $0x50] sm:$0xff] %v3064_v53  ;;  %v3065_v4 = vpack.c.bf16 %v2651_v31, %v2650_v49  ;;  %v2541_v7 = vadd.f32 %v3980_v0, %v2497_v33  ;;  %v2499_v9 = vmul.f32 %v3974_v11, %v2409_v3  ;;  %v2599_v3 = vunpack.c.h.bf16 %v2567_v27 }
 0x357   :  { %v2620_v63 = vadd.f32 %v2588_v51, %v2540_v57  ;;  %v2542_v14 = vadd.f32 %v3977_v16, %v2498_v61 }
 0x358   :  { %2775 = vst [vmem:[#allocation9 + $0x58] sm:$0xff] %v3065_v4  ;;  %v2621_v15 = vadd.f32 %v2589_v55, %v2541_v7  ;;  %v2543_v59 = vadd.f32 %v3980_v0, %v2499_v9  ;;  %v2598_v55 = vunpack.c.l.bf16 %v2567_v27 }
 0x359   :  { %v2652_v18 = vmax.f32 %v2620_v63, 0.0  ;;  %v2622_v19 = vadd.f32 %v2590_v62, %v2542_v14 }
 0x35a   :  { %v2653_v20 = vmax.f32 %v2621_v15, 0.0  ;;  %v2623_v21 = vadd.f32 %v2591_v10, %v2543_v59  ;;  %v2413_v22 = vpop.f32.mrb[24].mxu1 }
 0x35b   :  { %v2654_v25 = vmax.f32 %v2622_v19, 0.0  ;;  %v2500_v26 = vmul.f32 %v3971_v41, %v2413_v22  ;;  %v2415_v42 = vpop.f32.mrb[25].mxu1 }
 0x35c   :  { %v3066_v46 = vpack.c.bf16 %v2653_v20, %v2652_v18  ;;  %v2655_v48 = vmax.f32 %v2623_v21, 0.0  ;;  %v2501_v54 = vmul.f32 %v3974_v11, %v2415_v42  ;;  %v2417_v2 = vpop.f32.mrb[26].mxu1 }
 0x35d   :  { %v2544_v12 = vadd.f32 %v3977_v16, %v2500_v26  ;;  %v2502_v28 = vmul.f32 %v3971_v41, %v2417_v2  ;;  %v2419_v36 = vpop.f32.mrb[27].mxu1 }
 0x35e   :  { %2776 = vst [vmem:[#allocation9 + $0x60] sm:$0xff] %v3066_v46  ;;  %v3067_v45 = vpack.c.bf16 %v2655_v48, %v2654_v25  ;;  %v2545_v6 = vadd.f32 %v3980_v0, %v2501_v54  ;;  %v2503_v32 = vmul.f32 %v3974_v11, %v2419_v36 }
 0x35f   :  { %v2624_v5 = vadd.f32 %v2592_v40, %v2544_v12  ;;  %v2546_v52 = vadd.f32 %v3977_v16, %v2502_v28 }
 0x360   :  { %2777 = vst [vmem:[#allocation9 + $0x68] sm:$0xff] %v3067_v45  ;;  %v2625_v60 = vadd.f32 %v2593_v58, %v2545_v6  ;;  %v2547_v35 = vadd.f32 %v3980_v0, %v2503_v32 }
 0x361   :  { %v2656_v38 = vmax.f32 %v2624_v5, 0.0  ;;  %v2626_v39 = vadd.f32 %v2594_v24, %v2546_v52 }
 0x362   :  { %v2657_v13 = vmax.f32 %v2625_v60, 0.0  ;;  %v2627_v8 = vadd.f32 %v2595_v1, %v2547_v35  ;;  %v2423_v43 = vpop.f32.mrb[28].mxu1 }
 0x363   :  { %v2658_v44 = vmax.f32 %v2626_v39, 0.0  ;;  %v2504_v47 = vmul.f32 %v3971_v41, %v2423_v43  ;;  %v2425_v29 = vpop.f32.mrb[29].mxu1 }
 0x364   :  { %v3068_v49 = vpack.c.bf16 %v2657_v13, %v2656_v38  ;;  %v2659_v50 = vmax.f32 %v2627_v8, 0.0  ;;  %v2505_v51 = vmul.f32 %v3974_v11, %v2425_v29  ;;  %v2427_v53 = vpop.f32.mrb[30].mxu1 }
 0x365   :  { %v2548_v31 = vadd.f32 %v3977_v16, %v2504_v47  ;;  %v2506_v33 = vmul.f32 %v3971_v41, %v2427_v53  ;;  %v2429_v56 = vpop.f32.mrb[31].mxu1 }
 0x366   :  { %2778 = vst [vmem:[#allocation9 + $0x70] sm:$0xff] %v3068_v49  ;;  %v3069_v57 = vpack.c.bf16 %v2659_v50, %v2658_v44  ;;  %v2549_v61 = vadd.f32 %v3980_v0, %v2505_v51  ;;  %v2507_v62 = vmul.f32 %v3974_v11, %v2429_v56 }
 0x367   :  { %v2628_v4 = vadd.f32 %v2596_v34, %v2548_v31  ;;  %v2550_v7 = vadd.f32 %v3977_v16, %v2506_v33 }
 0x368   :  { %2779 = vst [vmem:[#allocation9 + $0x78] sm:$0xff] %v3069_v57  ;;  %v2629_v9 = vadd.f32 %v2597_v30, %v2549_v61  ;;  %v2551_v10 = vadd.f32 %v3980_v0, %v2507_v62 }
 0x369   :  { %v2660_v63 = vmax.f32 %v2628_v4, 0.0  ;;  %v2630_v14 = vadd.f32 %v2598_v55, %v2550_v7 }
 0x36a   :  { %v2661_v15 = vmax.f32 %v2629_v9, 0.0  ;;  %v2631_v41 = vadd.f32 %v2599_v3, %v2551_v10 }
 0x36b   :  { %v2662_v59 = vmax.f32 %v2630_v14, 0.0 }
 0x36c   :  { %v3070_v17 = vpack.c.bf16 %v2661_v15, %v2660_v63  ;;  %v2663_v18 = vmax.f32 %v2631_v41, 0.0 }
 0x36e   :  { %2780 = vst [vmem:[#allocation9 + $0x80] sm:$0xff] %v3070_v17  ;;  %v3071_v19 = vpack.c.bf16 %v2663_v18, %v2662_v59 }
 0x370   :  { %2781 = vst [vmem:[#allocation9 + $0x88] sm:$0xff] %v3071_v19 }
 0x371   :  { %3602 = shalt.err (!%p3599_p0)
}
 0x372   :  { %s3603_s24 = scalar_lea.hbm %s4068_s7, 2560 }
 0x373   :  { %p3604_p1 = scmp.ne.s32.totalorder %s4068_s7, %s3603_s24  ;;  %p3607_p2 = scmp.lt.u32.totalorder %s3603_s24, %s4068_s7 }
 0x375   :  { %p3609_p3 = pnand %p3607_p2, %p3604_p1 }
 0x377   :  { %3612 = shalt.err (!%p3609_p3)
}
 0x378   :  { %2793 = dma.vmem_to_hbm [thread:$0]  %s2788_s6, 2560, %s4068_s7, [#allocation5], %s3621_s13, %s3621_s13, %s3622_s14  }
 0x379   :  { %3617 = dma.done.wait [#allocation5], 2560  }
 0x37a   :  { %3618 = vsyncadd [#allocation5], 4294964736 }
 0x37b   :  { %2797 = vsyncpa [#allocation4], 1 }
 0x37c   :  { %2798 = vsyncpa [#allocation7], 1 }
 0x37d   :  { %2799 = vsyncpa [#allocation5], 1 }

// kernel: tpu_custom_call.1
= control target key start
LH: loop header
LB: loop body
LE: loop exit
PB: predicated region body
PF: predicated region fallthrough
CT: control target
= control target key end

     0   :  { %12 = vsyncpa [#allocation4], 0  ;;  %s4061_s0 = inlined_call_operand.hbm [shape: bf16[10,16,256], index: 0, kind: input, shape index: {}]   ;;  %s4062_s1 = inlined_call_operand.hbm [shape: bf16[3,256,256], index: 1, kind: input, shape index: {}]   ;;  %s4063_s2 = inlined_call_operand.vmem [shape: f32[1,256], index: 2, kind: input, shape index: {}]   ;;  %s4064_s3 = inlined_call_operand.vmem [shape: f32[1,256], index: 3, kind: input, shape index: {}]   ;;  %s4065_s4 = inlined_call_operand.hbm [shape: bf16[3,256,256], index: 4, kind: input, shape index: {}]   ;;  %s4066_s5 = inlined_call_operand.vmem [shape: f32[1,256], index: 5, kind: input, shape index: {}]   ;;  %s4067_s6 = inlined_call_operand.vmem [shape: f32[1,256], index: 6, kind: input, shape index: {}]   ;;  %s4068_s7 = inlined_call_operand.hbm [shape: bf16[10,16,256], index: 7, kind: output, shape index: {}]  }
   0x1   :  { %13 = vsyncpa [#allocation7], 0 }
   0x2   :  { %14 = vsyncpa [#allocation5], 0  ;;  %s3619_s24 = smov [#allocation6]   ;;  %s3620_s26 = smov [#allocation3]  }
   0x3   :  { %s32_s25 = sshll.u32 %s3619_s24, 4  ;;  %s20_s27 = sshll.u32 %s3620_s26, 4  ;;  %s33_s25 = int_to_ptr.vmem [resolvable:$true] %s32_s25  ;;  %s3666_s27 = int_to_ptr.vmem [resolvable:$true] %s20_s27 }
   0x4   :  { %s3525_s30 = scalar_lea.hbm %s4062_s1, 12288 }
   0x5   :  { %p3526_p0 = scmp.ne.s32.totalorder %s4062_s1, %s3525_s30  ;;  %p3529_p1 = scmp.lt.u32.totalorder %s3525_s30, %s4062_s1 }
   0x7   :  { %p3531_p2 = pnand %p3529_p1, %p3526_p0 }
   0x9   :  { %3534 = shalt.err (!%p3531_p2)
}
   0xa   :  { %s3535_s12 = scalar_lea.vmem %s33_s25, 12288  ;;  %p3540_p4 = scmp.lt.s32.totalorder %s33_s25, %s33_s25 }
   0xb   :  { %p3536_p3 = scmp.ne.s32.totalorder %s33_s25, %s3535_s12  ;;  %p3541_p5 = scmp.lt.s32.totalorder %s3535_s12, %s3535_s12 }
   0xd   :  { %p3542_p6 = por %p3541_p5, %p3540_p4 }
   0xf   :  { %p3543_p7 = pnand %p3542_p6, %p3536_p3 }
  0x11   :  { %3546 = shalt.err (!%p3543_p7)
}
  0x12   :  { %s3621_s13 = smov 128   ;;  %s3622_s14 = smov 8  }
  0x13   :  { %38 = dma.hbm_to_vmem [thread:$0]  %s4062_s1, 12288, %s33_s25, [#allocation7], %s3621_s13, %s3621_s13, %s3622_s14  }
  0x14   :  { %s3547_s19 = scalar_lea.hbm %s4061_s0, 2560 }
  0x15   :  { %p3548_p8 = scmp.ne.s32.totalorder %s4061_s0, %s3547_s19  ;;  %p3551_p9 = scmp.lt.u32.totalorder %s3547_s19, %s4061_s0 }
  0x17   :  { %p3553_p10 = pnand %p3551_p9, %p3548_p8 }
  0x19   :  { %3556 = shalt.err (!%p3553_p10)
}
  0x1a   :  { %s3557_s24 = scalar_lea.vmem %s3666_s27, 2560  ;;  %p3562_p12 = scmp.lt.s32.totalorder %s3666_s27, %s3666_s27 }
  0x1b   :  { %p3558_p11 = scmp.ne.s32.totalorder %s3666_s27, %s3557_s24  ;;  %p3563_p13 = scmp.lt.s32.totalorder %s3557_s24, %s3557_s24 }
  0x1d   :  { %p3564_p0 = por %p3563_p13, %p3562_p12 }
  0x1f   :  { %p3565_p1 = pnand %p3564_p0, %p3558_p11 }
  0x21   :  { %3568 = shalt.err (!%p3565_p1)
}
  0x22   :  { %26 = dma.hbm_to_vmem [thread:$0]  %s4061_s0, 2560, %s3666_s27, [#allocation4], %s3621_s13, %s3621_s13, %s3622_s14  }
  0x23   :  { %s3623_s26 = smov [#allocation8]   ;;  %s3569_s8 = scalar_lea.hbm %s4065_s4, 12288 }
  0x24   :  { %s48_s28 = sshll.u32 %s3623_s26, 4  ;;  %p3570_p2 = scmp.ne.s32.totalorder %s4065_s4, %s3569_s8  ;;  %s49_s28 = int_to_ptr.vmem [resolvable:$true] %s48_s28 }
  0x25   :  { %p3573_p3 = scmp.lt.u32.totalorder %s3569_s8, %s4065_s4 }
  0x27   :  { %p3575_p4 = pnand %p3573_p3, %p3570_p2 }
  0x29   :  { %3578 = shalt.err (!%p3575_p4)
}
  0x2a   :  { %s3579_s15 = scalar_lea.vmem %s49_s28, 12288  ;;  %p3584_p6 = scmp.lt.s32.totalorder %s49_s28, %s49_s28 }
  0x2b   :  { %p3580_p5 = scmp.ne.s32.totalorder %s49_s28, %s3579_s15  ;;  %p3585_p7 = scmp.lt.s32.totalorder %s3579_s15, %s3579_s15 }
  0x2d   :  { %p3586_p8 = por %p3585_p7, %p3584_p6 }
  0x2f   :  { %p3587_p9 = pnand %p3586_p8, %p3580_p5 }
  0x31   :  { %3590 = shalt.err (!%p3587_p9)
}
  0x32   :  { %54 = dma.hbm_to_vmem [thread:$0]  %s4065_s4, 12288, %s49_s28, [#allocation7], %s3621_s13, %s3621_s13, %s3622_s14  }
  0x33   :  { %3613 = dma.done.wait [#allocation4], 2560  }
  0x34   :  { %3614 = vsyncadd [#allocation4], 4294964736 }
  0x35   :  { %3615 = dma.done.wait [#allocation7], 24576  }
  0x36   :  { %3616 = vsyncadd [#allocation7], 4294942720  ;;  %v3207_v0 = vld [vmem:[#allocation6 + $0x104] ss:$8 sps:$4 sm:$0xff]   ;;  %v3209_v1 = vld [vmem:[#allocation6 + $0x100] ss:$8 sps:$4 sm:$0xff]  }
  0x37   :  { %412 = vmatprep.subr.bf16.mxu0 %v3207_v0  ;;  %v3210_v2 = vld [vmem:[#allocation6 + $0x114] ss:$8 sps:$4 sm:$0xff]   ;;  %v3212_v3 = vld [vmem:[#allocation6 + $0x110] ss:$8 sps:$4 sm:$0xff]   ;;  %v3213_v4 = vld [vmem:[#allocation6 + $0x124] ss:$8 sps:$4 sm:$0xff]  }
  0x38   :  { %413 = vmatpush1.bf16.msra.mxu0 %v3209_v1  ;;  %v3215_v5 = vld [vmem:[#allocation6 + $0x120] ss:$8 sps:$4 sm:$0xff]   ;;  %v3216_v6 = vld [vmem:[#allocation6 + $0x134] ss:$8 sps:$4 sm:$0xff]   ;;  %v3218_v7 = vld [vmem:[#allocation6 + $0x130] ss:$8 sps:$4 sm:$0xff]  }
  0x39   :  { %414 = vmatprep.subr.bf16.mxu0 %v3210_v2  ;;  %v3219_v8 = vld [vmem:[#allocation6 + $0x144] ss:$8 sps:$4 sm:$0xff]   ;;  %v3221_v9 = vld [vmem:[#allocation6 + $0x140] ss:$8 sps:$4 sm:$0xff]   ;;  %v3222_v10 = vld [vmem:[#allocation6 + $0x154] ss:$8 sps:$4 sm:$0xff]  }
  0x3a   :  { %v3224_v11 = vld [vmem:[#allocation6 + $0x150] ss:$8 sps:$4 sm:$0xff]   ;;  %v3225_v12 = vld [vmem:[#allocation6 + $0x164] ss:$8 sps:$4 sm:$0xff]   ;;  %v3718_v13 = vld [vmem:[#allocation3 + $0x14] ss:$8 sps:$4 sm:$0xff]  }
  0x3b   :  { %v3227_v14 = vld [vmem:[#allocation6 + $0x160] ss:$8 sps:$4 sm:$0xff]   ;;  %v3228_v15 = vld [vmem:[#allocation6 + $0x174] ss:$8 sps:$4 sm:$0xff]   ;;  %444 = vmatprep.mubr.bf16.mxu0 %v3718_v13  ;;  %v3230_v16 = vld [vmem:[#allocation6 + $0x170] ss:$8 sps:$4 sm:$0xff]  }
  0x3c   :  { %415 = vmatpush1.bf16.msra.mxu0 %v3212_v3  ;;  %v3231_v17 = vld [vmem:[#allocation6 + $0x184] ss:$8 sps:$4 sm:$0xff]   ;;  %v3233_v18 = vld [vmem:[#allocation6 + $0x180] ss:$8 sps:$4 sm:$0xff]   ;;  %v3234_v19 = vld [vmem:[#allocation6 + $0x194] ss:$8 sps:$4 sm:$0xff]  }
  0x3d   :  { %416 = vmatprep.subr.bf16.mxu0 %v3213_v4  ;;  %v3236_v20 = vld [vmem:[#allocation6 + $0x190] ss:$8 sps:$4 sm:$0xff]   ;;  %v3237_v21 = vld [vmem:[#allocation6 + $0x1a4] ss:$8 sps:$4 sm:$0xff]   ;;  %v3239_v22 = vld [vmem:[#allocation6 + $0x1a0] ss:$8 sps:$4 sm:$0xff]  }
  0x3e   :  { %v3240_v23 = vld [vmem:[#allocation6 + $0x1b4] ss:$8 sps:$4 sm:$0xff]   ;;  %v3242_v24 = vld [vmem:[#allocation6 + $0x1b0] ss:$8 sps:$4 sm:$0xff]   ;;  %v3243_v25 = vld [vmem:[#allocation6 + $0x1c4] ss:$8 sps:$4 sm:$0xff]  }
  0x3f   :  { %v3245_v26 = vld [vmem:[#allocation6 + $0x1c0] ss:$8 sps:$4 sm:$0xff]   ;;  %v3246_v27 = vld [vmem:[#allocation6 + $0x1d4] ss:$8 sps:$4 sm:$0xff]   ;;  %v3248_v28 = vld [vmem:[#allocation6 + $0x1d0] ss:$8 sps:$4 sm:$0xff]  }
  0x40   :  { %417 = vmatpush1.bf16.msra.mxu0 %v3215_v5  ;;  %v3249_v29 = vld [vmem:[#allocation6 + $0x1e4] ss:$8 sps:$4 sm:$0xff]   ;;  %v3251_v30 = vld [vmem:[#allocation6 + $0x1e0] ss:$8 sps:$4 sm:$0xff]   ;;  %v3252_v31 = vld [vmem:[#allocation6 + $0x1f4] ss:$8 sps:$4 sm:$0xff]  }
  0x41   :  { %418 = vmatprep.subr.bf16.mxu0 %v3216_v6  ;;  %v3254_v32 = vld [vmem:[#allocation6 + $0x1f0] ss:$8 sps:$4 sm:$0xff]   ;;  %v3260_v33 = vld [vmem:[#allocation6 + $0x4] ss:$8 sps:$4 sm:$0xff]   ;;  %v3258_v35 = vld [vmem:[#allocation6] ss:$8 sps:$4 sm:$0xff]  }
  0x42   :  { %v3721_v34 = vld [vmem:[#allocation3 + $0x10] ss:$8 sps:$4 sm:$0xff]   ;;  %v3723_v36 = vld [vmem:[#allocation3 + $0x24] ss:$8 sps:$4 sm:$0xff]   ;;  %v3263_v37 = vld [vmem:[#allocation6 + $0x14] ss:$8 sps:$4 sm:$0xff]  }
  0x43   :  { %v3261_v38 = vld [vmem:[#allocation6 + $0x10] ss:$8 sps:$4 sm:$0xff]   ;;  %v3269_v39 = vld [vmem:[#allocation6 + $0x24] ss:$8 sps:$4 sm:$0xff]   ;;  %v3727_v40 = vld [vmem:[#allocation3 + $0x20] ss:$8 sps:$4 sm:$0xff]  }
  0x44   :  { %419 = vmatpush1.bf16.msra.mxu0 %v3218_v7  ;;  %v3267_v41 = vld [vmem:[#allocation6 + $0x20] ss:$8 sps:$4 sm:$0xff]   ;;  %v3729_v42 = vld [vmem:[#allocation3 + $0x34] ss:$8 sps:$4 sm:$0xff]   ;;  %v3270_v44 = vld [vmem:[#allocation6 + $0x30] ss:$8 sps:$4 sm:$0xff]  }
  0x45   :  { %420 = vmatprep.subr.bf16.mxu0 %v3219_v8  ;;  %v3272_v43 = vld [vmem:[#allocation6 + $0x34] ss:$8 sps:$4 sm:$0xff]   ;;  %v3278_v45 = vld [vmem:[#allocation6 + $0x44] ss:$8 sps:$4 sm:$0xff]   ;;  %v3733_v46 = vld [vmem:[#allocation3 + $0x30] ss:$8 sps:$4 sm:$0xff]  }
  0x46   :  { %v3276_v47 = vld [vmem:[#allocation6 + $0x40] ss:$8 sps:$4 sm:$0xff]   ;;  %v3735_v48 = vld [vmem:[#allocation3 + $0x44] ss:$8 sps:$4 sm:$0xff]   ;;  %v3281_v49 = vld [vmem:[#allocation6 + $0x54] ss:$8 sps:$4 sm:$0xff]  }
  0x47   :  { %v3279_v50 = vld [vmem:[#allocation6 + $0x50] ss:$8 sps:$4 sm:$0xff]   ;;  %v3287_v51 = vld [vmem:[#allocation6 + $0x64] ss:$8 sps:$4 sm:$0xff]   ;;  %v3739_v52 = vld [vmem:[#allocation3 + $0x40] ss:$8 sps:$4 sm:$0xff]  }
  0x48   :  { %421 = vmatpush1.bf16.msra.mxu0 %v3221_v9  ;;  %v3285_v53 = vld [vmem:[#allocation6 + $0x60] ss:$8 sps:$4 sm:$0xff]   ;;  %v3741_v54 = vld [vmem:[#allocation3 + $0x54] ss:$8 sps:$4 sm:$0xff]   ;;  %v3288_v56 = vld [vmem:[#allocation6 + $0x70] ss:$8 sps:$4 sm:$0xff]  }
  0x49   :  { %422 = vmatprep.subr.bf16.mxu0 %v3222_v10  ;;  %v3290_v55 = vld [vmem:[#allocation6 + $0x74] ss:$8 sps:$4 sm:$0xff]   ;;  %v3296_v57 = vld [vmem:[#allocation6 + $0x84] ss:$8 sps:$4 sm:$0xff]   ;;  %v3745_v58 = vld [vmem:[#allocation3 + $0x50] ss:$8 sps:$4 sm:$0xff]  }
  0x4a   :  { %v3294_v59 = vld [vmem:[#allocation6 + $0x80] ss:$8 sps:$4 sm:$0xff]   ;;  %v3747_v60 = vld [vmem:[#allocation3 + $0x64] ss:$8 sps:$4 sm:$0xff]   ;;  %v3299_v61 = vld [vmem:[#allocation6 + $0x94] ss:$8 sps:$4 sm:$0xff]  }
  0x4b   :  { %v3297_v62 = vld [vmem:[#allocation6 + $0x90] ss:$8 sps:$4 sm:$0xff]   ;;  %v3305_v63 = vld [vmem:[#allocation6 + $0xa4] ss:$8 sps:$4 sm:$0xff]   ;;  %v3751_v0 = vld [vmem:[#allocation3 + $0x60] ss:$8 sps:$4 sm:$0xff]  }
  0x4c   :  { %423 = vmatpush1.bf16.msra.mxu0 %v3224_v11  ;;  %v3303_v1 = vld [vmem:[#allocation6 + $0xa0] ss:$8 sps:$4 sm:$0xff]   ;;  %v3753_v2 = vld [vmem:[#allocation3 + $0x74] ss:$8 sps:$4 sm:$0xff]   ;;  %v3306_v4 = vld [vmem:[#allocation6 + $0xb0] ss:$8 sps:$4 sm:$0xff]  }
  0x4d   :  { %424 = vmatprep.subr.bf16.mxu0 %v3225_v12  ;;  %v3308_v3 = vld [vmem:[#allocation6 + $0xb4] ss:$8 sps:$4 sm:$0xff]   ;;  %v3314_v5 = vld [vmem:[#allocation6 + $0xc4] ss:$8 sps:$4 sm:$0xff]   ;;  %v3757_v6 = vld [vmem:[#allocation3 + $0x70] ss:$8 sps:$4 sm:$0xff]  }
  0x4e   :  { %v3312_v7 = vld [vmem:[#allocation6 + $0xc0] ss:$8 sps:$4 sm:$0xff]   ;;  %v3759_v8 = vld [vmem:[#allocation3 + $0x84] ss:$8 sps:$4 sm:$0xff]   ;;  %v3317_v9 = vld [vmem:[#allocation6 + $0xd4] ss:$8 sps:$4 sm:$0xff]  }
  0x4f   :  { %v3315_v10 = vld [vmem:[#allocation6 + $0xd0] ss:$8 sps:$4 sm:$0xff]   ;;  %v3323_v11 = vld [vmem:[#allocation6 + $0xe4] ss:$8 sps:$4 sm:$0xff]   ;;  %v3763_v12 = vld [vmem:[#allocation3 + $0x80] ss:$8 sps:$4 sm:$0xff]  }
  0x50   :  { %425 = vmatpush1.bf16.msra.mxu0 %v3227_v14  ;;  %v3321_v14 = vld [vmem:[#allocation6 + $0xe0] ss:$8 sps:$4 sm:$0xff]  }
  0x51   :  { %426 = vmatprep.subr.bf16.mxu0 %v3228_v15  ;;  %v3329_v15 = vld [vmem:[#allocation3 + $0x4] ss:$8 sps:$4 sm:$0xff]  }
  0x54   :  { %427 = vmatpush1.bf16.msra.mxu0 %v3230_v16  ;;  %v3326_v16 = vld [vmem:[#allocation6 + $0xf4] ss:$8 sps:$4 sm:$0xff]  }
  0x55   :  { %428 = vmatprep.subr.bf16.mxu0 %v3231_v17  ;;  %v3381_v17 = vld [vmem:[#allocation8 + $0x104] ss:$8 sps:$4 sm:$0xff]  }
  0x56   :  { %1723 = vmatprep.subr.bf16.mxu1 %v3381_v17  ;;  %v3419_v17 = vld [vmem:[#allocation8 + $0x1c0] ss:$8 sps:$4 sm:$0xff]  }
  0x58   :  { %429 = vmatpush1.bf16.msra.mxu0 %v3233_v18  ;;  %v3383_v18 = vld [vmem:[#allocation8 + $0x100] ss:$8 sps:$4 sm:$0xff]  }
  0x59   :  { %430 = vmatprep.subr.bf16.mxu0 %v3234_v19  ;;  %v3384_v19 = vld [vmem:[#allocation8 + $0x114] ss:$8 sps:$4 sm:$0xff]   ;;  %1724 = vmatpush1.bf16.msra.mxu1 %v3383_v18  ;;  %v3363_v18 = vld [vmem:[#allocation6 + $0x2b0] ss:$8 sps:$4 sm:$0xff]  }
  0x5a   :  { %1725 = vmatprep.subr.bf16.mxu1 %v3384_v19  ;;  %v3368_v19 = vld [vmem:[#allocation6 + $0x2c4] ss:$8 sps:$4 sm:$0xff]  }
  0x5c   :  { %431 = vmatpush1.bf16.msra.mxu0 %v3236_v20  ;;  %v3324_v20 = vld [vmem:[#allocation6 + $0xf0] ss:$8 sps:$4 sm:$0xff]  }
  0x5d   :  { %432 = vmatprep.subr.bf16.mxu0 %v3237_v21  ;;  %v3332_v21 = vld [vmem:[#allocation6 + $0x204] ss:$8 sps:$4 sm:$0xff]  }
  0x60   :  { %433 = vmatpush1.bf16.msra.mxu0 %v3239_v22  ;;  %v3386_v22 = vld [vmem:[#allocation8 + $0x110] ss:$8 sps:$4 sm:$0xff]  }
  0x61   :  { %434 = vmatprep.subr.bf16.mxu0 %v3240_v23  ;;  %v3327_v23 = vld [vmem:[#allocation3] ss:$8 sps:$4 sm:$0xff]   ;;  %1726 = vmatpush1.bf16.msra.mxu1 %v3386_v22  ;;  %v3369_v22 = vld [vmem:[#allocation6 + $0x2d0] ss:$8 sps:$4 sm:$0xff]  }
  0x64   :  { %435 = vmatpush1.bf16.msra.mxu0 %v3242_v24  ;;  %v3387_v24 = vld [vmem:[#allocation8 + $0x124] ss:$8 sps:$4 sm:$0xff]  }
  0x65   :  { %436 = vmatprep.subr.bf16.mxu0 %v3243_v25  ;;  %v3330_v25 = vld [vmem:[#allocation6 + $0x200] ss:$8 sps:$4 sm:$0xff]   ;;  %1727 = vmatprep.subr.bf16.mxu1 %v3387_v24 }
  0x66   :  { %v3372_v24 = vld [vmem:[#allocation6 + $0x2e0] ss:$8 sps:$4 sm:$0xff]  }
  0x68   :  { %437 = vmatpush1.bf16.msra.mxu0 %v3245_v26  ;;  %v3335_v26 = vld [vmem:[#allocation6 + $0x214] ss:$8 sps:$4 sm:$0xff]  }
  0x69   :  { %438 = vmatprep.subr.bf16.mxu0 %v3246_v27  ;;  %v3389_v27 = vld [vmem:[#allocation8 + $0x120] ss:$8 sps:$4 sm:$0xff]  }
  0x6a   :  { %1728 = vmatpush1.bf16.msra.mxu1 %v3389_v27 }
  0x6c   :  { %439 = vmatpush1.bf16.msra.mxu0 %v3248_v28  ;;  %v3390_v28 = vld [vmem:[#allocation8 + $0x134] ss:$8 sps:$4 sm:$0xff]  }
  0x6d   :  { %440 = vmatprep.subr.bf16.mxu0 %v3249_v29  ;;  %v3333_v29 = vld [vmem:[#allocation6 + $0x210] ss:$8 sps:$4 sm:$0xff]   ;;  %1729 = vmatprep.subr.bf16.mxu1 %v3390_v28  ;;  %v1357_v28 = vld [vmem:[%s4064_s3] sm:$0x3] }
  0x70   :  { %441 = vmatpush1.bf16.msra.mxu0 %v3251_v30  ;;  %v3338_v30 = vld [vmem:[#allocation6 + $0x224] ss:$8 sps:$4 sm:$0xff]  }
  0x71   :  { %442 = vmatprep.subr.bf16.mxu0 %v3252_v31  ;;  %v3392_v31 = vld [vmem:[#allocation8 + $0x130] ss:$8 sps:$4 sm:$0xff]  }
  0x72   :  { %1730 = vmatpush1.bf16.msra.mxu1 %v3392_v31 }
  0x74   :  { %443 = vmatpush1.bf16.msra.mxu0 %v3254_v32  ;;  %v3393_v32 = vld [vmem:[#allocation8 + $0x144] ss:$8 sps:$4 sm:$0xff]  }
  0x75   :  { %765 = vmatprep.subr.bf16.mxu0 %v3260_v33  ;;  %v3336_v33 = vld [vmem:[#allocation6 + $0x220] ss:$8 sps:$4 sm:$0xff]   ;;  %1731 = vmatprep.subr.bf16.mxu1 %v3393_v32 }
  0x77   :  { %445 = vmatmul.mubr.bf16.vlgmr.msra.gmra.mrb[0].mxu0 %v3721_v34 }
  0x78   :  { %766 = vmatpush1.bf16.msra.mxu0 %v3258_v35  ;;  %454 = vmatprep.mubr.bf16.mxu0 %v3723_v36  ;;  %v3341_v35 = vld [vmem:[#allocation6 + $0x234] ss:$8 sps:$4 sm:$0xff]  }
  0x79   :  { %767 = vmatprep.subr.bf16.mxu0 %v3263_v37  ;;  %v3395_v37 = vld [vmem:[#allocation8 + $0x140] ss:$8 sps:$4 sm:$0xff]  }
  0x7a   :  { %1732 = vmatpush1.bf16.msra.mxu1 %v3395_v37 }
  0x7c   :  { %768 = vmatpush1.bf16.msra.mxu0 %v3261_v38  ;;  %v3396_v38 = vld [vmem:[#allocation8 + $0x154] ss:$8 sps:$4 sm:$0xff]  }
  0x7d   :  { %769 = vmatprep.subr.bf16.mxu0 %v3269_v39  ;;  %v3339_v39 = vld [vmem:[#allocation6 + $0x230] ss:$8 sps:$4 sm:$0xff]   ;;  %1733 = vmatprep.subr.bf16.mxu1 %v3396_v38 }
  0x7f   :  { %455 = vmatmul.mubr.bf16.gmra.mrb[4].mxu0 %v3727_v40 }
  0x80   :  { %770 = vmatpush1.bf16.msra.mxu0 %v3267_v41  ;;  %464 = vmatprep.mubr.bf16.mxu0 %v3729_v42  ;;  %v3398_v41 = vld [vmem:[#allocation8 + $0x150] ss:$8 sps:$4 sm:$0xff]  }
  0x81   :  { %771 = vmatprep.subr.bf16.mxu0 %v3272_v43  ;;  %v3399_v43 = vld [vmem:[#allocation8 + $0x164] ss:$8 sps:$4 sm:$0xff]   ;;  %1734 = vmatpush1.bf16.msra.mxu1 %v3398_v41 }
  0x82   :  { %1735 = vmatprep.subr.bf16.mxu1 %v3399_v43 }
  0x84   :  { %772 = vmatpush1.bf16.msra.mxu0 %v3270_v44  ;;  %v3342_v44 = vld [vmem:[#allocation6 + $0x240] ss:$8 sps:$4 sm:$0xff]  }
  0x85   :  { %773 = vmatprep.subr.bf16.mxu0 %v3278_v45  ;;  %v3347_v45 = vld [vmem:[#allocation6 + $0x254] ss:$8 sps:$4 sm:$0xff]  }
  0x87   :  { %465 = vmatmul.mubr.bf16.gmra.mrb[8].mxu0 %v3733_v46 }
  0x88   :  { %774 = vmatpush1.bf16.msra.mxu0 %v3276_v47  ;;  %474 = vmatprep.mubr.bf16.mxu0 %v3735_v48  ;;  %v3401_v47 = vld [vmem:[#allocation8 + $0x160] ss:$8 sps:$4 sm:$0xff]  }
  0x89   :  { %775 = vmatprep.subr.bf16.mxu0 %v3281_v49  ;;  %v3345_v49 = vld [vmem:[#allocation6 + $0x250] ss:$8 sps:$4 sm:$0xff]   ;;  %1736 = vmatpush1.bf16.msra.mxu1 %v3401_v47 }
  0x8c   :  { %776 = vmatpush1.bf16.msra.mxu0 %v3279_v50  ;;  %v3350_v50 = vld [vmem:[#allocation6 + $0x264] ss:$8 sps:$4 sm:$0xff]  }
  0x8d   :  { %777 = vmatprep.subr.bf16.mxu0 %v3287_v51  ;;  %v3404_v51 = vld [vmem:[#allocation8 + $0x170] ss:$8 sps:$4 sm:$0xff]  }
  0x8f   :  { %475 = vmatmul.mubr.bf16.gmra.mrb[12].mxu0 %v3739_v52 }
  0x90   :  { %778 = vmatpush1.bf16.msra.mxu0 %v3285_v53  ;;  %484 = vmatprep.mubr.bf16.mxu0 %v3741_v54  ;;  %v3405_v53 = vld [vmem:[#allocation8 + $0x184] ss:$8 sps:$4 sm:$0xff]  }
  0x91   :  { %779 = vmatprep.subr.bf16.mxu0 %v3290_v55  ;;  %v3348_v55 = vld [vmem:[#allocation6 + $0x260] ss:$8 sps:$4 sm:$0xff]  }
  0x94   :  { %780 = vmatpush1.bf16.msra.mxu0 %v3288_v56  ;;  %v3353_v56 = vld [vmem:[#allocation6 + $0x274] ss:$8 sps:$4 sm:$0xff]  }
  0x95   :  { %781 = vmatprep.subr.bf16.mxu0 %v3296_v57  ;;  %v3407_v57 = vld [vmem:[#allocation8 + $0x180] ss:$8 sps:$4 sm:$0xff]  }
  0x97   :  { %485 = vmatmul.mubr.bf16.gmra.mrb[16].mxu0 %v3745_v58 }
  0x98   :  { %782 = vmatpush1.bf16.msra.mxu0 %v3294_v59  ;;  %494 = vmatprep.mubr.bf16.mxu0 %v3747_v60  ;;  %v3408_v59 = vld [vmem:[#allocation8 + $0x194] ss:$8 sps:$4 sm:$0xff]  }
  0x99   :  { %783 = vmatprep.subr.bf16.mxu0 %v3299_v61  ;;  %v3351_v61 = vld [vmem:[#allocation6 + $0x270] ss:$8 sps:$4 sm:$0xff]  }
  0x9c   :  { %784 = vmatpush1.bf16.msra.mxu0 %v3297_v62  ;;  %v3356_v62 = vld [vmem:[#allocation6 + $0x284] ss:$8 sps:$4 sm:$0xff]  }
  0x9d   :  { %785 = vmatprep.subr.bf16.mxu0 %v3305_v63  ;;  %v3410_v63 = vld [vmem:[#allocation8 + $0x190] ss:$8 sps:$4 sm:$0xff]  }
  0x9f   :  { %495 = vmatmul.mubr.bf16.gmra.mrb[20].mxu0 %v3751_v0 }
  0xa0   :  { %786 = vmatpush1.bf16.msra.mxu0 %v3303_v1  ;;  %504 = vmatprep.mubr.bf16.mxu0 %v3753_v2  ;;  %v3411_v1 = vld [vmem:[#allocation8 + $0x1a4] ss:$8 sps:$4 sm:$0xff]  }
  0xa1   :  { %787 = vmatprep.subr.bf16.mxu0 %v3308_v3  ;;  %v3354_v3 = vld [vmem:[#allocation6 + $0x280] ss:$8 sps:$4 sm:$0xff]  }
  0xa4   :  { %788 = vmatpush1.bf16.msra.mxu0 %v3306_v4  ;;  %v3359_v4 = vld [vmem:[#allocation6 + $0x294] ss:$8 sps:$4 sm:$0xff]  }
  0xa5   :  { %789 = vmatprep.subr.bf16.mxu0 %v3314_v5  ;;  %v3413_v5 = vld [vmem:[#allocation8 + $0x1a0] ss:$8 sps:$4 sm:$0xff]  }
  0xa7   :  { %505 = vmatmul.mubr.bf16.gmra.mrb[24].mxu0 %v3757_v6 }
  0xa8   :  { %790 = vmatpush1.bf16.msra.mxu0 %v3312_v7  ;;  %514 = vmatprep.mubr.bf16.mxu0 %v3759_v8  ;;  %v3414_v7 = vld [vmem:[#allocation8 + $0x1b4] ss:$8 sps:$4 sm:$0xff]  }
  0xa9   :  { %791 = vmatprep.subr.bf16.mxu0 %v3317_v9  ;;  %v3357_v9 = vld [vmem:[#allocation6 + $0x290] ss:$8 sps:$4 sm:$0xff]  }
  0xac   :  { %792 = vmatpush1.bf16.msra.mxu0 %v3315_v10  ;;  %v3362_v10 = vld [vmem:[#allocation6 + $0x2a4] ss:$8 sps:$4 sm:$0xff]  }
  0xad   :  { %793 = vmatprep.subr.bf16.mxu0 %v3323_v11  ;;  %v3416_v11 = vld [vmem:[#allocation8 + $0x1b0] ss:$8 sps:$4 sm:$0xff]  }
  0xaf   :  { %515 = vmatmul.mubr.bf16.gmra.mrb[28].mxu0 %v3763_v12 }
  0xb0   :  { %794 = vmatpush1.bf16.msra.mxu0 %v3321_v14  ;;  %797 = vmatprep.mubr.bf16.mxu0 %v3329_v15  ;;  %v3417_v14 = vld [vmem:[#allocation8 + $0x1c4] ss:$8 sps:$4 sm:$0xff]   ;;  %v3360_v15 = vld [vmem:[#allocation6 + $0x2a0] ss:$8 sps:$4 sm:$0xff]  }
  0xb1   :  { %795 = vmatprep.subr.bf16.mxu0 %v3326_v16  ;;  %v3365_v16 = vld [vmem:[#allocation6 + $0x2b4] ss:$8 sps:$4 sm:$0xff]  }
  0xb4   :  { %796 = vmatpush1.bf16.msra.mxu0 %v3324_v20  ;;  %v3366_v20 = vld [vmem:[#allocation6 + $0x2c0] ss:$8 sps:$4 sm:$0xff]  }
  0xb5   :  { %1168 = vmatprep.subr.bf16.mxu0 %v3332_v21  ;;  %v3371_v21 = vld [vmem:[#allocation6 + $0x2d4] ss:$8 sps:$4 sm:$0xff]  }
  0xb7   :  { %798 = vmatmul.mubr.bf16.vlgmr.msra.gmra.mrb[0].mxu0 %v3327_v23  ;;  %v3374_v23 = vld [vmem:[#allocation6 + $0x2e4] ss:$8 sps:$4 sm:$0xff]  }
  0xb8   :  { %1169 = vmatpush1.bf16.msra.mxu0 %v3330_v25  ;;  %807 = vmatprep.mubr.bf16.mxu0 %v3718_v13  ;;  %v3344_v13 = vld [vmem:[#allocation6 + $0x244] ss:$8 sps:$4 sm:$0xff]   ;;  %v3377_v25 = vld [vmem:[#allocation6 + $0x2f4] ss:$8 sps:$4 sm:$0xff]  }
  0xb9   :  { %1170 = vmatprep.subr.bf16.mxu0 %v3335_v26  ;;  %v3375_v26 = vld [vmem:[#allocation6 + $0x2f0] ss:$8 sps:$4 sm:$0xff]  }
  0xbc   :  { %1171 = vmatpush1.bf16.msra.mxu0 %v3333_v29 }
  0xbd   :  { %1172 = vmatprep.subr.bf16.mxu0 %v3338_v30 }
  0xbf   :  { %808 = vmatmul.mubr.bf16.gmra.mrb[4].mxu0 %v3721_v34  ;;  %v3402_v34 = vld [vmem:[#allocation8 + $0x174] ss:$8 sps:$4 sm:$0xff]  }
  0xc0   :  { %1173 = vmatpush1.bf16.msra.mxu0 %v3336_v33  ;;  %817 = vmatprep.mubr.bf16.mxu0 %v3723_v36 }
  0xc1   :  { %1174 = vmatprep.subr.bf16.mxu0 %v3341_v35  ;;  %1737 = vmatprep.subr.bf16.mxu1 %v3402_v34 }
  0xc2   :  { %1738 = vmatpush1.bf16.msra.mxu1 %v3404_v51 }
  0xc3   :  { %1739 = vmatprep.subr.bf16.mxu1 %v3405_v53 }
  0xc4   :  { %1175 = vmatpush1.bf16.msra.mxu0 %v3339_v39 }
  0xc5   :  { %1176 = vmatprep.subr.bf16.mxu0 %v3344_v13 }
  0xc6   :  { %1740 = vmatpush1.bf16.msra.mxu1 %v3407_v57 }
  0xc7   :  { %818 = vmatmul.mubr.bf16.gmra.mrb[8].mxu0 %v3727_v40  ;;  %1741 = vmatprep.subr.bf16.mxu1 %v3408_v59 }
  0xc8   :  { %1177 = vmatpush1.bf16.msra.mxu0 %v3342_v44  ;;  %827 = vmatprep.mubr.bf16.mxu0 %v3729_v42 }
  0xc9   :  { %1178 = vmatprep.subr.bf16.mxu0 %v3347_v45 }
  0xca   :  { %1742 = vmatpush1.bf16.msra.mxu1 %v3410_v63 }
  0xcb   :  { %1743 = vmatprep.subr.bf16.mxu1 %v3411_v1  ;;  %v3429_v1 = vld [vmem:[#allocation8] ss:$8 sps:$4 sm:$0xff]  }
  0xcc   :  { %1179 = vmatpush1.bf16.msra.mxu0 %v3345_v49 }
  0xcd   :  { %1180 = vmatprep.subr.bf16.mxu0 %v3350_v50 }
  0xce   :  { %1744 = vmatpush1.bf16.msra.mxu1 %v3413_v5 }
  0xcf   :  { %828 = vmatmul.mubr.bf16.gmra.mrb[12].mxu0 %v3733_v46  ;;  %1745 = vmatprep.subr.bf16.mxu1 %v3414_v7  ;;  %v3434_v7 = vld [vmem:[#allocation8 + $0x14] ss:$8 sps:$4 sm:$0xff]  }
  0xd0   :  { %1181 = vmatpush1.bf16.msra.mxu0 %v3348_v55  ;;  %837 = vmatprep.mubr.bf16.mxu0 %v3735_v48 }
  0xd1   :  { %1182 = vmatprep.subr.bf16.mxu0 %v3353_v56 }
  0xd2   :  { %1746 = vmatpush1.bf16.msra.mxu1 %v3416_v11 }
  0xd3   :  { %1747 = vmatprep.subr.bf16.mxu1 %v3417_v14 }
  0xd4   :  { %1183 = vmatpush1.bf16.msra.mxu0 %v3351_v61 }
  0xd5   :  { %1184 = vmatprep.subr.bf16.mxu0 %v3356_v62 }
  0xd6   :  { %1748 = vmatpush1.bf16.msra.mxu1 %v3419_v17 }
  0xd7   :  { %838 = vmatmul.mubr.bf16.gmra.mrb[16].mxu0 %v3739_v52 }
  0xd8   :  { %1185 = vmatpush1.bf16.msra.mxu0 %v3354_v3  ;;  %847 = vmatprep.mubr.bf16.mxu0 %v3741_v54 }
  0xd9   :  { %1186 = vmatprep.subr.bf16.mxu0 %v3359_v4 }
  0xdc   :  { %1187 = vmatpush1.bf16.msra.mxu0 %v3357_v9 }
  0xdd   :  { %1188 = vmatprep.subr.bf16.mxu0 %v3362_v10 }
  0xdf   :  { %848 = vmatmul.mubr.bf16.gmra.mrb[20].mxu0 %v3745_v58 }
  0xe0   :  { %1189 = vmatpush1.bf16.msra.mxu0 %v3360_v15  ;;  %857 = vmatprep.mubr.bf16.mxu0 %v3747_v60  ;;  %v3432_v15 = vld [vmem:[#allocation8 + $0x10] ss:$8 sps:$4 sm:$0xff]  }
  0xe1   :  { %1190 = vmatprep.subr.bf16.mxu0 %v3365_v16 }
  0xe4   :  { %1191 = vmatpush1.bf16.msra.mxu0 %v3363_v18  ;;  %v3437_v18 = vld [vmem:[#allocation8 + $0x24] ss:$8 sps:$4 sm:$0xff]  }
  0xe5   :  { %1192 = vmatprep.subr.bf16.mxu0 %v3368_v19 }
  0xe7   :  { %858 = vmatmul.mubr.bf16.gmra.mrb[24].mxu0 %v3751_v0 }
  0xe8   :  { %1193 = vmatpush1.bf16.msra.mxu0 %v3366_v20  ;;  %867 = vmatprep.mubr.bf16.mxu0 %v3753_v2 }
  0xe9   :  { %1194 = vmatprep.subr.bf16.mxu0 %v3371_v21 }
  0xec   :  { %1195 = vmatpush1.bf16.msra.mxu0 %v3369_v22 }
  0xed   :  { %1196 = vmatprep.subr.bf16.mxu0 %v3374_v23 }
  0xef   :  { %868 = vmatmul.mubr.bf16.gmra.mrb[28].mxu0 %v3757_v6 }
  0xf0   :  { %1197 = vmatpush1.bf16.msra.mxu0 %v3372_v24  ;;  %1200 = vmatprep.mubr.bf16.mxu0 %v3723_v36  ;;  %v3378_v36 = vld [vmem:[#allocation3 + $0x94] ss:$8 sps:$4 sm:$0xff]  }
  0xf1   :  { %1198 = vmatprep.subr.bf16.mxu0 %v3377_v25 }
  0xf4   :  { %1199 = vmatpush1.bf16.msra.mxu0 %v3375_v26 }
  0xf7   :  { %1201 = vmatmul.mubr.bf16.vlgmr.msra.gmra.mrb[0].mxu0 %v3727_v40  ;;  %v3380_v40 = vld [vmem:[#allocation3 + $0x90] ss:$8 sps:$4 sm:$0xff]  }
  0xf8   :  { %1210 = vmatprep.mubr.bf16.mxu0 %v3729_v42  ;;  %v3420_v42 = vld [vmem:[#allocation8 + $0x1d4] ss:$8 sps:$4 sm:$0xff]  }
  0xf9   :  { %1749 = vmatprep.subr.bf16.mxu1 %v3420_v42 }
  0xff   :  { %1211 = vmatmul.mubr.bf16.gmra.mrb[4].mxu0 %v3733_v46  ;;  %v3422_v46 = vld [vmem:[#allocation8 + $0x1d0] ss:$8 sps:$4 sm:$0xff]  }
 0x100   :  { %1220 = vmatprep.mubr.bf16.mxu0 %v3735_v48  ;;  %1750 = vmatpush1.bf16.msra.mxu1 %v3422_v46  ;;  %v3423_v48 = vld [vmem:[#allocation8 + $0x1e4] ss:$8 sps:$4 sm:$0xff]  }
 0x101   :  { %1751 = vmatprep.subr.bf16.mxu1 %v3423_v48 }
 0x107   :  { %1221 = vmatmul.mubr.bf16.gmra.mrb[8].mxu0 %v3739_v52  ;;  %v3425_v52 = vld [vmem:[#allocation8 + $0x1e0] ss:$8 sps:$4 sm:$0xff]  }
 0x108   :  { %1230 = vmatprep.mubr.bf16.mxu0 %v3741_v54  ;;  %1752 = vmatpush1.bf16.msra.mxu1 %v3425_v52  ;;  %v3426_v54 = vld [vmem:[#allocation8 + $0x1f4] ss:$8 sps:$4 sm:$0xff]  }
 0x109   :  { %1753 = vmatprep.subr.bf16.mxu1 %v3426_v54  ;;  %v3440_v52 = vld [vmem:[#allocation8 + $0x34] ss:$8 sps:$4 sm:$0xff]  }
 0x10f   :  { %1231 = vmatmul.mubr.bf16.gmra.mrb[12].mxu0 %v3745_v58  ;;  %v3428_v58 = vld [vmem:[#allocation8 + $0x1f0] ss:$8 sps:$4 sm:$0xff]  }
 0x110   :  { %1240 = vmatprep.mubr.bf16.mxu0 %v3747_v60  ;;  %1754 = vmatpush1.bf16.msra.mxu1 %v3428_v58  ;;  %v3431_v60 = vld [vmem:[#allocation8 + $0x4] ss:$8 sps:$4 sm:$0xff]  }
 0x111   :  { %1996 = vmatprep.subr.bf16.mxu1 %v3431_v60 }
 0x117   :  { %1241 = vmatmul.mubr.bf16.gmra.mrb[16].mxu0 %v3751_v0  ;;  %v3624_v0 = vmov 0  }
 0x118   :  { %1250 = vmatprep.mubr.bf16.mxu0 %v3753_v2  ;;  %2664 = vst [vmem:[#allocation9] sm:$0xff] %v3624_v0  ;;  %2665 = vst [vmem:[#allocation9 + $0x8] sm:$0xff] %v3624_v0  ;;  %v1315_v2 = vlaneseq }
 0x119   :  { %2667 = vst [vmem:[#allocation9 + $0x90] sm:$0xff] %v3624_v0  ;;  %2668 = vst [vmem:[#allocation9 + $0x98] sm:$0xff] %v3624_v0 }
 0x11f   :  { %1251 = vmatmul.mubr.bf16.gmra.mrb[20].mxu0 %v3757_v6  ;;  %v1316_v6 = vshrl.u32 %v1315_v2, 7 }
 0x120   :  { %1260 = vmatprep.mubr.bf16.mxu0 %v3759_v8 }
 0x121   :  { %v3798_v8 = vsub.s32 0, %v1316_v6  ;;  %v3803_v27 = vsub.s32 1, %v1316_v6  ;;  %v3438_v6 = vld [vmem:[#allocation8 + $0x30] ss:$8 sps:$4 sm:$0xff]  }
 0x123   :  { %v3815_v31 = vrot.slane %v1357_v28, %v3798_v8  ;;  %v3818_v33 = vrot.slane %v1357_v28, %v3803_v27 }
 0x127   :  { %1261 = vmatmul.mubr.bf16.gmra.mrb[24].mxu0 %v3763_v12  ;;  %v1313_v12 = vld [vmem:[%s4063_s2] sm:$0x3] }
 0x128   :  { %1270 = vmatprep.mubr.bf16.mxu0 %v3378_v36  ;;  %v3809_v29 = vrot.slane %v1313_v12, %v3798_v8  ;;  %v3812_v30 = vrot.slane %v1313_v12, %v3803_v27 }
 0x12f   :  { %1271 = vmatmul.mubr.bf16.gmra.mrb[28].mxu0 %v3380_v40  ;;  %v3435_v40 = vld [vmem:[#allocation8 + $0x20] ss:$8 sps:$4 sm:$0xff]  }
 0x1ca   :  { %v1202_v32 = vpop.f32.mrb[0].mxu0 }
 0x1cb   :  { %v1325_v35 = vmul.f32 %v3809_v29, %v1202_v32  ;;  %v1204_v37 = vpop.f32.mrb[1].mxu0  ;;  %v3443_v32 = vld [vmem:[#allocation8 + $0x44] ss:$8 sps:$4 sm:$0xff]  }
 0x1cc   :  { %v1326_v38 = vmul.f32 %v3812_v30, %v1204_v37  ;;  %v1206_v39 = vpop.f32.mrb[2].mxu0 }
 0x1cd   :  { %v1369_v13 = vadd.f32 %v3815_v31, %v1325_v35  ;;  %v1327_v41 = vmul.f32 %v3809_v29, %v1206_v39  ;;  %v1208_v43 = vpop.f32.mrb[3].mxu0 }
 0x1ce   :  { %v1370_v44 = vadd.f32 %v3818_v33, %v1326_v38  ;;  %v1328_v45 = vmul.f32 %v3812_v30, %v1208_v43 }
 0x1cf   :  { %v1371_v47 = vadd.f32 %v3815_v31, %v1327_v41  ;;  %v1401_v49 = vmax.f32 %v1369_v13, 0.0 }
 0x1d0   :  { %v1372_v34 = vadd.f32 %v3818_v33, %v1328_v45  ;;  %v1402_v51 = vmax.f32 %v1370_v44, 0.0 }
 0x1d1   :  { %v1403_v50 = vmax.f32 %v1371_v47, 0.0  ;;  %v3441_v47 = vld [vmem:[#allocation8 + $0x40] ss:$8 sps:$4 sm:$0xff]  }
 0x1d2   :  { %v1404_v53 = vmax.f32 %v1372_v34, 0.0  ;;  %v1212_v55 = vpop.f32.mrb[4].mxu0 }
 0x1d3   :  { %v1329_v56 = vmul.f32 %v3809_v29, %v1212_v55  ;;  %v1214_v57 = vpop.f32.mrb[5].mxu0  ;;  %v3829_v59 = vpack.c.bf16 %v1403_v50, %v1401_v49 }
 0x1d4   :  { %v1330_v61 = vmul.f32 %v3812_v30, %v1214_v57  ;;  %v1216_v62 = vpop.f32.mrb[6].mxu0  ;;  %v3832_v63 = vpack.c.bf16 %v1404_v53, %v1402_v51  ;;  %v3446_v51 = vld [vmem:[#allocation8 + $0x54] ss:$8 sps:$4 sm:$0xff]  }
 0x1d5   :  { %v1373_v3 = vadd.f32 %v3815_v31, %v1329_v56  ;;  %v1331_v4 = vmul.f32 %v3809_v29, %v1216_v62  ;;  %v1218_v5 = vpop.f32.mrb[7].mxu0 }
 0x1d6   :  { %v1374_v9 = vadd.f32 %v3818_v33, %v1330_v61  ;;  %v1332_v10 = vmul.f32 %v3812_v30, %v1218_v5  ;;  %1755 = vmatprep.mubr.bf16.mxu1 %v3832_v63  ;;  %v3444_v61 = vld [vmem:[#allocation8 + $0x50] ss:$8 sps:$4 sm:$0xff]  }
 0x1d7   :  { %v1375_v11 = vadd.f32 %v3815_v31, %v1331_v4  ;;  %1756 = vmatmul.mubr.bf16.vlgmr.msra.gmra.mrb[0].mxu1 %v3829_v59  ;;  %v1405_v16 = vmax.f32 %v1373_v3, 0.0  ;;  %v3449_v3 = vld [vmem:[#allocation8 + $0x64] ss:$8 sps:$4 sm:$0xff]  }
 0x1d8   :  { %v1376_v14 = vadd.f32 %v3818_v33, %v1332_v10  ;;  %1997 = vmatpush1.bf16.msra.mxu1 %v3429_v1  ;;  %v1406_v19 = vmax.f32 %v1374_v9, 0.0 }
 0x1d9   :  { %v1407_v17 = vmax.f32 %v1375_v11, 0.0  ;;  %1998 = vmatprep.subr.bf16.mxu1 %v3434_v7 }
 0x1da   :  { %v1408_v20 = vmax.f32 %v1376_v14, 0.0  ;;  %v1222_v21 = vpop.f32.mrb[8].mxu0 }
 0x1db   :  { %v1333_v22 = vmul.f32 %v3809_v29, %v1222_v21  ;;  %v1224_v23 = vpop.f32.mrb[9].mxu0  ;;  %v3843_v24 = vpack.c.bf16 %v1407_v17, %v1405_v16  ;;  %v3447_v17 = vld [vmem:[#allocation8 + $0x60] ss:$8 sps:$4 sm:$0xff]   ;;  %v3452_v21 = vld [vmem:[#allocation8 + $0x74] ss:$8 sps:$4 sm:$0xff]  }
 0x1dc   :  { %v1334_v25 = vmul.f32 %v3812_v30, %v1224_v23  ;;  %v1226_v26 = vpop.f32.mrb[10].mxu0  ;;  %1999 = vmatpush1.bf16.msra.mxu1 %v3432_v15  ;;  %v3846_v36 = vpack.c.bf16 %v1408_v20, %v1406_v19 }
 0x1dd   :  { %v1377_v42 = vadd.f32 %v3815_v31, %v1333_v22  ;;  %v1335_v46 = vmul.f32 %v3809_v29, %v1226_v26  ;;  %v1228_v48 = vpop.f32.mrb[11].mxu0  ;;  %2000 = vmatprep.subr.bf16.mxu1 %v3437_v18 }
 0x1de   :  { %v1378_v54 = vadd.f32 %v3818_v33, %v1334_v25  ;;  %v1336_v58 = vmul.f32 %v3812_v30, %v1228_v48  ;;  %1765 = vmatprep.mubr.bf16.mxu1 %v3846_v36  ;;  %v3455_v48 = vld [vmem:[#allocation8 + $0x84] ss:$8 sps:$4 sm:$0xff]  }
 0x1df   :  { %v1379_v60 = vadd.f32 %v3815_v31, %v1335_v46  ;;  %1766 = vmatmul.mubr.bf16.gmra.mrb[4].mxu1 %v3843_v24  ;;  %v1409_v12 = vmax.f32 %v1377_v42, 0.0 }
 0x1e0   :  { %v1380_v2 = vadd.f32 %v3818_v33, %v1336_v58  ;;  %2001 = vmatpush1.bf16.msra.mxu1 %v3435_v40  ;;  %v1410_v35 = vmax.f32 %v1378_v54, 0.0  ;;  %v3450_v40 = vld [vmem:[#allocation8 + $0x70] ss:$8 sps:$4 sm:$0xff]  }
 0x1e1   :  { %v1411_v28 = vmax.f32 %v1379_v60, 0.0  ;;  %2002 = vmatprep.subr.bf16.mxu1 %v3440_v52 }
 0x1e2   :  { %v1412_v37 = vmax.f32 %v1380_v2, 0.0  ;;  %v1232_v38 = vpop.f32.mrb[12].mxu0 }
 0x1e3   :  { %v1337_v39 = vmul.f32 %v3809_v29, %v1232_v38  ;;  %v1234_v13 = vpop.f32.mrb[13].mxu0  ;;  %v3857_v41 = vpack.c.bf16 %v1411_v28, %v1409_v12 }
 0x1e4   :  { %v1338_v43 = vmul.f32 %v3812_v30, %v1234_v13  ;;  %v1236_v44 = vpop.f32.mrb[14].mxu0  ;;  %2003 = vmatpush1.bf16.msra.mxu1 %v3438_v6  ;;  %v3860_v45 = vpack.c.bf16 %v1412_v37, %v1410_v35  ;;  %v3453_v35 = vld [vmem:[#allocation8 + $0x80] ss:$8 sps:$4 sm:$0xff]   ;;  %v3458_v13 = vld [vmem:[#allocation8 + $0x94] ss:$8 sps:$4 sm:$0xff]  }
 0x1e5   :  { %v1381_v34 = vadd.f32 %v3815_v31, %v1337_v39  ;;  %v1339_v49 = vmul.f32 %v3809_v29, %v1236_v44  ;;  %v1238_v50 = vpop.f32.mrb[15].mxu0  ;;  %2004 = vmatprep.subr.bf16.mxu1 %v3443_v32 }
 0x1e6   :  { %v1382_v53 = vadd.f32 %v3818_v33, %v1338_v43  ;;  %v1340_v55 = vmul.f32 %v3812_v30, %v1238_v50  ;;  %1775 = vmatprep.mubr.bf16.mxu1 %v3860_v45 }
 0x1e7   :  { %v1383_v56 = vadd.f32 %v3815_v31, %v1339_v49  ;;  %1776 = vmatmul.mubr.bf16.gmra.mrb[8].mxu1 %v3857_v41  ;;  %v1413_v62 = vmax.f32 %v1381_v34, 0.0  ;;  %v3456_v49 = vld [vmem:[#allocation8 + $0x90] ss:$8 sps:$4 sm:$0xff]  }
 0x1e8   :  { %v1384_v57 = vadd.f32 %v3818_v33, %v1340_v55  ;;  %2005 = vmatpush1.bf16.msra.mxu1 %v3441_v47  ;;  %v1414_v4 = vmax.f32 %v1382_v53, 0.0  ;;  %v3461_v53 = vld [vmem:[#allocation8 + $0xa4] ss:$8 sps:$4 sm:$0xff]  }
 0x1e9   :  { %v1415_v1 = vmax.f32 %v1383_v56, 0.0  ;;  %2006 = vmatprep.subr.bf16.mxu1 %v3446_v51 }
 0x1ea   :  { %v1416_v5 = vmax.f32 %v1384_v57, 0.0  ;;  %v1242_v7 = vpop.f32.mrb[16].mxu0 }
 0x1eb   :  { %v1341_v9 = vmul.f32 %v3809_v29, %v1242_v7  ;;  %v1244_v10 = vpop.f32.mrb[17].mxu0  ;;  %v3871_v11 = vpack.c.bf16 %v1415_v1, %v1413_v62  ;;  %v3459_v7 = vld [vmem:[#allocation8 + $0xa0] ss:$8 sps:$4 sm:$0xff]  }
 0x1ec   :  { %v1342_v14 = vmul.f32 %v3812_v30, %v1244_v10  ;;  %v1246_v15 = vpop.f32.mrb[18].mxu0  ;;  %2007 = vmatpush1.bf16.msra.mxu1 %v3444_v61  ;;  %v3874_v16 = vpack.c.bf16 %v1416_v5, %v1414_v4 }
 0x1ed   :  { %v1385_v18 = vadd.f32 %v3815_v31, %v1341_v9  ;;  %v1343_v19 = vmul.f32 %v3809_v29, %v1246_v15  ;;  %v1248_v20 = vpop.f32.mrb[19].mxu0  ;;  %2008 = vmatprep.subr.bf16.mxu1 %v3449_v3  ;;  %v3464_v15 = vld [vmem:[#allocation8 + $0xb4] ss:$8 sps:$4 sm:$0xff]  }
 0x1ee   :  { %v1386_v22 = vadd.f32 %v3818_v33, %v1342_v14  ;;  %v1344_v23 = vmul.f32 %v3812_v30, %v1248_v20  ;;  %1785 = vmatprep.mubr.bf16.mxu1 %v3874_v16 }
 0x1ef   :  { %v1387_v25 = vadd.f32 %v3815_v31, %v1343_v19  ;;  %1786 = vmatmul.mubr.bf16.gmra.mrb[12].mxu1 %v3871_v11  ;;  %v1417_v42 = vmax.f32 %v1385_v18, 0.0 }
 0x1f0   :  { %v1388_v26 = vadd.f32 %v3818_v33, %v1344_v23  ;;  %2009 = vmatpush1.bf16.msra.mxu1 %v3447_v17  ;;  %v1418_v52 = vmax.f32 %v1386_v22, 0.0 }
 0x1f1   :  { %v1419_v46 = vmax.f32 %v1387_v25, 0.0  ;;  %2010 = vmatprep.subr.bf16.mxu1 %v3452_v21  ;;  %v3462_v21 = vld [vmem:[#allocation8 + $0xb0] ss:$8 sps:$4 sm:$0xff]   ;;  %v3467_v25 = vld [vmem:[#allocation8 + $0xc4] ss:$8 sps:$4 sm:$0xff]  }
 0x1f2   :  { %v1420_v54 = vmax.f32 %v1388_v26, 0.0  ;;  %v1252_v58 = vpop.f32.mrb[20].mxu0 }
 0x1f3   :  { %v1345_v60 = vmul.f32 %v3809_v29, %v1252_v58  ;;  %v1254_v2 = vpop.f32.mrb[21].mxu0  ;;  %v3885_v6 = vpack.c.bf16 %v1419_v46, %v1417_v42 }
 0x1f4   :  { %v1346_v12 = vmul.f32 %v3812_v30, %v1254_v2  ;;  %v1256_v28 = vpop.f32.mrb[22].mxu0  ;;  %2011 = vmatpush1.bf16.msra.mxu1 %v3450_v40  ;;  %v3888_v32 = vpack.c.bf16 %v1420_v54, %v1418_v52  ;;  %v3465_v2 = vld [vmem:[#allocation8 + $0xc0] ss:$8 sps:$4 sm:$0xff]  }
 0x1f5   :  { %v1389_v37 = vadd.f32 %v3815_v31, %v1345_v60  ;;  %v1347_v38 = vmul.f32 %v3809_v29, %v1256_v28  ;;  %v1258_v39 = vpop.f32.mrb[23].mxu0  ;;  %2012 = vmatprep.subr.bf16.mxu1 %v3455_v48 }
 0x1f6   :  { %v1390_v43 = vadd.f32 %v3818_v33, %v1346_v12  ;;  %v1348_v44 = vmul.f32 %v3812_v30, %v1258_v39  ;;  %1795 = vmatprep.mubr.bf16.mxu1 %v3888_v32 }
 0x1f7   :  { %v1391_v47 = vadd.f32 %v3815_v31, %v1347_v38  ;;  %1796 = vmatmul.mubr.bf16.gmra.mrb[16].mxu1 %v3885_v6  ;;  %v1421_v50 = vmax.f32 %v1389_v37, 0.0  ;;  %v3470_v37 = vld [vmem:[#allocation8 + $0xd4] ss:$8 sps:$4 sm:$0xff]  }
 0x1f8   :  { %v1392_v34 = vadd.f32 %v3818_v33, %v1348_v44  ;;  %2013 = vmatpush1.bf16.msra.mxu1 %v3453_v35  ;;  %v1422_v55 = vmax.f32 %v1390_v43, 0.0  ;;  %v3468_v44 = vld [vmem:[#allocation8 + $0xd0] ss:$8 sps:$4 sm:$0xff]  }
 0x1f9   :  { %v1423_v51 = vmax.f32 %v1391_v47, 0.0  ;;  %2014 = vmatprep.subr.bf16.mxu1 %v3458_v13 }
 0x1fa   :  { %v1424_v56 = vmax.f32 %v1392_v34, 0.0  ;;  %v1262_v57 = vpop.f32.mrb[24].mxu0 }
 0x1fb   :  { %v1349_v61 = vmul.f32 %v3809_v29, %v1262_v57  ;;  %v1264_v62 = vpop.f32.mrb[25].mxu0  ;;  %v3899_v1 = vpack.c.bf16 %v1423_v51, %v1421_v50  ;;  %v3482_v57 = vld [vmem:[#allocation8 + $0x214] ss:$8 sps:$4 sm:$0xff]  }
 0x1fc   :  { %v1350_v3 = vmul.f32 %v3812_v30, %v1264_v62  ;;  %v1266_v4 = vpop.f32.mrb[26].mxu0  ;;  %2015 = vmatpush1.bf16.msra.mxu1 %v3456_v49  ;;  %v3902_v5 = vpack.c.bf16 %v1424_v56, %v1422_v55  ;;  %v3479_v55 = vld [vmem:[#allocation8 + $0x204] ss:$8 sps:$4 sm:$0xff]   ;;  %v3477_v56 = vld [vmem:[#allocation8 + $0x200] ss:$8 sps:$4 sm:$0xff]  }
 0x1fd   :  { %v1393_v9 = vadd.f32 %v3815_v31, %v1349_v61  ;;  %v1351_v10 = vmul.f32 %v3809_v29, %v1266_v4  ;;  %v1268_v14 = vpop.f32.mrb[27].mxu0  ;;  %2016 = vmatprep.subr.bf16.mxu1 %v3461_v53  ;;  %v3471_v53 = vld [vmem:[#allocation8 + $0xe0] ss:$8 sps:$4 sm:$0xff]   ;;  %v3480_v61 = vld [vmem:[#allocation8 + $0x210] ss:$8 sps:$4 sm:$0xff]  }
 0x1fe   :  { %v1394_v17 = vadd.f32 %v3818_v33, %v1350_v3  ;;  %v1352_v18 = vmul.f32 %v3812_v30, %v1268_v14  ;;  %1805 = vmatprep.mubr.bf16.mxu1 %v3902_v5  ;;  %v3485_v62 = vld [vmem:[#allocation8 + $0x224] ss:$8 sps:$4 sm:$0xff]   ;;  %v3483_v3 = vld [vmem:[#allocation8 + $0x220] ss:$8 sps:$4 sm:$0xff]   ;;  %v3488_v4 = vld [vmem:[#allocation8 + $0x234] ss:$8 sps:$4 sm:$0xff]  }
 0x1ff   :  { %v1395_v19 = vadd.f32 %v3815_v31, %v1351_v10  ;;  %1806 = vmatmul.mubr.bf16.gmra.mrb[20].mxu1 %v3899_v1  ;;  %v1425_v22 = vmax.f32 %v1393_v9, 0.0  ;;  %v3491_v9 = vld [vmem:[#allocation8 + $0x244] ss:$8 sps:$4 sm:$0xff]   ;;  %v3489_v10 = vld [vmem:[#allocation8 + $0x240] ss:$8 sps:$4 sm:$0xff]  }
 0x200   :  { %v1396_v20 = vadd.f32 %v3818_v33, %v1352_v18  ;;  %2017 = vmatpush1.bf16.msra.mxu1 %v3459_v7  ;;  %v1426_v26 = vmax.f32 %v1394_v17, 0.0  ;;  %v3486_v7 = vld [vmem:[#allocation8 + $0x230] ss:$8 sps:$4 sm:$0xff]   ;;  %v3500_v17 = vld [vmem:[#allocation8 + $0x274] ss:$8 sps:$4 sm:$0xff]  }
 0x201   :  { %v1427_v23 = vmax.f32 %v1395_v19, 0.0  ;;  %2018 = vmatprep.subr.bf16.mxu1 %v3464_v15  ;;  %v3492_v14 = vld [vmem:[#allocation8 + $0x250] ss:$8 sps:$4 sm:$0xff]   ;;  %v3497_v15 = vld [vmem:[#allocation8 + $0x264] ss:$8 sps:$4 sm:$0xff]  }
 0x202   :  { %v1428_v40 = vmax.f32 %v1396_v20, 0.0  ;;  %v1272_v42 = vpop.f32.mrb[28].mxu0  ;;  %v3498_v18 = vld [vmem:[#allocation8 + $0x270] ss:$8 sps:$4 sm:$0xff]   ;;  %v3503_v19 = vld [vmem:[#allocation8 + $0x284] ss:$8 sps:$4 sm:$0xff]  }
 0x203   :  { %v1353_v46 = vmul.f32 %v3809_v29, %v1272_v42  ;;  %v1274_v48 = vpop.f32.mrb[29].mxu0  ;;  %v3913_v52 = vpack.c.bf16 %v1427_v23, %v1425_v22  ;;  %v3501_v20 = vld [vmem:[#allocation8 + $0x280] ss:$8 sps:$4 sm:$0xff]   ;;  %v3504_v22 = vld [vmem:[#allocation8 + $0x290] ss:$8 sps:$4 sm:$0xff]  }
 0x204   :  { %v1354_v54 = vmul.f32 %v3812_v30, %v1274_v48  ;;  %v1276_v58 = vpop.f32.mrb[30].mxu0  ;;  %2019 = vmatpush1.bf16.msra.mxu1 %v3462_v21  ;;  %v3916_v60 = vpack.c.bf16 %v1428_v40, %v1426_v26  ;;  %v3506_v21 = vld [vmem:[#allocation8 + $0x294] ss:$8 sps:$4 sm:$0xff]   ;;  %v3509_v23 = vld [vmem:[#allocation8 + $0x2a4] ss:$8 sps:$4 sm:$0xff]  }
 0x205   :  { %v1397_v12 = vadd.f32 %v3815_v31, %v1353_v46  ;;  %v1355_v28 = vmul.f32 %v3809_v29, %v1276_v58  ;;  %v1278_v35 = vpop.f32.mrb[31].mxu0  ;;  %2020 = vmatprep.subr.bf16.mxu1 %v3467_v25  ;;  %v3473_v29 = vld [vmem:[#allocation8 + $0xe4] ss:$8 sps:$4 sm:$0xff]   ;;  %v3507_v25 = vld [vmem:[#allocation8 + $0x2a0] ss:$8 sps:$4 sm:$0xff]  }
 0x206   :  { %v1398_v38 = vadd.f32 %v3818_v33, %v1354_v54  ;;  %v1356_v39 = vmul.f32 %v3812_v30, %v1278_v35  ;;  %1815 = vmatprep.mubr.bf16.mxu1 %v3916_v60  ;;  %v3512_v26 = vld [vmem:[#allocation8 + $0x2b4] ss:$8 sps:$4 sm:$0xff]   ;;  %v3510_v40 = vld [vmem:[#allocation8 + $0x2b0] ss:$8 sps:$4 sm:$0xff]   ;;  %v3515_v42 = vld [vmem:[#allocation8 + $0x2c4] ss:$8 sps:$4 sm:$0xff]  }
 0x207   :  { %v1399_v13 = vadd.f32 %v3815_v31, %v1355_v28  ;;  %1816 = vmatmul.mubr.bf16.gmra.mrb[24].mxu1 %v3913_v52  ;;  %v1429_v47 = vmax.f32 %v1397_v12, 0.0  ;;  %v3476_v31 = vld [vmem:[#allocation8 + $0xf4] ss:$8 sps:$4 sm:$0xff]   ;;  %v3513_v46 = vld [vmem:[#allocation8 + $0x2c0] ss:$8 sps:$4 sm:$0xff]  }
 0x208   :  { %v1400_v43 = vadd.f32 %v3818_v33, %v1356_v39  ;;  %2021 = vmatpush1.bf16.msra.mxu1 %v3465_v2  ;;  %v1430_v49 = vmax.f32 %v1398_v38, 0.0  ;;  %v3474_v33 = vld [vmem:[#allocation8 + $0xf0] ss:$8 sps:$4 sm:$0xff]   ;;  %v3518_v48 = vld [vmem:[#allocation8 + $0x2d4] ss:$8 sps:$4 sm:$0xff]  }
 0x209   :  { %v1431_v34 = vmax.f32 %v1399_v13, 0.0  ;;  %2022 = vmatprep.subr.bf16.mxu1 %v3470_v37  ;;  %v3516_v54 = vld [vmem:[#allocation8 + $0x2d0] ss:$8 sps:$4 sm:$0xff]   ;;  %v3521_v58 = vld [vmem:[#allocation8 + $0x2e4] ss:$8 sps:$4 sm:$0xff]  }
 0x20a   :  { %v1432_v50 = vmax.f32 %v1400_v43, 0.0  ;;  %v3519_v2 = vld [vmem:[#allocation8 + $0x2e0] ss:$8 sps:$4 sm:$0xff]   ;;  %v3524_v12 = vld [vmem:[#allocation8 + $0x2f4] ss:$8 sps:$4 sm:$0xff]  }
 0x20b   :  { %v3926_v51 = vpack.c.bf16 %v1431_v34, %v1429_v47  ;;  %v3522_v28 = vld [vmem:[#allocation8 + $0x2f0] ss:$8 sps:$4 sm:$0xff]  }
 0x20c   :  { %2023 = vmatpush1.bf16.msra.mxu1 %v3468_v44  ;;  %v3928_v30 = vpack.c.bf16 %v1432_v50, %v1430_v49  ;;  %v2554_v50 = vld [vmem:[#allocation3 + $0x20] sm:$0xff] }
 0x20d   :  { %2024 = vmatprep.subr.bf16.mxu1 %v3473_v29 }
 0x20e   :  { %1825 = vmatprep.mubr.bf16.mxu1 %v3928_v30 }
 0x20f   :  { %1826 = vmatmul.mubr.bf16.gmra.mrb[28].mxu1 %v3926_v51 }
 0x210   :  { %2025 = vmatpush1.bf16.msra.mxu1 %v3471_v53  ;;  %2028 = vmatprep.mubr.bf16.mxu1 %v3624_v0 }
 0x211   :  { %2026 = vmatprep.subr.bf16.mxu1 %v3476_v31 }
 0x214   :  { %2027 = vmatpush1.bf16.msra.mxu1 %v3474_v33 }
 0x215   :  { %2319 = vmatprep.subr.bf16.mxu1 %v3479_v55  ;;  %v2555_v55 = vld [vmem:[#allocation3 + $0x28] sm:$0xff] }
 0x217   :  { %2029 = vmatmul.mubr.bf16.vlgmr.msra.gmra.mrb[0].mxu1 %v3624_v0 }
 0x218   :  { %2038 = vmatprep.mubr.bf16.mxu1 %v3832_v63  ;;  %2320 = vmatpush1.bf16.msra.mxu1 %v3477_v56  ;;  %v3494_v63 = vld [vmem:[#allocation8 + $0x254] ss:$8 sps:$4 sm:$0xff]  }
 0x219   :  { %2321 = vmatprep.subr.bf16.mxu1 %v3482_v57 }
 0x21c   :  { %2322 = vmatpush1.bf16.msra.mxu1 %v3480_v61  ;;  %v2572_v61 = vunpack.c.l.bf16 %v2554_v50 }
 0x21d   :  { %2323 = vmatprep.subr.bf16.mxu1 %v3485_v62 }
 0x21f   :  { %2039 = vmatmul.mubr.bf16.gmra.mrb[4].mxu1 %v3829_v59  ;;  %v3495_v59 = vld [vmem:[#allocation8 + $0x260] ss:$8 sps:$4 sm:$0xff]  }
 0x220   :  { %2048 = vmatprep.mubr.bf16.mxu1 %v3846_v36  ;;  %2324 = vmatpush1.bf16.msra.mxu1 %v3483_v3 }
 0x221   :  { %2325 = vmatprep.subr.bf16.mxu1 %v3488_v4 }
 0x224   :  { %2326 = vmatpush1.bf16.msra.mxu1 %v3486_v7 }
 0x225   :  { %2327 = vmatprep.subr.bf16.mxu1 %v3491_v9  ;;  %v2573_v9 = vunpack.c.h.bf16 %v2554_v50 }
 0x227   :  { %2049 = vmatmul.mubr.bf16.gmra.mrb[8].mxu1 %v3843_v24 }
 0x228   :  { %2058 = vmatprep.mubr.bf16.mxu1 %v3860_v45  ;;  %2328 = vmatpush1.bf16.msra.mxu1 %v3489_v10 }
 0x229   :  { %2329 = vmatprep.subr.bf16.mxu1 %v3494_v63 }
 0x22c   :  { %2330 = vmatpush1.bf16.msra.mxu1 %v3492_v14 }
 0x22d   :  { %2331 = vmatprep.subr.bf16.mxu1 %v3497_v15  ;;  %v2574_v15 = vunpack.c.l.bf16 %v2555_v55 }
 0x22f   :  { %2059 = vmatmul.mubr.bf16.gmra.mrb[12].mxu1 %v3857_v41 }
 0x230   :  { %2068 = vmatprep.mubr.bf16.mxu1 %v3874_v16  ;;  %2332 = vmatpush1.bf16.msra.mxu1 %v3495_v59 }
 0x231   :  { %2333 = vmatprep.subr.bf16.mxu1 %v3500_v17 }
 0x234   :  { %2334 = vmatpush1.bf16.msra.mxu1 %v3498_v18 }
 0x235   :  { %2335 = vmatprep.subr.bf16.mxu1 %v3503_v19 }
 0x237   :  { %2069 = vmatmul.mubr.bf16.gmra.mrb[16].mxu1 %v3871_v11 }
 0x238   :  { %2078 = vmatprep.mubr.bf16.mxu1 %v3888_v32  ;;  %2336 = vmatpush1.bf16.msra.mxu1 %v3501_v20  ;;  %v2575_v20 = vunpack.c.h.bf16 %v2555_v55 }
 0x239   :  { %2337 = vmatprep.subr.bf16.mxu1 %v3506_v21 }
 0x23c   :  { %2338 = vmatpush1.bf16.msra.mxu1 %v3504_v22 }
 0x23d   :  { %2339 = vmatprep.subr.bf16.mxu1 %v3509_v23 }
 0x23f   :  { %2079 = vmatmul.mubr.bf16.gmra.mrb[20].mxu1 %v3885_v6 }
 0x240   :  { %2088 = vmatprep.mubr.bf16.mxu1 %v3902_v5  ;;  %2340 = vmatpush1.bf16.msra.mxu1 %v3507_v25 }
 0x241   :  { %2341 = vmatprep.subr.bf16.mxu1 %v3512_v26  ;;  %v2556_v26 = vld [vmem:[#allocation3 + $0x30] sm:$0xff] }
 0x244   :  { %2342 = vmatpush1.bf16.msra.mxu1 %v3510_v40 }
 0x245   :  { %2343 = vmatprep.subr.bf16.mxu1 %v3515_v42 }
 0x247   :  { %2089 = vmatmul.mubr.bf16.gmra.mrb[24].mxu1 %v3899_v1 }
 0x248   :  { %2098 = vmatprep.mubr.bf16.mxu1 %v3916_v60  ;;  %2344 = vmatpush1.bf16.msra.mxu1 %v3513_v46 }
 0x249   :  { %2345 = vmatprep.subr.bf16.mxu1 %v3518_v48 }
 0x24c   :  { %2346 = vmatpush1.bf16.msra.mxu1 %v3516_v54 }
 0x24d   :  { %2347 = vmatprep.subr.bf16.mxu1 %v3521_v58  ;;  %v2557_v58 = vld [vmem:[#allocation3 + $0x38] sm:$0xff] }
 0x24f   :  { %2099 = vmatmul.mubr.bf16.gmra.mrb[28].mxu1 %v3913_v52 }
 0x250   :  { %2348 = vmatpush1.bf16.msra.mxu1 %v3519_v2  ;;  %2351 = vmatprep.mubr.bf16.mxu1 %v3846_v36  ;;  %v2508_v36 = vld [vmem:[%s4067_s6] sm:$0x3] }
 0x251   :  { %2349 = vmatprep.subr.bf16.mxu1 %v3524_v12 }
 0x254   :  { %2350 = vmatpush1.bf16.msra.mxu1 %v3522_v28  ;;  %v2576_v28 = vunpack.c.l.bf16 %v2556_v26 }
 0x257   :  { %2352 = vmatmul.mubr.bf16.vlgmr.msra.gmra.mrb[0].mxu1 %v3843_v24  ;;  %v2464_v24 = vld [vmem:[%s4066_s5] sm:$0x3]  ;;  %s3625_s5 = smov [#allocation9]  }
 0x258   :  { %2361 = vmatprep.mubr.bf16.mxu1 %v3860_v45  ;;  %v2552_v45 = vld [vmem:[#allocation3 + $0x10] sm:$0xff]  ;;  %s2787_s6 = sshll.u32 %s3625_s5, 4  ;;  %s2788_s6 = int_to_ptr.vmem [resolvable:$true] %s2787_s6 }
 0x259   :  { %v2569_v35 = vunpack.c.h.bf16 %v2552_v45  ;;  %s3591_s21 = scalar_lea.vmem %s2788_s6, 2560  ;;  %p3596_p11 = scmp.lt.s32.totalorder %s2788_s6, %s2788_s6 }
 0x25a   :  { %p3592_p10 = scmp.ne.s32.totalorder %s2788_s6, %s3591_s21  ;;  %p3597_p12 = scmp.lt.s32.totalorder %s3591_s21, %s3591_s21 }
 0x25c   :  { %p3598_p13 = por %p3597_p12, %p3596_p11 }
 0x25e   :  { %p3599_p0 = pnand %p3598_p13, %p3592_p10 }
 0x25f   :  { %2362 = vmatmul.mubr.bf16.gmra.mrb[4].mxu1 %v3857_v41  ;;  %v3971_v41 = vrot.slane %v2464_v24, %v3798_v8 }
 0x260   :  { %2371 = vmatprep.mubr.bf16.mxu1 %v3874_v16  ;;  %v3977_v16 = vrot.slane %v2508_v36, %v3798_v8 }
 0x267   :  { %2372 = vmatmul.mubr.bf16.gmra.mrb[8].mxu1 %v3871_v11  ;;  %v3974_v11 = vrot.slane %v2464_v24, %v3803_v27 }
 0x268   :  { %2381 = vmatprep.mubr.bf16.mxu1 %v3888_v32  ;;  %v2553_v32 = vld [vmem:[#allocation3 + $0x18] sm:$0xff] }
 0x269   :  { %v2570_v13 = vunpack.c.l.bf16 %v2553_v32  ;;  %v2571_v44 = vunpack.c.h.bf16 %v2553_v32  ;;  %v2577_v32 = vunpack.c.h.bf16 %v2556_v26 }
 0x26f   :  { %2382 = vmatmul.mubr.bf16.gmra.mrb[12].mxu1 %v3885_v6 }
 0x270   :  { %2391 = vmatprep.mubr.bf16.mxu1 %v3902_v5  ;;  %v2568_v5 = vunpack.c.l.bf16 %v2552_v45 }
 0x277   :  { %2392 = vmatmul.mubr.bf16.gmra.mrb[16].mxu1 %v3899_v1 }
 0x278   :  { %2401 = vmatprep.mubr.bf16.mxu1 %v3916_v60 }
 0x27f   :  { %2402 = vmatmul.mubr.bf16.gmra.mrb[20].mxu1 %v3913_v52 }
 0x280   :  { %2411 = vmatprep.mubr.bf16.mxu1 %v3928_v30 }
 0x287   :  { %2412 = vmatmul.mubr.bf16.gmra.mrb[24].mxu1 %v3926_v51 }
 0x288   :  { %2421 = vmatprep.mubr.bf16.mxu1 %v3624_v0 }
 0x28f   :  { %2422 = vmatmul.mubr.bf16.gmra.mrb[28].mxu1 %v3624_v0  ;;  %v3980_v0 = vrot.slane %v2508_v36, %v3803_v27 }
 0x32a   :  { %v2353_v6 = vpop.f32.mrb[0].mxu1 }
 0x32b   :  { %v2476_v1 = vmul.f32 %v3971_v41, %v2353_v6  ;;  %v2355_v52 = vpop.f32.mrb[1].mxu1 }
 0x32c   :  { %v2477_v60 = vmul.f32 %v3974_v11, %v2355_v52  ;;  %v2357_v37 = vpop.f32.mrb[2].mxu1 }
 0x32d   :  { %v2520_v38 = vadd.f32 %v3977_v16, %v2476_v1  ;;  %v2478_v39 = vmul.f32 %v3971_v41, %v2357_v37  ;;  %v2359_v8 = vpop.f32.mrb[3].mxu1 }
 0x32e   :  { %v2521_v43 = vadd.f32 %v3980_v0, %v2477_v60  ;;  %v2479_v27 = vmul.f32 %v3974_v11, %v2359_v8  ;;  %v2578_v60 = vunpack.c.l.bf16 %v2557_v58 }
 0x32f   :  { %v2600_v47 = vadd.f32 %v2568_v5, %v2520_v38  ;;  %v2522_v34 = vadd.f32 %v3977_v16, %v2478_v39 }
 0x330   :  { %v2601_v29 = vadd.f32 %v2569_v35, %v2521_v43  ;;  %v2523_v49 = vadd.f32 %v3980_v0, %v2479_v27 }
 0x331   :  { %v2632_v51 = vmax.f32 %v2600_v47, 0.0  ;;  %v2602_v30 = vadd.f32 %v2570_v13, %v2522_v34  ;;  %v2579_v13 = vunpack.c.h.bf16 %v2557_v58  ;;  %v2558_v47 = vld [vmem:[#allocation3 + $0x40] sm:$0xff] }
 0x332   :  { %v2633_v53 = vmax.f32 %v2601_v29, 0.0  ;;  %v2603_v31 = vadd.f32 %v2571_v44, %v2523_v49  ;;  %v2363_v33 = vpop.f32.mrb[4].mxu1 }
 0x333   :  { %v2634_v56 = vmax.f32 %v2602_v30, 0.0  ;;  %v2480_v57 = vmul.f32 %v3971_v41, %v2363_v33  ;;  %v2365_v62 = vpop.f32.mrb[5].mxu1  ;;  %v2559_v30 = vld [vmem:[#allocation3 + $0x48] sm:$0xff]  ;;  %v2580_v33 = vunpack.c.l.bf16 %v2558_v47 }
 0x334   :  { %v3056_v3 = vpack.c.bf16 %v2633_v53, %v2632_v51  ;;  %v2635_v4 = vmax.f32 %v2603_v31, 0.0  ;;  %v2481_v7 = vmul.f32 %v3974_v11, %v2365_v62  ;;  %v2367_v10 = vpop.f32.mrb[6].mxu1  ;;  %v2581_v62 = vunpack.c.h.bf16 %v2558_v47 }
 0x335   :  { %v2524_v63 = vadd.f32 %v3977_v16, %v2480_v57  ;;  %v2482_v14 = vmul.f32 %v3971_v41, %v2367_v10  ;;  %v2369_v59 = vpop.f32.mrb[7].mxu1 }
 0x336   :  { %2766 = vst [vmem:[#allocation9 + $0x10] sm:$0xff] %v3056_v3  ;;  %v3057_v17 = vpack.c.bf16 %v2635_v4, %v2634_v56  ;;  %v2525_v18 = vadd.f32 %v3980_v0, %v2481_v7  ;;  %v2483_v19 = vmul.f32 %v3974_v11, %v2369_v59  ;;  %v2583_v59 = vunpack.c.h.bf16 %v2559_v30 }
 0x337   :  { %v2604_v21 = vadd.f32 %v2572_v61, %v2524_v63  ;;  %v2526_v22 = vadd.f32 %v3977_v16, %v2482_v14 }
 0x338   :  { %2767 = vst [vmem:[#allocation9 + $0x18] sm:$0xff] %v3057_v17  ;;  %v2605_v23 = vadd.f32 %v2573_v9, %v2525_v18  ;;  %v2527_v25 = vadd.f32 %v3980_v0, %v2483_v19  ;;  %v2582_v9 = vunpack.c.l.bf16 %v2559_v30 }
 0x339   :  { %v2636_v40 = vmax.f32 %v2604_v21, 0.0  ;;  %v2606_v42 = vadd.f32 %v2574_v15, %v2526_v22  ;;  %v2560_v21 = vld [vmem:[#allocation3 + $0x50] sm:$0xff] }
 0x33a   :  { %v2637_v46 = vmax.f32 %v2605_v23, 0.0  ;;  %v2607_v48 = vadd.f32 %v2575_v20, %v2527_v25  ;;  %v2373_v54 = vpop.f32.mrb[8].mxu1 }
 0x33b   :  { %v2638_v2 = vmax.f32 %v2606_v42, 0.0  ;;  %v2484_v12 = vmul.f32 %v3971_v41, %v2373_v54  ;;  %v2375_v24 = vpop.f32.mrb[9].mxu1  ;;  %v2561_v42 = vld [vmem:[#allocation3 + $0x58] sm:$0xff]  ;;  %v2584_v54 = vunpack.c.l.bf16 %v2560_v21 }
 0x33c   :  { %v3058_v36 = vpack.c.bf16 %v2637_v46, %v2636_v40  ;;  %v2639_v45 = vmax.f32 %v2607_v48, 0.0  ;;  %v2485_v6 = vmul.f32 %v3974_v11, %v2375_v24  ;;  %v2377_v1 = vpop.f32.mrb[10].mxu1  ;;  %v2585_v24 = vunpack.c.h.bf16 %v2560_v21 }
 0x33d   :  { %v2528_v5 = vadd.f32 %v3977_v16, %v2484_v12  ;;  %v2486_v52 = vmul.f32 %v3971_v41, %v2377_v1  ;;  %v2379_v35 = vpop.f32.mrb[11].mxu1 }
 0x33e   :  { %2768 = vst [vmem:[#allocation9 + $0x20] sm:$0xff] %v3058_v36  ;;  %v3059_v37 = vpack.c.bf16 %v2639_v45, %v2638_v2  ;;  %v2529_v38 = vadd.f32 %v3980_v0, %v2485_v6  ;;  %v2487_v39 = vmul.f32 %v3974_v11, %v2379_v35  ;;  %v2587_v35 = vunpack.c.h.bf16 %v2561_v42 }
 0x33f   :  { %v2608_v8 = vadd.f32 %v2576_v28, %v2528_v5  ;;  %v2530_v43 = vadd.f32 %v3977_v16, %v2486_v52 }
 0x340   :  { %2769 = vst [vmem:[#allocation9 + $0x28] sm:$0xff] %v3059_v37  ;;  %v2609_v27 = vadd.f32 %v2577_v32, %v2529_v38  ;;  %v2531_v44 = vadd.f32 %v3980_v0, %v2487_v39  ;;  %v2586_v32 = vunpack.c.l.bf16 %v2561_v42 }
 0x341   :  { %v2640_v34 = vmax.f32 %v2608_v8, 0.0  ;;  %v2610_v29 = vadd.f32 %v2578_v60, %v2530_v43  ;;  %v2562_v8 = vld [vmem:[#allocation3 + $0x60] sm:$0xff] }
 0x342   :  { %v2641_v49 = vmax.f32 %v2609_v27, 0.0  ;;  %v2611_v50 = vadd.f32 %v2579_v13, %v2531_v44  ;;  %v2383_v51 = vpop.f32.mrb[12].mxu1 }
 0x343   :  { %v2642_v53 = vmax.f32 %v2610_v29, 0.0  ;;  %v2488_v31 = vmul.f32 %v3971_v41, %v2383_v51  ;;  %v2385_v55 = vpop.f32.mrb[13].mxu1  ;;  %v2563_v29 = vld [vmem:[#allocation3 + $0x68] sm:$0xff]  ;;  %v2588_v51 = vunpack.c.l.bf16 %v2562_v8 }
 0x344   :  { %v3060_v56 = vpack.c.bf16 %v2641_v49, %v2640_v34  ;;  %v2643_v57 = vmax.f32 %v2611_v50, 0.0  ;;  %v2489_v61 = vmul.f32 %v3974_v11, %v2385_v55  ;;  %v2387_v3 = vpop.f32.mrb[14].mxu1  ;;  %v2589_v55 = vunpack.c.h.bf16 %v2562_v8 }
 0x345   :  { %v2532_v4 = vadd.f32 %v3977_v16, %v2488_v31  ;;  %v2490_v7 = vmul.f32 %v3971_v41, %v2387_v3  ;;  %v2389_v10 = vpop.f32.mrb[15].mxu1 }
 0x346   :  { %2770 = vst [vmem:[#allocation9 + $0x30] sm:$0xff] %v3060_v56  ;;  %v3061_v63 = vpack.c.bf16 %v2643_v57, %v2642_v53  ;;  %v2533_v14 = vadd.f32 %v3980_v0, %v2489_v61  ;;  %v2491_v15 = vmul.f32 %v3974_v11, %v2389_v10  ;;  %v2591_v10 = vunpack.c.h.bf16 %v2563_v29 }
 0x347   :  { %v2612_v17 = vadd.f32 %v2580_v33, %v2532_v4  ;;  %v2534_v18 = vadd.f32 %v3977_v16, %v2490_v7 }
 0x348   :  { %2771 = vst [vmem:[#allocation9 + $0x38] sm:$0xff] %v3061_v63  ;;  %v2613_v19 = vadd.f32 %v2581_v62, %v2533_v14  ;;  %v2535_v20 = vadd.f32 %v3980_v0, %v2491_v15  ;;  %v2590_v62 = vunpack.c.l.bf16 %v2563_v29 }
 0x349   :  { %v2644_v22 = vmax.f32 %v2612_v17, 0.0  ;;  %v2614_v23 = vadd.f32 %v2582_v9, %v2534_v18  ;;  %v2564_v17 = vld [vmem:[#allocation3 + $0x70] sm:$0xff] }
 0x34a   :  { %v2645_v25 = vmax.f32 %v2613_v19, 0.0  ;;  %v2615_v26 = vadd.f32 %v2583_v59, %v2535_v20  ;;  %v2393_v40 = vpop.f32.mrb[16].mxu1 }
 0x34b   :  { %v2646_v46 = vmax.f32 %v2614_v23, 0.0  ;;  %v2492_v48 = vmul.f32 %v3971_v41, %v2393_v40  ;;  %v2395_v58 = vpop.f32.mrb[17].mxu1  ;;  %v2565_v23 = vld [vmem:[#allocation3 + $0x78] sm:$0xff]  ;;  %v2592_v40 = vunpack.c.l.bf16 %v2564_v17 }
 0x34c   :  { %v3062_v2 = vpack.c.bf16 %v2645_v25, %v2644_v22  ;;  %v2647_v12 = vmax.f32 %v2615_v26, 0.0  ;;  %v2493_v28 = vmul.f32 %v3974_v11, %v2395_v58  ;;  %v2397_v36 = vpop.f32.mrb[18].mxu1  ;;  %v2593_v58 = vunpack.c.h.bf16 %v2564_v17 }
 0x34d   :  { %v2536_v45 = vadd.f32 %v3977_v16, %v2492_v48  ;;  %v2494_v6 = vmul.f32 %v3971_v41, %v2397_v36  ;;  %v2399_v1 = vpop.f32.mrb[19].mxu1 }
 0x34e   :  { %2772 = vst [vmem:[#allocation9 + $0x40] sm:$0xff] %v3062_v2  ;;  %v3063_v5 = vpack.c.bf16 %v2647_v12, %v2646_v46  ;;  %v2537_v52 = vadd.f32 %v3980_v0, %v2493_v28  ;;  %v2495_v60 = vmul.f32 %v3974_v11, %v2399_v1  ;;  %v2595_v1 = vunpack.c.h.bf16 %v2565_v23 }
 0x34f   :  { %v2616_v37 = vadd.f32 %v2584_v54, %v2536_v45  ;;  %v2538_v38 = vadd.f32 %v3977_v16, %v2494_v6 }
 0x350   :  { %2773 = vst [vmem:[#allocation9 + $0x48] sm:$0xff] %v3063_v5  ;;  %v2617_v39 = vadd.f32 %v2585_v24, %v2537_v52  ;;  %v2539_v13 = vadd.f32 %v3980_v0, %v2495_v60  ;;  %v2594_v24 = vunpack.c.l.bf16 %v2565_v23 }
 0x351   :  { %v2648_v43 = vmax.f32 %v2616_v37, 0.0  ;;  %v2618_v27 = vadd.f32 %v2586_v32, %v2538_v38  ;;  %v2566_v37 = vld [vmem:[#allocation3 + $0x80] sm:$0xff] }
 0x352   :  { %v2649_v44 = vmax.f32 %v2617_v39, 0.0  ;;  %v2619_v47 = vadd.f32 %v2587_v35, %v2539_v13  ;;  %v2403_v34 = vpop.f32.mrb[20].mxu1 }
 0x353   :  { %v2650_v49 = vmax.f32 %v2618_v27, 0.0  ;;  %v2496_v50 = vmul.f32 %v3971_v41, %v2403_v34  ;;  %v2405_v30 = vpop.f32.mrb[21].mxu1  ;;  %v2567_v27 = vld [vmem:[#allocation3 + $0x88] sm:$0xff]  ;;  %v2596_v34 = vunpack.c.l.bf16 %v2566_v37 }
 0x354   :  { %v3064_v53 = vpack.c.bf16 %v2649_v44, %v2648_v43  ;;  %v2651_v31 = vmax.f32 %v2619_v47, 0.0  ;;  %v2497_v33 = vmul.f32 %v3974_v11, %v2405_v30  ;;  %v2407_v56 = vpop.f32.mrb[22].mxu1  ;;  %v2597_v30 = vunpack.c.h.bf16 %v2566_v37 }
 0x355   :  { %v2540_v57 = vadd.f32 %v3977_v16, %v2496_v50  ;;  %v2498_v61 = vmul.f32 %v3971_v41, %v2407_v56  ;;  %v2409_v3 = vpop.f32.mrb[23].mxu1 }
 0x356   :  { %2774 = vst [vmem:[#allocation9 + $0x50] sm:$0xff] %v3064_v53  ;;  %v3065_v4 = vpack.c.bf16 %v2651_v31, %v2650_v49  ;;  %v2541_v7 = vadd.f32 %v3980_v0, %v2497_v33  ;;  %v2499_v9 = vmul.f32 %v3974_v11, %v2409_v3  ;;  %v2599_v3 = vunpack.c.h.bf16 %v2567_v27 }
 0x357   :  { %v2620_v63 = vadd.f32 %v2588_v51, %v2540_v57  ;;  %v2542_v14 = vadd.f32 %v3977_v16, %v2498_v61 }
 0x358   :  { %2775 = vst [vmem:[#allocation9 + $0x58] sm:$0xff] %v3065_v4  ;;  %v2621_v15 = vadd.f32 %v2589_v55, %v2541_v7  ;;  %v2543_v59 = vadd.f32 %v3980_v0, %v2499_v9  ;;  %v2598_v55 = vunpack.c.l.bf16 %v2567_v27 }
 0x359   :  { %v2652_v18 = vmax.f32 %v2620_v63, 0.0  ;;  %v2622_v19 = vadd.f32 %v2590_v62, %v2542_v14 }
 0x35a   :  { %v2653_v20 = vmax.f32 %v2621_v15, 0.0  ;;  %v2623_v21 = vadd.f32 %v2591_v10, %v2543_v59  ;;  %v2413_v22 = vpop.f32.mrb[24].mxu1 }
 0x35b   :  { %v2654_v25 = vmax.f32 %v2622_v19, 0.0  ;;  %v2500_v26 = vmul.f32 %v3971_v41, %v2413_v22  ;;  %v2415_v42 = vpop.f32.mrb[25].mxu1 }
 0x35c   :  { %v3066_v46 = vpack.c.bf16 %v2653_v20, %v2652_v18  ;;  %v2655_v48 = vmax.f32 %v2623_v21, 0.0  ;;  %v2501_v54 = vmul.f32 %v3974_v11, %v2415_v42  ;;  %v2417_v2 = vpop.f32.mrb[26].mxu1 }
 0x35d   :  { %v2544_v12 = vadd.f32 %v3977_v16, %v2500_v26  ;;  %v2502_v28 = vmul.f32 %v3971_v41, %v2417_v2  ;;  %v2419_v36 = vpop.f32.mrb[27].mxu1 }
 0x35e   :  { %2776 = vst [vmem:[#allocation9 + $0x60] sm:$0xff] %v3066_v46  ;;  %v3067_v45 = vpack.c.bf16 %v2655_v48, %v2654_v25  ;;  %v2545_v6 = vadd.f32 %v3980_v0, %v2501_v54  ;;  %v2503_v32 = vmul.f32 %v3974_v11, %v2419_v36 }
 0x35f   :  { %v2624_v5 = vadd.f32 %v2592_v40, %v2544_v12  ;;  %v2546_v52 = vadd.f32 %v3977_v16, %v2502_v28 }
 0x360   :  { %2777 = vst [vmem:[#allocation9 + $0x68] sm:$0xff] %v3067_v45  ;;  %v2625_v60 = vadd.f32 %v2593_v58, %v2545_v6  ;;  %v2547_v35 = vadd.f32 %v3980_v0, %v2503_v32 }
 0x361   :  { %v2656_v38 = vmax.f32 %v2624_v5, 0.0  ;;  %v2626_v39 = vadd.f32 %v2594_v24, %v2546_v52 }
 0x362   :  { %v2657_v13 = vmax.f32 %v2625_v60, 0.0  ;;  %v2627_v8 = vadd.f32 %v2595_v1, %v2547_v35  ;;  %v2423_v43 = vpop.f32.mrb[28].mxu1 }
 0x363   :  { %v2658_v44 = vmax.f32 %v2626_v39, 0.0  ;;  %v2504_v47 = vmul.f32 %v3971_v41, %v2423_v43  ;;  %v2425_v29 = vpop.f32.mrb[29].mxu1 }
 0x364   :  { %v3068_v49 = vpack.c.bf16 %v2657_v13, %v2656_v38  ;;  %v2659_v50 = vmax.f32 %v2627_v8, 0.0  ;;  %v2505_v51 = vmul.f32 %v3974_v11, %v2425_v29  ;;  %v2427_v53 = vpop.f32.mrb[30].mxu1 }
 0x365   :  { %v2548_v31 = vadd.f32 %v3977_v16, %v2504_v47  ;;  %v2506_v33 = vmul.f32 %v3971_v41, %v2427_v53  ;;  %v2429_v56 = vpop.f32.mrb[31].mxu1 }
 0x366   :  { %2778 = vst [vmem:[#allocation9 + $0x70] sm:$0xff] %v3068_v49  ;;  %v3069_v57 = vpack.c.bf16 %v2659_v50, %v2658_v44  ;;  %v2549_v61 = vadd.f32 %v3980_v0, %v2505_v51  ;;  %v2507_v62 = vmul.f32 %v3974_v11, %v2429_v56 }
 0x367   :  { %v2628_v4 = vadd.f32 %v2596_v34, %v2548_v31  ;;  %v2550_v7 = vadd.f32 %v3977_v16, %v2506_v33 }
 0x368   :  { %2779 = vst [vmem:[#allocation9 + $0x78] sm:$0xff] %v3069_v57  ;;  %v2629_v9 = vadd.f32 %v2597_v30, %v2549_v61  ;;  %v2551_v10 = vadd.f32 %v3980_v0, %v2507_v62 }
 0x369   :  { %v2660_v63 = vmax.f32 %v2628_v4, 0.0  ;;  %v2630_v14 = vadd.f32 %v2598_v55, %v2550_v7 }
 0x36a   :  { %v2661_v15 = vmax.f32 %v2629_v9, 0.0  ;;  %v2631_v41 = vadd.f32 %v2599_v3, %v2551_v10 }
 0x36b   :  { %v2662_v59 = vmax.f32 %v2630_v14, 0.0 }
 0x36c   :  { %v3070_v17 = vpack.c.bf16 %v2661_v15, %v2660_v63  ;;  %v2663_v18 = vmax.f32 %v2631_v41, 0.0 }
 0x36e   :  { %2780 = vst [vmem:[#allocation9 + $0x80] sm:$0xff] %v3070_v17  ;;  %v3071_v19 = vpack.c.bf16 %v2663_v18, %v2662_v59 }
 0x370   :  { %2781 = vst [vmem:[#allocation9 + $0x88] sm:$0xff] %v3071_v19 }
 0x371   :  { %3602 = shalt.err (!%p3599_p0)
}
 0x372   :  { %s3603_s24 = scalar_lea.hbm %s4068_s7, 2560 }
 0x373   :  { %p3604_p1 = scmp.ne.s32.totalorder %s4068_s7, %s3603_s24  ;;  %p3607_p2 = scmp.lt.u32.totalorder %s3603_s24, %s4068_s7 }
 0x375   :  { %p3609_p3 = pnand %p3607_p2, %p3604_p1 }
 0x377   :  { %3612 = shalt.err (!%p3609_p3)
}
 0x378   :  { %2793 = dma.vmem_to_hbm [thread:$0]  %s2788_s6, 2560, %s4068_s7, [#allocation5], %s3621_s13, %s3621_s13, %s3622_s14  }
 0x379   :  { %3617 = dma.done.wait [#allocation5], 2560  }
 0x37a   :  { %3618 = vsyncadd [#allocation5], 4294964736 }
 0x37b   :  { %2797 = vsyncpa [#allocation4], 1 }
 0x37c   :  { %2798 = vsyncpa [#allocation7], 1 }
 0x37d   :  { %2799 = vsyncpa [#allocation5], 1 }

</bundles_post_ra>
